<compile_context>
chip_gen: v5e
topology: v5e:2x2
jax: 0.10.0
libtpu: 0.0.40
codegen_flags: <defaults>
</compile_context>

<pallas_src>
import math

import jax
import jax.numpy as jnp
from jax import lax
from jax.experimental import pallas as pl
from jax.experimental.pallas import tpu as pltpu


# ---------------------------------------------------------------------------
# Static configuration (mirrors FreqConv.__init__ / projection_init).
# ---------------------------------------------------------------------------
def calculate_order(c_in, s_in, pred_len, order, _unused=None):
    # TODO(synk): `calculate_order` is not provided in the spec; use a simple
    # schedule that pools the frequency axis by `order` (and multiplies the
    # channel count by `order`) each layer while the width still divides.
    order_in, order_out = [], []
    while s_in // order >= order:
        order_in.append(order)
        order_out.append(order)
        s_in //= order
    if not order_in:
        order_in, order_out = [1], [1]
    return len(order_in), order_in, order_out


def build_freqconv(key, c_in, inp_len, pred_len, kernel_size, dilation=1, order=2):
    """Initializes FreqConv parameters and pre-packs them for the kernel.

    All weight transposes / reshapes, pooling matrices and DFT matrices are
    computed ONCE here (hoisted out of the forward path).
    """
    assert inp_len % 2 == 1, "use odd inp_len so rfft width == (inp_len+1)//2"
    assert pred_len == inp_len, "the residual add requires pred_len == inp_len"
    assert c_in % 6 == 0, "conv channels are the concat of 6 rfft parts"

    padding = (kernel_size - 1) * (dilation - 1) + kernel_size - 1
    pad_front = padding // 2
    pad_behind = padding - pad_front

    freq_len = (inp_len + 1) // 2  # rfft length for odd inp_len
    n_layers, order_in, order_out = calculate_order(c_in, freq_len, pred_len,
                                                    order, None)

    # ---- raw (PyTorch-layout) parameters ----------------------------------
    conv_w, conv_b, widths = [], [], []
    s_in, s_out = freq_len, c_in
    for i in range(n_layers):
        widths.append(s_in)
        c_outi = order_out[i] * s_out
        key, kw, kb = jax.random.split(key, 3)
        bound = 1.0 / math.sqrt(s_out * kernel_size)
        conv_w.append(jax.random.uniform(kw, (c_outi, s_out, 1, kernel_size),
                                         jnp.float32, -bound, bound))
        conv_b.append(jax.random.uniform(kb, (c_outi,), jnp.float32,
                                         -bound, bound))
        s_in //= order_in[i]
        s_out = c_outi
    key, kw, kb = jax.random.split(key, 3)
    bound = 1.0 / math.sqrt(s_out * s_in)
    final_w = jax.random.uniform(kw, (pred_len, s_out, 1, s_in),
                                 jnp.float32, -bound, bound)
    final_b = jax.random.uniform(kb, (pred_len,), jnp.float32, -bound, bound)

    # ---- kernel-ready (pre-packed) parameters ------------------------------
    # Conv weight (C_out, C_in, 1, K) -> per-tap (K, C_in, C_out) so the kernel
    # computes (rows, C_in) x (C_in, C_out) with no in-kernel transpose.
    conv_wT = [jnp.transpose(w[:, :, 0, :], (2, 1, 0)) for w in conv_w]
    conv_bR = [b.reshape(1, -1) for b in conv_b]
    # AvgPool2d((1, p)) as a row-mix matrix: (Wo, W) applied to (W, C) rows.
    pool_mats = []
    for i in range(n_layers):
        w_in, p = widths[i], order_in[i]
        wo = w_in // p
        m = jnp.kron(jnp.eye(wo, dtype=jnp.float32),
                     jnp.full((1, p), 1.0 / p, jnp.float32))
        if w_in > wo * p:  # AvgPool drops the tail
            m = jnp.pad(m, ((0, 0), (0, w_in - wo * p)))
        pool_mats.append(m)
    # Final conv (P, C, 1, S) -> (S, C, P).
    final_wT = jnp.transpose(final_w[:, :, 0, :], (2, 1, 0))
    final_bR = final_b.reshape(1, -1)
    # rfft as two DFT contractions over the time axis.
    t = jnp.arange(inp_len, dtype=jnp.float32)[None, :]
    f = jnp.arange(freq_len, dtype=jnp.float32)[:, None]
    ang = 2.0 * jnp.pi * f * t / inp_len
    crT = jnp.cos(ang)                  # real part
    ciT = -jnp.sin(ang)                 # imag part

    params = dict(
        crT=crT, ciT=ciT,
        conv_wT=conv_wT, conv_bR=conv_bR, pool_mats=pool_mats,
        final_wT=final_wT, final_bR=final_bR,
        # raw torch-layout copies used only by the pure-JAX reference
        conv_w=conv_w, conv_b=conv_b, final_w=final_w, final_b=final_b,
    )
    cfg = dict(
        n_layers=n_layers, kernel_size=kernel_size, dilation=dilation,
        pad_front=pad_front, pad_behind=pad_behind,
        order_in=order_in, order_out=order_out,
        c_in=c_in, inp_len=inp_len, pred_len=pred_len, freq_len=freq_len,
    )
    return params, cfg


# ---------------------------------------------------------------------------
# Kernel.
# ---------------------------------------------------------------------------
def _rowmix(m, x):
    """sum_k m[r, k] * x[a, k, c] -> (A, R, C); exact f32 on the VPU.

    Used for the DFT (rows = frequencies) and for AvgPool-as-matmul.  All
    contraction lengths here are <= ~24, so a broadcast-multiply + sublane
    reduce is both exact and cheaper than spinning up the MXU.
    """
    return jnp.sum(m[None, :, :, None] * x[:, None, :, :], axis=2)


def _chanmix(x, w):
    """sum_c x[a, r, c] * w[c, d] -> (A, R, D); exact f32 on the VPU."""
    return jnp.sum(x[:, :, :, None] * w[None, None, :, :], axis=2)


def make_freqconv_kernel(cfg):
    n_layers = cfg["n_layers"]
    ksz = cfg["kernel_size"]
    dil = cfg["dilation"]
    pad_front = cfg["pad_front"]
    pad_behind = cfg["pad_behind"]

    def kernel(*refs):
        xcat_ref, res_ref, crt_ref, cit_ref = refs[:4]
        layer_refs = refs[4:4 + 3 * n_layers]
        wf_ref = refs[4 + 3 * n_layers]
        bf_ref = refs[5 + 3 * n_layers]
        o_ref = refs[6 + 3 * n_layers]

        crt = crt_ref[...]            # (F, T) real-part DFT matrix
        cit = cit_ref[...]            # (F, T) imag-part DFT matrix
        xa = xcat_ref[0, :, :, :]     # (A, T, 3D): columns [x1 | x2 | x3]
        num_series = xa.shape[0]

        # rfft via DFT, batched over the whole series (A) axis.  Lane order is
        # [imag(x1), imag(x2), imag(x3), real(x1), real(x2), real(x3)],
        # matching torch.cat((i1, i2, i3, r1, r2, r3), dim=2).
        h = jnp.concatenate([_rowmix(cit, xa), _rowmix(crt, xa)],
                            axis=2)                     # (A, F, 6D)

        for i in range(n_layers):
            w = layer_refs[3 * i][...]                  # (K, C_in, C_out)
            b = layer_refs[3 * i + 1][...]              # (1, C_out)
            pm = layer_refs[3 * i + 2][...]             # (W // p, W)
            c_in = w.shape[1]
            width = h.shape[1]
            # "same" padding along the frequency (row) axis.
            hp = jnp.concatenate(
                [jnp.zeros((num_series, pad_front, c_in), jnp.float32),
                 h,
                 jnp.zeros((num_series, pad_behind, c_in), jnp.float32)],
                axis=1)
            # Dilated (1, K) conv == K statically-shifted channel mixes.
            y = _chanmix(hp[:, 0:width, :], w[0])
            for kk in range(1, ksz):
                y = y + _chanmix(hp[:, kk * dil:kk * dil + width, :], w[kk])
            y = y + b[None, :, :]
            # AvgPool2d((1, p)) as a row-mix with the pre-built pool matrix.
            h = _rowmix(pm, y)                          # (A, W // p, C_out)

        # Final Conv2d((1, s_fin)) collapses the remaining frequency rows into
        # one row whose lanes are the pred_len output channels.
        wf = wf_ref[...]                                # (S, C, pred_len)
        yf = bf_ref[...][None, :, :]                    # (1, 1, pred_len)
        for wi in range(wf.shape[0]):
            yf = yf + _chanmix(h[:, wi:wi + 1, :], wf[wi])   # (A, 1, pred_len)

        # Residual: out[a, d, t] = (x1 + x2 + x3)[a, d, t] + yf[a, 0, t].
        o_ref[0, :, :, :] = (res_ref[0, :, :, :] + yf).astype(o_ref.dtype)

    return kernel


# ---------------------------------------------------------------------------
# Forward wrapper (one fused pallas_call).
# ---------------------------------------------------------------------------
def _cost_estimate(cfg, batch, num_series, d_feat, inputs, out_bytes):
    t_len = cfg["inp_len"]
    flops = 2 * 2 * cfg["freq_len"] * t_len * (3 * d_feat)      # DFT
    width, c_in = cfg["freq_len"], cfg["c_in"]
    for i in range(cfg["n_layers"]):
        c_out = c_in * cfg["order_out"][i]
        flops += 2 * cfg["kernel_size"] * width * c_in * c_out  # conv taps
        w_out = width // cfg["order_in"][i]
        flops += 2 * w_out * width * c_out                      # pool matmul
        width, c_in = w_out, c_out
    flops += 2 * width * c_in * cfg["pred_len"]                 # final conv
    flops += 2 * d_feat * t_len                                 # residual add
    flops *= batch * num_series
    bytes_accessed = int(sum(int(a.nbytes) for a in inputs)) + int(out_bytes)
    return pl.CostEstimate(flops=int(flops), transcendentals=0,
                           bytes_accessed=bytes_accessed)


def freqconv_forward(params, cfg, x1, x2, x3):
    """Runs the whole FreqConv forward as a single fused Pallas kernel."""
    batch, num_series, d_feat, t_len = x1.shape
    n_layers = cfg["n_layers"]
    assert t_len == cfg["inp_len"] and 6 * d_feat == cfg["c_in"]
    assert x2.shape == x1.shape and x3.shape == x1.shape

    # Tiny activation-side prep (all weight packing was hoisted to init time):
    # pack x1|x2|x3 time-major so the in-kernel DFT is a plain contraction,
    # and precompute the residual sum once (avoids an in-kernel transpose).
    xcat = jnp.concatenate(
        [jnp.transpose(x, (0, 1, 3, 2)) for x in (x1, x2, x3)], axis=-1)
    res = x1 + x2 + x3

    inputs = [xcat, res, params["crT"], params["ciT"]]
    for i in range(n_layers):
        inputs += [params["conv_wT"][i], params["conv_bR"][i],
                   params["pool_mats"][i]]
    inputs += [params["final_wT"], params["final_bR"]]

    def per_batch_spec(arr):
        rest = arr.shape[1:]
        return pl.BlockSpec((1,) + rest, lambda b, n=len(rest): (b,) + (0,) * n)

    def resident_spec(arr):
        # Constant block index -> fetched to VMEM once, resident for all steps.
        return pl.BlockSpec(arr.shape, lambda b, n=arr.ndim: (0,) * n)

    in_specs = [per_batch_spec(xcat), per_batch_spec(res)]
    in_specs += [resident_spec(a) for a in inputs[2:]]

    out_bytes = batch * num_series * d_feat * t_len * x1.dtype.itemsize

    return pl.pallas_call(
        make_freqconv_kernel(cfg),
        out_shape=jax.ShapeDtypeStruct(x1.shape, x1.dtype),
        grid=(batch,),
        in_specs=in_specs,
        out_specs=per_batch_spec(res),
        compiler_params=pltpu.CompilerParams(
            dimension_semantics=("parallel",)),   # megacore sharding on v7x
        cost_estimate=_cost_estimate(cfg, batch, num_series, d_feat,
                                     inputs, out_bytes),
    )(*inputs)


# ---------------------------------------------------------------------------
# Pure-JAX reference (independent of the kernel's DFT/matmul formulation).
# ---------------------------------------------------------------------------
def freqconv_reference(params, cfg, x1, x2, x3):
    n_layers = cfg["n_layers"]
    pf, pb = cfg["pad_front"], cfg["pad_behind"]
    dn = ("NCHW", "OIHW", "NCHW")

    f1, f2, f3 = jnp.fft.rfft(x1), jnp.fft.rfft(x2), jnp.fft.rfft(x3)
    h = jnp.concatenate([f1.imag, f2.imag, f3.imag, f1.real, f2.real, f3.real],
                        axis=2)
    h = jnp.swapaxes(h, 1, 2).astype(jnp.float32)         # (B, 6D, A, F)

    for i in range(n_layers):
        h = jnp.pad(h, ((0, 0), (0, 0), (0, 0), (pf, pb)))
        h = lax.conv_general_dilated(
            h, params["conv_w"][i], window_strides=(1, 1), padding="VALID",
            rhs_dilation=(1, cfg["dilation"]), dimension_numbers=dn,
            precision=lax.Precision.HIGHEST)
        h = h + params["conv_b"][i].reshape(1, -1, 1, 1)
        p = cfg["order_in"][i]
        wo = h.shape[-1] // p
        h = h[..., :wo * p].reshape(h.shape[:-1] + (wo, p)).mean(-1)

    y = lax.conv_general_dilated(
        h, params["final_w"], window_strides=(1, 1), padding="VALID",
        dimension_numbers=dn, precision=lax.Precision.HIGHEST)
    y = y + params["final_b"].reshape(1, -1, 1, 1)
    y = jnp.transpose(y, (0, 2, 3, 1))                     # (B, A, 1, pred_len)
    return y + x1 + x2 + x3


if __name__ == "__main__":
    # Small shapes consistent with the module:
    #   x1/x2/x3: (batch=2, series=4, feat=1, inp_len=15);  c_in = 6*feat = 6.
    B, A, D = 2, 4, 1
    inp_len = pred_len = 15              # residual add requires pred_len == inp_len
    c_in = 6 * D
    kernel_size, dilation, order = 3, 2, 2

    root = jax.random.PRNGKey(0)
    kp, k1, k2, k3 = jax.random.split(root, 4)
    params, cfg = build_freqconv(kp, c_in, inp_len, pred_len,
                                 kernel_size, dilation, order)

    x1 = jax.random.normal(k1, (B, A, D, inp_len), jnp.float32)
    x2 = jax.random.normal(k2, (B, A, D, inp_len), jnp.float32)
    x3 = jax.random.normal(k3, (B, A, D, inp_len), jnp.float32)

    out = freqconv_forward(params, cfg, x1, x2, x3)
    out = jax.block_until_ready(out)

    ref = freqconv_reference(params, cfg, x1, x2, x3)
    assert out.shape == (B, A, D, inp_len), out.shape
    max_err = float(jnp.max(jnp.abs(out - ref)))
    assert jnp.allclose(out, ref, atol=5e-4, rtol=5e-4), \
        f"mismatch vs reference: max_err={max_err}"

    print("KERNEL_OK")
</pallas_src>

<mosaic_0001>
module attributes {stable_mosaic.version = 11 : i64} {
  func.func @kernel(%arg0: i32, %arg1: memref<1x4x15x3xf32, #tpu.memory_space<vmem>>, %arg2: memref<1x4x1x15xf32, #tpu.memory_space<vmem>>, %arg3: memref<8x15xf32, #tpu.memory_space<vmem>>, %arg4: memref<8x15xf32, #tpu.memory_space<vmem>>, %arg5: memref<3x6x12xf32, #tpu.memory_space<vmem>>, %arg6: memref<1x12xf32, #tpu.memory_space<vmem>>, %arg7: memref<4x8xf32, #tpu.memory_space<vmem>>, %arg8: memref<3x12x24xf32, #tpu.memory_space<vmem>>, %arg9: memref<1x24xf32, #tpu.memory_space<vmem>>, %arg10: memref<2x4xf32, #tpu.memory_space<vmem>>, %arg11: memref<2x24x15xf32, #tpu.memory_space<vmem>>, %arg12: memref<1x15xf32, #tpu.memory_space<vmem>>, %arg13: memref<1x4x1x15xf32, #tpu.memory_space<vmem>>) attributes {dimension_semantics = [#tpu.dimension_semantics<parallel>], iteration_bounds = array<i64: 2>, scalar_prefetch = 0 : i64, scratch_operands = 0 : i64, tpu.core_type = #tpu.core_type<tc>, window_params = [{transform_indices = @transform_0, window_bounds = array<i64: 1, 4, 15, 3>}, {transform_indices = @transform_1, window_bounds = array<i64: 1, 4, 1, 15>}, {pipeline_mode = #tpu.pipeline_mode<synchronous>, transform_indices = @transform_2, window_bounds = array<i64: 8, 15>}, {pipeline_mode = #tpu.pipeline_mode<synchronous>, transform_indices = @transform_3, window_bounds = array<i64: 8, 15>}, {pipeline_mode = #tpu.pipeline_mode<synchronous>, transform_indices = @transform_4, window_bounds = array<i64: 3, 6, 12>}, {pipeline_mode = #tpu.pipeline_mode<synchronous>, transform_indices = @transform_5, window_bounds = array<i64: 1, 12>}, {pipeline_mode = #tpu.pipeline_mode<synchronous>, transform_indices = @transform_6, window_bounds = array<i64: 4, 8>}, {pipeline_mode = #tpu.pipeline_mode<synchronous>, transform_indices = @transform_7, window_bounds = array<i64: 3, 12, 24>}, {pipeline_mode = #tpu.pipeline_mode<synchronous>, transform_indices = @transform_8, window_bounds = array<i64: 1, 24>}, {pipeline_mode = #tpu.pipeline_mode<synchronous>, transform_indices = @transform_9, window_bounds = array<i64: 2, 4>}, {pipeline_mode = #tpu.pipeline_mode<synchronous>, transform_indices = @transform_10, window_bounds = array<i64: 2, 24, 15>}, {pipeline_mode = #tpu.pipeline_mode<synchronous>, transform_indices = @transform_11, window_bounds = array<i64: 1, 15>}, {transform_indices = @transform_12, window_bounds = array<i64: 1, 4, 1, 15>}]} {
    %c0 = arith.constant 0 : index
    %c0_0 = arith.constant 0 : index
    %0 = vector.load %arg3[%c0, %c0_0] : memref<8x15xf32, #tpu.memory_space<vmem>>, vector<8x15xf32>
    %c0_1 = arith.constant 0 : index
    %c0_2 = arith.constant 0 : index
    %1 = vector.load %arg4[%c0_1, %c0_2] : memref<8x15xf32, #tpu.memory_space<vmem>>, vector<8x15xf32>
    %c0_3 = arith.constant 0 : index
    %c0_4 = arith.constant 0 : index
    %c0_5 = arith.constant 0 : index
    %c0_6 = arith.constant 0 : index
    %2 = vector.load %arg1[%c0_3, %c0_4, %c0_5, %c0_6] : memref<1x4x15x3xf32, #tpu.memory_space<vmem>>, vector<1x4x15x3xf32>
    %3 = vector.shape_cast %2 : vector<1x4x15x3xf32> to vector<4x15x3xf32>
    %4 = vector.shape_cast %1 : vector<8x15xf32> to vector<1x8x15x1xf32>
    %5 = vector.shape_cast %3 : vector<4x15x3xf32> to vector<4x1x15x3xf32>
    %6 = vector.broadcast %4 : vector<1x8x15x1xf32> to vector<4x8x15x3xf32>
    %7 = vector.broadcast %5 : vector<4x1x15x3xf32> to vector<4x8x15x3xf32>
    %8 = arith.mulf %6, %7 : vector<4x8x15x3xf32>
    %cst = arith.constant dense<0.000000e+00> : vector<4x8x3xf32>
    %9 = vector.multi_reduction <add>, %8, %cst [2] : vector<4x8x15x3xf32> to vector<4x8x3xf32>
    %10 = vector.shape_cast %0 : vector<8x15xf32> to vector<1x8x15x1xf32>
    %11 = vector.shape_cast %3 : vector<4x15x3xf32> to vector<4x1x15x3xf32>
    %12 = vector.broadcast %10 : vector<1x8x15x1xf32> to vector<4x8x15x3xf32>
    %13 = vector.broadcast %11 : vector<4x1x15x3xf32> to vector<4x8x15x3xf32>
    %14 = arith.mulf %12, %13 : vector<4x8x15x3xf32>
    %cst_7 = arith.constant dense<0.000000e+00> : vector<4x8x3xf32>
    %15 = vector.multi_reduction <add>, %14, %cst_7 [2] : vector<4x8x15x3xf32> to vector<4x8x3xf32>
    %16 = tpu.concatenate %9, %15 in 2 : vector<4x8x3xf32>, vector<4x8x3xf32> -> vector<4x8x6xf32>
    %c0_8 = arith.constant 0 : index
    %c0_9 = arith.constant 0 : index
    %c0_10 = arith.constant 0 : index
    %17 = vector.load %arg5[%c0_8, %c0_9, %c0_10] : memref<3x6x12xf32, #tpu.memory_space<vmem>>, vector<3x6x12xf32>
    %c0_11 = arith.constant 0 : index
    %c0_12 = arith.constant 0 : index
    %18 = vector.load %arg6[%c0_11, %c0_12] : memref<1x12xf32, #tpu.memory_space<vmem>>, vector<1x12xf32>
    %c0_13 = arith.constant 0 : index
    %c0_14 = arith.constant 0 : index
    %19 = vector.load %arg7[%c0_13, %c0_14] : memref<4x8xf32, #tpu.memory_space<vmem>>, vector<4x8xf32>
    %cst_15 = arith.constant 0.000000e+00 : f32
    %20 = vector.broadcast %cst_15 : f32 to vector<4x2x6xf32>
    %cst_16 = arith.constant 0.000000e+00 : f32
    %21 = vector.broadcast %cst_16 : f32 to vector<4x2x6xf32>
    %22 = tpu.concatenate %20, %16, %21 in 1 : vector<4x2x6xf32>, vector<4x8x6xf32>, vector<4x2x6xf32> -> vector<4x12x6xf32>
    %23 = vector.extract_strided_slice %22 {offsets = [0, 0, 0], sizes = [4, 8, 6], strides = [1, 1, 1]} : vector<4x12x6xf32> to vector<4x8x6xf32>
    %24 = vector.extract_strided_slice %17 {offsets = [0, 0, 0], sizes = [1, 6, 12], strides = [1, 1, 1]} : vector<3x6x12xf32> to vector<1x6x12xf32>
    %25 = vector.shape_cast %24 : vector<1x6x12xf32> to vector<6x12xf32>
    %26 = vector.shape_cast %23 : vector<4x8x6xf32> to vector<4x8x6x1xf32>
    %27 = vector.shape_cast %25 : vector<6x12xf32> to vector<1x1x6x12xf32>
    %28 = vector.broadcast %26 : vector<4x8x6x1xf32> to vector<4x8x6x12xf32>
    %29 = vector.broadcast %27 : vector<1x1x6x12xf32> to vector<4x8x6x12xf32>
    %30 = arith.mulf %28, %29 : vector<4x8x6x12xf32>
    %cst_17 = arith.constant dense<0.000000e+00> : vector<4x8x12xf32>
    %31 = vector.multi_reduction <add>, %30, %cst_17 [2] : vector<4x8x6x12xf32> to vector<4x8x12xf32>
    %32 = vector.extract_strided_slice %22 {offsets = [0, 2, 0], sizes = [4, 8, 6], strides = [1, 1, 1]} : vector<4x12x6xf32> to vector<4x8x6xf32>
    %33 = vector.extract_strided_slice %17 {offsets = [1, 0, 0], sizes = [1, 6, 12], strides = [1, 1, 1]} : vector<3x6x12xf32> to vector<1x6x12xf32>
    %34 = vector.shape_cast %33 : vector<1x6x12xf32> to vector<6x12xf32>
    %35 = vector.shape_cast %32 : vector<4x8x6xf32> to vector<4x8x6x1xf32>
    %36 = vector.shape_cast %34 : vector<6x12xf32> to vector<1x1x6x12xf32>
    %37 = vector.broadcast %35 : vector<4x8x6x1xf32> to vector<4x8x6x12xf32>
    %38 = vector.broadcast %36 : vector<1x1x6x12xf32> to vector<4x8x6x12xf32>
    %39 = arith.mulf %37, %38 : vector<4x8x6x12xf32>
    %cst_18 = arith.constant dense<0.000000e+00> : vector<4x8x12xf32>
    %40 = vector.multi_reduction <add>, %39, %cst_18 [2] : vector<4x8x6x12xf32> to vector<4x8x12xf32>
    %41 = arith.addf %31, %40 : vector<4x8x12xf32>
    %42 = vector.extract_strided_slice %22 {offsets = [0, 4, 0], sizes = [4, 8, 6], strides = [1, 1, 1]} : vector<4x12x6xf32> to vector<4x8x6xf32>
    %43 = vector.extract_strided_slice %17 {offsets = [2, 0, 0], sizes = [1, 6, 12], strides = [1, 1, 1]} : vector<3x6x12xf32> to vector<1x6x12xf32>
    %44 = vector.shape_cast %43 : vector<1x6x12xf32> to vector<6x12xf32>
    %45 = vector.shape_cast %42 : vector<4x8x6xf32> to vector<4x8x6x1xf32>
    %46 = vector.shape_cast %44 : vector<6x12xf32> to vector<1x1x6x12xf32>
    %47 = vector.broadcast %45 : vector<4x8x6x1xf32> to vector<4x8x6x12xf32>
    %48 = vector.broadcast %46 : vector<1x1x6x12xf32> to vector<4x8x6x12xf32>
    %49 = arith.mulf %47, %48 : vector<4x8x6x12xf32>
    %cst_19 = arith.constant dense<0.000000e+00> : vector<4x8x12xf32>
    %50 = vector.multi_reduction <add>, %49, %cst_19 [2] : vector<4x8x6x12xf32> to vector<4x8x12xf32>
    %51 = arith.addf %41, %50 : vector<4x8x12xf32>
    %52 = vector.shape_cast %18 : vector<1x12xf32> to vector<1x1x12xf32>
    %53 = vector.broadcast %52 : vector<1x1x12xf32> to vector<4x8x12xf32>
    %54 = arith.addf %51, %53 : vector<4x8x12xf32>
    %55 = vector.shape_cast %19 : vector<4x8xf32> to vector<1x4x8x1xf32>
    %56 = vector.shape_cast %54 : vector<4x8x12xf32> to vector<4x1x8x12xf32>
    %57 = vector.broadcast %55 : vector<1x4x8x1xf32> to vector<4x4x8x12xf32>
    %58 = vector.broadcast %56 : vector<4x1x8x12xf32> to vector<4x4x8x12xf32>
    %59 = arith.mulf %57, %58 : vector<4x4x8x12xf32>
    %cst_20 = arith.constant dense<0.000000e+00> : vector<4x4x12xf32>
    %60 = vector.multi_reduction <add>, %59, %cst_20 [2] : vector<4x4x8x12xf32> to vector<4x4x12xf32>
    %c0_21 = arith.constant 0 : index
    %c0_22 = arith.constant 0 : index
    %c0_23 = arith.constant 0 : index
    %61 = vector.load %arg8[%c0_21, %c0_22, %c0_23] : memref<3x12x24xf32, #tpu.memory_space<vmem>>, vector<3x12x24xf32>
    %c0_24 = arith.constant 0 : index
    %c0_25 = arith.constant 0 : index
    %62 = vector.load %arg9[%c0_24, %c0_25] : memref<1x24xf32, #tpu.memory_space<vmem>>, vector<1x24xf32>
    %c0_26 = arith.constant 0 : index
    %c0_27 = arith.constant 0 : index
    %63 = vector.load %arg10[%c0_26, %c0_27] : memref<2x4xf32, #tpu.memory_space<vmem>>, vector<2x4xf32>
    %cst_28 = arith.constant 0.000000e+00 : f32
    %64 = vector.broadcast %cst_28 : f32 to vector<4x2x12xf32>
    %cst_29 = arith.constant 0.000000e+00 : f32
    %65 = vector.broadcast %cst_29 : f32 to vector<4x2x12xf32>
    %66 = tpu.concatenate %64, %60, %65 in 1 : vector<4x2x12xf32>, vector<4x4x12xf32>, vector<4x2x12xf32> -> vector<4x8x12xf32>
    %67 = vector.extract_strided_slice %66 {offsets = [0, 0, 0], sizes = [4, 4, 12], strides = [1, 1, 1]} : vector<4x8x12xf32> to vector<4x4x12xf32>
    %68 = vector.extract_strided_slice %61 {offsets = [0, 0, 0], sizes = [1, 12, 24], strides = [1, 1, 1]} : vector<3x12x24xf32> to vector<1x12x24xf32>
    %69 = vector.shape_cast %68 : vector<1x12x24xf32> to vector<12x24xf32>
    %70 = vector.shape_cast %67 : vector<4x4x12xf32> to vector<4x4x12x1xf32>
    %71 = vector.shape_cast %69 : vector<12x24xf32> to vector<1x1x12x24xf32>
    %72 = vector.broadcast %70 : vector<4x4x12x1xf32> to vector<4x4x12x24xf32>
    %73 = vector.broadcast %71 : vector<1x1x12x24xf32> to vector<4x4x12x24xf32>
    %74 = arith.mulf %72, %73 : vector<4x4x12x24xf32>
    %cst_30 = arith.constant dense<0.000000e+00> : vector<4x4x24xf32>
    %75 = vector.multi_reduction <add>, %74, %cst_30 [2] : vector<4x4x12x24xf32> to vector<4x4x24xf32>
    %76 = vector.extract_strided_slice %66 {offsets = [0, 2, 0], sizes = [4, 4, 12], strides = [1, 1, 1]} : vector<4x8x12xf32> to vector<4x4x12xf32>
    %77 = vector.extract_strided_slice %61 {offsets = [1, 0, 0], sizes = [1, 12, 24], strides = [1, 1, 1]} : vector<3x12x24xf32> to vector<1x12x24xf32>
    %78 = vector.shape_cast %77 : vector<1x12x24xf32> to vector<12x24xf32>
    %79 = vector.shape_cast %76 : vector<4x4x12xf32> to vector<4x4x12x1xf32>
    %80 = vector.shape_cast %78 : vector<12x24xf32> to vector<1x1x12x24xf32>
    %81 = vector.broadcast %79 : vector<4x4x12x1xf32> to vector<4x4x12x24xf32>
    %82 = vector.broadcast %80 : vector<1x1x12x24xf32> to vector<4x4x12x24xf32>
    %83 = arith.mulf %81, %82 : vector<4x4x12x24xf32>
    %cst_31 = arith.constant dense<0.000000e+00> : vector<4x4x24xf32>
    %84 = vector.multi_reduction <add>, %83, %cst_31 [2] : vector<4x4x12x24xf32> to vector<4x4x24xf32>
    %85 = arith.addf %75, %84 : vector<4x4x24xf32>
    %86 = vector.extract_strided_slice %66 {offsets = [0, 4, 0], sizes = [4, 4, 12], strides = [1, 1, 1]} : vector<4x8x12xf32> to vector<4x4x12xf32>
    %87 = vector.extract_strided_slice %61 {offsets = [2, 0, 0], sizes = [1, 12, 24], strides = [1, 1, 1]} : vector<3x12x24xf32> to vector<1x12x24xf32>
    %88 = vector.shape_cast %87 : vector<1x12x24xf32> to vector<12x24xf32>
    %89 = vector.shape_cast %86 : vector<4x4x12xf32> to vector<4x4x12x1xf32>
    %90 = vector.shape_cast %88 : vector<12x24xf32> to vector<1x1x12x24xf32>
    %91 = vector.broadcast %89 : vector<4x4x12x1xf32> to vector<4x4x12x24xf32>
    %92 = vector.broadcast %90 : vector<1x1x12x24xf32> to vector<4x4x12x24xf32>
    %93 = arith.mulf %91, %92 : vector<4x4x12x24xf32>
    %cst_32 = arith.constant dense<0.000000e+00> : vector<4x4x24xf32>
    %94 = vector.multi_reduction <add>, %93, %cst_32 [2] : vector<4x4x12x24xf32> to vector<4x4x24xf32>
    %95 = arith.addf %85, %94 : vector<4x4x24xf32>
    %96 = vector.shape_cast %62 : vector<1x24xf32> to vector<1x1x24xf32>
    %97 = vector.broadcast %96 : vector<1x1x24xf32> to vector<4x4x24xf32>
    %98 = arith.addf %95, %97 : vector<4x4x24xf32>
    %99 = vector.shape_cast %63 : vector<2x4xf32> to vector<1x2x4x1xf32>
    %100 = vector.shape_cast %98 : vector<4x4x24xf32> to vector<4x1x4x24xf32>
    %101 = vector.broadcast %99 : vector<1x2x4x1xf32> to vector<4x2x4x24xf32>
    %102 = vector.broadcast %100 : vector<4x1x4x24xf32> to vector<4x2x4x24xf32>
    %103 = arith.mulf %101, %102 : vector<4x2x4x24xf32>
    %cst_33 = arith.constant dense<0.000000e+00> : vector<4x2x24xf32>
    %104 = vector.multi_reduction <add>, %103, %cst_33 [2] : vector<4x2x4x24xf32> to vector<4x2x24xf32>
    %c0_34 = arith.constant 0 : index
    %c0_35 = arith.constant 0 : index
    %c0_36 = arith.constant 0 : index
    %105 = vector.load %arg11[%c0_34, %c0_35, %c0_36] : memref<2x24x15xf32, #tpu.memory_space<vmem>>, vector<2x24x15xf32>
    %c0_37 = arith.constant 0 : index
    %c0_38 = arith.constant 0 : index
    %106 = vector.load %arg12[%c0_37, %c0_38] : memref<1x15xf32, #tpu.memory_space<vmem>>, vector<1x15xf32>
    %107 = vector.shape_cast %106 : vector<1x15xf32> to vector<1x1x15xf32>
    %108 = vector.extract_strided_slice %104 {offsets = [0, 0, 0], sizes = [4, 1, 24], strides = [1, 1, 1]} : vector<4x2x24xf32> to vector<4x1x24xf32>
    %109 = vector.extract_strided_slice %105 {offsets = [0, 0, 0], sizes = [1, 24, 15], strides = [1, 1, 1]} : vector<2x24x15xf32> to vector<1x24x15xf32>
    %110 = vector.shape_cast %109 : vector<1x24x15xf32> to vector<24x15xf32>
    %111 = vector.shape_cast %108 : vector<4x1x24xf32> to vector<4x1x24x1xf32>
    %112 = vector.shape_cast %110 : vector<24x15xf32> to vector<1x1x24x15xf32>
    %113 = vector.broadcast %111 : vector<4x1x24x1xf32> to vector<4x1x24x15xf32>
    %114 = vector.broadcast %112 : vector<1x1x24x15xf32> to vector<4x1x24x15xf32>
    %115 = arith.mulf %113, %114 : vector<4x1x24x15xf32>
    %cst_39 = arith.constant dense<0.000000e+00> : vector<4x1x15xf32>
    %116 = vector.multi_reduction <add>, %115, %cst_39 [2] : vector<4x1x24x15xf32> to vector<4x1x15xf32>
    %117 = vector.broadcast %107 : vector<1x1x15xf32> to vector<4x1x15xf32>
    %118 = arith.addf %117, %116 : vector<4x1x15xf32>
    %119 = vector.extract_strided_slice %104 {offsets = [0, 1, 0], sizes = [4, 1, 24], strides = [1, 1, 1]} : vector<4x2x24xf32> to vector<4x1x24xf32>
    %120 = vector.extract_strided_slice %105 {offsets = [1, 0, 0], sizes = [1, 24, 15], strides = [1, 1, 1]} : vector<2x24x15xf32> to vector<1x24x15xf32>
    %121 = vector.shape_cast %120 : vector<1x24x15xf32> to vector<24x15xf32>
    %122 = vector.shape_cast %119 : vector<4x1x24xf32> to vector<4x1x24x1xf32>
    %123 = vector.shape_cast %121 : vector<24x15xf32> to vector<1x1x24x15xf32>
    %124 = vector.broadcast %122 : vector<4x1x24x1xf32> to vector<4x1x24x15xf32>
    %125 = vector.broadcast %123 : vector<1x1x24x15xf32> to vector<4x1x24x15xf32>
    %126 = arith.mulf %124, %125 : vector<4x1x24x15xf32>
    %cst_40 = arith.constant dense<0.000000e+00> : vector<4x1x15xf32>
    %127 = vector.multi_reduction <add>, %126, %cst_40 [2] : vector<4x1x24x15xf32> to vector<4x1x15xf32>
    %128 = arith.addf %118, %127 : vector<4x1x15xf32>
    %c0_41 = arith.constant 0 : index
    %c0_42 = arith.constant 0 : index
    %c0_43 = arith.constant 0 : index
    %c0_44 = arith.constant 0 : index
    %129 = vector.load %arg2[%c0_41, %c0_42, %c0_43, %c0_44] : memref<1x4x1x15xf32, #tpu.memory_space<vmem>>, vector<1x4x1x15xf32>
    %130 = vector.shape_cast %129 : vector<1x4x1x15xf32> to vector<4x1x15xf32>
    %131 = arith.addf %130, %128 : vector<4x1x15xf32>
    %c0_45 = arith.constant 0 : index
    %c0_46 = arith.constant 0 : index
    %c0_47 = arith.constant 0 : index
    %c0_48 = arith.constant 0 : index
    %132 = vector.load %arg13[%c0_45, %c0_46, %c0_47, %c0_48] : memref<1x4x1x15xf32, #tpu.memory_space<vmem>>, vector<1x4x1x15xf32>
    %133 = vector.shape_cast %132 : vector<1x4x1x15xf32> to vector<4x1x15xf32>
    %134 = vector.shape_cast %131 : vector<4x1x15xf32> to vector<1x4x1x15xf32>
    tpu.vector_store %arg13[%c0_45, %c0_46, %c0_47, %c0_48], %134 {strides = array<i32>} : memref<1x4x1x15xf32, #tpu.memory_space<vmem>>, vector<1x4x1x15xf32>,
    return
  }
  func.func @transform_0(%arg0: i32) -> (i32, i32, i32, i32) {
    %c0_i32 = arith.constant 0 : i32
    %c0_i32_0 = arith.constant 0 : i32
    %c0_i32_1 = arith.constant 0 : i32
    %c0_i32_2 = arith.constant 0 : i32
    return %arg0, %c0_i32, %c0_i32_0, %c0_i32_1 : i32, i32, i32, i32
  }
  func.func @transform_1(%arg0: i32) -> (i32, i32, i32, i32) {
    %c0_i32 = arith.constant 0 : i32
    %c0_i32_0 = arith.constant 0 : i32
    %c0_i32_1 = arith.constant 0 : i32
    %c0_i32_2 = arith.constant 0 : i32
    return %arg0, %c0_i32, %c0_i32_0, %c0_i32_1 : i32, i32, i32, i32
  }
  func.func @transform_2(%arg0: i32) -> (i32, i32) {
    %c0_i32 = arith.constant 0 : i32
    %c0_i32_0 = arith.constant 0 : i32
    %c0_i32_1 = arith.constant 0 : i32
    return %c0_i32, %c0_i32_0 : i32, i32
  }
  func.func @transform_3(%arg0: i32) -> (i32, i32) {
    %c0_i32 = arith.constant 0 : i32
    %c0_i32_0 = arith.constant 0 : i32
    %c0_i32_1 = arith.constant 0 : i32
    return %c0_i32, %c0_i32_0 : i32, i32
  }
  func.func @transform_4(%arg0: i32) -> (i32, i32, i32) {
    %c0_i32 = arith.constant 0 : i32
    %c0_i32_0 = arith.constant 0 : i32
    %c0_i32_1 = arith.constant 0 : i32
    %c0_i32_2 = arith.constant 0 : i32
    return %c0_i32, %c0_i32_0, %c0_i32_1 : i32, i32, i32
  }
  func.func @transform_5(%arg0: i32) -> (i32, i32) {
    %c0_i32 = arith.constant 0 : i32
    %c0_i32_0 = arith.constant 0 : i32
    %c0_i32_1 = arith.constant 0 : i32
    return %c0_i32, %c0_i32_0 : i32, i32
  }
  func.func @transform_6(%arg0: i32) -> (i32, i32) {
    %c0_i32 = arith.constant 0 : i32
    %c0_i32_0 = arith.constant 0 : i32
    %c0_i32_1 = arith.constant 0 : i32
    return %c0_i32, %c0_i32_0 : i32, i32
  }
  func.func @transform_7(%arg0: i32) -> (i32, i32, i32) {
    %c0_i32 = arith.constant 0 : i32
    %c0_i32_0 = arith.constant 0 : i32
    %c0_i32_1 = arith.constant 0 : i32
    %c0_i32_2 = arith.constant 0 : i32
    return %c0_i32, %c0_i32_0, %c0_i32_1 : i32, i32, i32
  }
  func.func @transform_8(%arg0: i32) -> (i32, i32) {
    %c0_i32 = arith.constant 0 : i32
    %c0_i32_0 = arith.constant 0 : i32
    %c0_i32_1 = arith.constant 0 : i32
    return %c0_i32, %c0_i32_0 : i32, i32
  }
  func.func @transform_9(%arg0: i32) -> (i32, i32) {
    %c0_i32 = arith.constant 0 : i32
    %c0_i32_0 = arith.constant 0 : i32
    %c0_i32_1 = arith.constant 0 : i32
    return %c0_i32, %c0_i32_0 : i32, i32
  }
  func.func @transform_10(%arg0: i32) -> (i32, i32, i32) {
    %c0_i32 = arith.constant 0 : i32
    %c0_i32_0 = arith.constant 0 : i32
    %c0_i32_1 = arith.constant 0 : i32
    %c0_i32_2 = arith.constant 0 : i32
    return %c0_i32, %c0_i32_0, %c0_i32_1 : i32, i32, i32
  }
  func.func @transform_11(%arg0: i32) -> (i32, i32) {
    %c0_i32 = arith.constant 0 : i32
    %c0_i32_0 = arith.constant 0 : i32
    %c0_i32_1 = arith.constant 0 : i32
    return %c0_i32, %c0_i32_0 : i32, i32
  }
  func.func @transform_12(%arg0: i32) -> (i32, i32, i32, i32) {
    %c0_i32 = arith.constant 0 : i32
    %c0_i32_0 = arith.constant 0 : i32
    %c0_i32_1 = arith.constant 0 : i32
    %c0_i32_2 = arith.constant 0 : i32
    return %arg0, %c0_i32, %c0_i32_0, %c0_i32_1 : i32, i32, i32, i32
  }
}

</mosaic_0001>

<bundles_post_ra>
// kernel: tpu_custom_call.1
= control target key start
LH: loop header
LB: loop body
LE: loop exit
PB: predicated region body
PF: predicated region fallthrough
CT: control target
= control target key end

     0   :  { %s6971_s0 = inlined_call_operand.vmem [shape: f32[2,4,15,3], index: 0, kind: input, shape index: {}]   ;;  %s6972_s1 = inlined_call_operand.vmem [shape: f32[2,4,1,15], index: 1, kind: input, shape index: {}]   ;;  %s6973_s2 = inlined_call_operand.vmem [shape: f32[8,15], index: 2, kind: input, shape index: {}]   ;;  %s6974_s3 = inlined_call_operand.vmem [shape: f32[8,15], index: 3, kind: input, shape index: {}]   ;;  %s6975_s4 = inlined_call_operand.vmem [shape: f32[3,6,12], index: 4, kind: input, shape index: {}]   ;;  %s6976_s5 = inlined_call_operand.vmem [shape: f32[1,12], index: 5, kind: input, shape index: {}]   ;;  %s6977_s6 = inlined_call_operand.vmem [shape: f32[4,8], index: 6, kind: input, shape index: {}]   ;;  %s6978_s7 = inlined_call_operand.vmem [shape: f32[3,12,24], index: 7, kind: input, shape index: {}]   ;;  %s6979_s8 = inlined_call_operand.vmem [shape: f32[1,24], index: 8, kind: input, shape index: {}]   ;;  %s6980_s9 = inlined_call_operand.vmem [shape: f32[2,4], index: 9, kind: input, shape index: {}]   ;;  %s6981_s10 = inlined_call_operand.vmem [shape: f32[2,24,15], index: 10, kind: input, shape index: {}]   ;;  %s6982_s11 = inlined_call_operand.vmem [shape: f32[1,15], index: 11, kind: input, shape index: {}]   ;;  %s6983_s12 = inlined_call_operand.hbm [shape: f32[2,4,1,15], index: 12, kind: output, shape index: {}]  }
   0x1   :  { %7013 = sst [smem:[#allocation30_spill]] %s6971_s0 }
   0x2   :  { %7014 = sst [smem:[#allocation31_spill]] %s6972_s1 }
   0x3   :  { %17 = vsyncpa [#allocation3], 0 }
   0x4   :  { %19 = vsyncpa [#allocation3 + $0x1], 0  ;;  %s4800_s21 = smov 0   ;;  %s4802_s22 = smov 0  }
   0x5   :  { %s4804_s23 = smov 0   ;;  %s4806_s24 = smov 0  }
   0x6 LB: > { %s4821_s25 = sadd.s32 4294967295, %s4730_s24   ;;  %s4521_s26 = sadd.s32 4294967294, %s4730_s24   ;;  %s4730_s24 = sphi %s4806_s24, %s7097_s24   ;;  %s4726_s23 = sphi %s4804_s23, %s7096_s23   ;;  %s4722_s22 = sphi %s4802_s22, %s7095_s22   ;;  %s4718_s21 = sphi %s4800_s21, %s7094_s21  }
   0x7   : > { %s4825_s27 = sadd.s32 1, %s4730_s24   ;;  %s294_s28 = sadd.s32 1, %s4726_s23 }
   0x8   : > { %s291_s29 = ssub.s32 %s4730_s24, %s4825_s27  ;;  %p304_p0 = scmp.ne.s32.totalorder %s4726_s23, %s4722_s22 }
   0x9   : > { %p292_p1 = scmp.eq.s32.totalorder %s291_s29, 0  ;;  %p305_p2 = scmp.eq.s32.totalorder %s4821_s25, 1 }
   0xa   : > { %p310_p3 = scmp.ne.s32.totalorder %s4722_s22, %s4718_s21  ;;  %p311_p4 = scmp.eq.s32.totalorder %s4521_s26, 1 }
   0xb   : > { %s4836_s30 = scalar_select %p292_p1, %s4726_s23, %s294_s28  }
   0xc   : > { %p4838_p5 = por %p305_p2, %p304_p0  ;;  %p4842_p6 = por %p311_p4, %p310_p3 }
   0xd   : > { %p4524_p7 = scmp.ge.s32.totalorder %s4730_s24, 1  ;;  %p374_p8 = scmp.lt.s32.totalorder %s4730_s24, 3 }
   0xf   : > { %p375_p9 = pnand %p4524_p7, %p374_p8 }
  0x11   : > { %378 = sbr.rel (%p375_p9) target bundleno = 1431 (0x597), region = 68 }
  0x16   : > { %v440_v0 = vlaneseq  ;;  %v430_v3 = vld [vmem:[%s6974_s3] sm:$0xff]  ;;  %p420_p10 = scmp.lt.s32.totalorder %s4821_s25, 1  ;;  %s7019_s0 = sld [smem:[#allocation30_spill]]  ;;  %vm609_vm0 = vcmask 22528   ;;  %vm607_vm1 = vcmask 23552   ;;  %vm1385_vm2 = vcmask 1041409  }
  0x17   : > { %v452_v4 = vperm.slane %v430_v3, 1  ;;  %v465_v5 = vperm.slane %v430_v3, 2  ;;  %v439_v6 = vperm.slane %v430_v3, 0  ;;  %v517_v7 = vperm.slane %v430_v3, 6  ;;  %v4864_v8 = vld [vmem:[%s6973_s2] sm:$0xff]  ;;  %s4732_s19 = smov 3  }
  0x18   : > { %v4848_v1 = vshrl.u32 %v440_v0, 7  ;;  %v936_v9 = vperm.slane %v4864_v8, 3  ;;  %v478_v10 = vperm.slane %v430_v3, 3  ;;  %v504_v11 = vperm.slane %v430_v3, 5  ;;  %v4883_v18 = vld [vmem:[%s6977_s6] sm:$0xf] }
  0x19   : > { %v491_v12 = vperm.slane %v430_v3, 4  ;;  %v910_v13 = vperm.slane %v4864_v8, 1  ;;  %v530_v14 = vperm.slane %v430_v3, 7  ;;  %v897_v15 = vperm.slane %v4864_v8, 0  ;;  %s4890_s26 = scalar_select %p420_p10, %s4821_s25, 1 }
  0x1a   : > { %7017 = vst [vmem:[#allocation5_spill] sm:$0xff] %v4848_v1  ;;  %4577 = vset.pattern.permute.xlu1 %v4848_v1  ;;  %v4852_v2 = vadd.s32 8, %v4848_v1  ;;  %4578 = vset.pattern.permute.xlu2 %v4848_v1  ;;  %v975_v16 = vperm.slane %v4864_v8, 6  ;;  %v923_v17 = vperm.slane %v4864_v8, 2  ;;  %v2730_v19 = vperm.slane %v4883_v18, 0  ;;  %s417_s17 = sand.u32 1, %s4722_s22  }
  0x1b   : > { %v2751_v20 = vperm.slane %v4883_v18, 3  ;;  %s4533_s28 = sshll.u32 %s4890_s26, 6  ;;  %v949_v36 = vperm.slane %v4864_v8, 4  ;;  %v962_v53 = vperm.slane %v4864_v8, 5  ;;  %vm1387_vm3 = vcmask 1042434   ;;  %s7093_s1 = sld [smem:[#allocation31_spill]] }
  0x1c   : > { %7018 = vst [vmem:[#allocation6_spill] sm:$0xff] %v4852_v2  ;;  %4576 = vset.pattern.permute.xlu0 %v4852_v2  ;;  %s4897_s16 = scalar_lea.vmem %s7019_s0, %s4533_s28  ;;  %vm1389_vm4 = vcmask 1043459   ;;  %vm1391_vm5 = vcmask 1044484   ;;  %vm1393_vm6 = vcmask 1045509   ;;  %vm1395_vm7 = vcmask 1046534  }
  0x1d   : > { %v4900_v23 = vld [vmem:[%s4897_s16 + $0x8] sm:$0x7f]  ;;  %v4906_v25 = vld [vmem:[%s4897_s16 + $0x38] sm:$0x7f]  ;;  %v4909_v26 = vld [vmem:[%s4897_s16] sm:$0xff]  ;;  %vm1397_vm8 = vcmask 1047559  }
  0x1e   : > { %v4903_v24 = vld [vmem:[%s4897_s16 + $0x28] sm:$0x7f]  ;;  %v4912_v27 = vld [vmem:[%s4897_s16 + $0x20] sm:$0xff]  ;;  %v4915_v28 = vld [vmem:[%s4897_s16 + $0x18] sm:$0x7f]  ;;  %vm1517_vm9 = vcmask 1041408  }
  0x1f   : > { %v4918_v29 = vld [vmem:[%s4897_s16 + $0x30] sm:$0xff]  ;;  %vm1782_vm10 = vcmask 95232   ;;  %vm2866_vm11 = vcmask 97280   ;;  %vm3023_vm12 = vcmask 1045504   ;;  %vm3270_vm13 = vcmask 191488  }
  0x20   : > { %v4925_v34 = vld [vmem:[%s4897_s16 + $0x10] sm:$0xff]  ;;  %vm3268_vm14 = vcmask 195584   ;;  %vm4238_vm15 = vcmask 121856  }
  0x22   : > { %457 = vperm.xlu1 %4577, %v452_v4   ;;  %470 = vperm.xlu2 %4578, %v465_v5  }
  0x24   : > { %450 = vperm.xlu0 %4576, %v439_v6  }
  0x2a   : > { %4579 = vset.pattern.permute.xlu1 %v4852_v2  ;;  %4581 = vset.pattern.permute.xlu2 %v4852_v2 }
  0x2c   : > { %528 = vperm.xlu0 %4576, %v517_v7  }
  0x32   : > { %463 = vperm.xlu1 %4579, %v452_v4   ;;  %476 = vperm.xlu2 %4581, %v465_v5  }
  0x34   : > { %947 = vperm.xlu0 %4576, %v936_v9  }
  0x3a   : > { %4580 = vset.pattern.permute.xlu1 %v4848_v1  ;;  %489 = vperm.xlu2 %4581, %v478_v10  }
  0x3c   : > { %4588 = vset.pattern.permute.xlu0 %v4848_v1 }
  0x42   : > { %483 = vperm.xlu1 %4580, %v478_v10   ;;  %4583 = vset.pattern.permute.xlu2 %v4848_v1 }
  0x44   : > { %444 = vperm.xlu0 %4588, %v439_v6  }
  0x4a   : > { %4582 = vset.pattern.permute.xlu1 %v4852_v2  ;;  %509 = vperm.xlu2 %4583, %v504_v11  }
  0x4c   : > { %496 = vperm.xlu0 %4588, %v491_v12  }
  0x52   : > { %502 = vperm.xlu1 %4582, %v491_v12   ;;  %522 = vperm.xlu2 %4583, %v517_v7  }
  0x54   : > { %915 = vperm.xlu0 %4588, %v910_v13  }
  0x5a   : > { %515 = vperm.xlu1 %4582, %v504_v11   ;;  %4585 = vset.pattern.permute.xlu2 %v4852_v2 }
  0x5c   : > { %980 = vperm.xlu0 %4588, %v975_v16  }
  0x62   : > { %4584 = vset.pattern.permute.xlu1 %v4848_v1  ;;  %541 = vperm.xlu2 %4585, %v530_v14  }
  0x64   : > { %2735 = vperm.xlu0 %4588, %v2730_v19  }
  0x6a   : > { %535 = vperm.xlu1 %4584, %v530_v14   ;;  %908 = vperm.xlu2 %4585, %v897_v15  }
  0x6c   : > { %2756 = vperm.xlu0 %4588, %v2751_v20  }
  0x72   : > { %902 = vperm.xlu1 %4584, %v897_v15   ;;  %4587 = vset.pattern.permute.xlu2 %v4848_v1 }
  0x7a   : > { %4586 = vset.pattern.permute.xlu1 %v4852_v2  ;;  %928 = vperm.xlu2 %4587, %v923_v17  }
  0x7c   : > { %v471_v21 = vpop.permute.xlu2 %470 }
  0x7d   : > { %v547_v30 = vmul.f32 %v471_v21, %v4909_v26  ;;  %v579_v31 = vmul.f32 %v471_v21, %v4912_v27  ;;  %v595_v35 = vmul.f32 %v471_v21, %v4918_v29  ;;  %v563_v38 = vmul.f32 %v471_v21, %v4925_v34 }
  0x7f   : > { %v627_v40 = vsel %vm607_vm1, %v547_v30, 0.0  ;;  %v771_v41 = vsel %vm607_vm1, %v579_v31, 0.0  ;;  %v843_v44 = vsel %vm607_vm1, %v595_v35, 0.0  ;;  %v699_v46 = vsel %vm607_vm1, %v563_v38, 0.0 }
  0x82   : > { %921 = vperm.xlu1 %4586, %v910_v13   ;;  %941 = vperm.xlu2 %4587, %v936_v9  }
  0x8a   : > { %934 = vperm.xlu1 %4586, %v923_v17   ;;  %4590 = vset.pattern.permute.xlu2 %v4852_v2 }
  0x8c   : > { %v477_v22 = vpop.permute.xlu2 %476 }
  0x8d   : > { %v548_v32 = vmul.f32 %v477_v22, %v4900_v23  ;;  %v580_v33 = vmul.f32 %v477_v22, %v4903_v24  ;;  %v596_v37 = vmul.f32 %v477_v22, %v4906_v25  ;;  %v564_v39 = vmul.f32 %v477_v22, %v4915_v28 }
  0x8e   : > { %v988_v22 = vperm.slane %v4864_v8, 7 }
  0x8f   : > { %v628_v42 = vsel %vm609_vm0, %v548_v32, 0.0  ;;  %v772_v43 = vsel %vm609_vm0, %v580_v33, 0.0  ;;  %v844_v45 = vsel %vm609_vm0, %v596_v37, 0.0  ;;  %v700_v47 = vsel %vm609_vm0, %v564_v39, 0.0 }
  0x90   : > { %v629_v48 = vadd.f32 %v628_v42, %v627_v40  ;;  %v773_v49 = vadd.f32 %v772_v43, %v771_v41  ;;  %v845_v50 = vadd.f32 %v844_v45, %v843_v44  ;;  %v701_v51 = vadd.f32 %v700_v47, %v699_v46 }
  0x92   : > { %4589 = vset.pattern.permute.xlu1 %v4848_v1  ;;  %960 = vperm.xlu2 %4590, %v949_v36   ;;  %v630_v54 = vrot.slane %v629_v48, 4  ;;  %v774_v55 = vrot.slane %v773_v49, 4  ;;  %v846_v56 = vrot.slane %v845_v50, 4  ;;  %v702_v58 = vrot.slane %v701_v51, 4 }
  0x94   : > { %v458_v57 = vpop.permute.xlu1 %457  ;;  %v631_v59 = vadd.f32 %v630_v54, %v629_v48  ;;  %v775_v60 = vadd.f32 %v774_v55, %v773_v49  ;;  %v847_v61 = vadd.f32 %v846_v56, %v845_v50  ;;  %v703_v62 = vadd.f32 %v702_v58, %v701_v51  ;;  %v490_v35 = vpop.permute.xlu2 %489 }
  0x95   : > { %v545_v9 = vmul.f32 %v458_v57, %v4909_v26  ;;  %v561_v10 = vmul.f32 %v458_v57, %v4925_v34  ;;  %v577_v19 = vmul.f32 %v458_v57, %v4912_v27  ;;  %v593_v20 = vmul.f32 %v458_v57, %v4918_v29 }
  0x96   : > { %v451_v52 = vpop.permute.xlu0 %450  ;;  %v632_v63 = vrot.slane %v631_v59, 2  ;;  %v776_v0 = vrot.slane %v775_v60, 2  ;;  %v848_v4 = vrot.slane %v847_v61, 2  ;;  %v704_v5 = vrot.slane %v703_v62, 2 }
  0x97   : > { %v544_v30 = vmul.f32 %v451_v52, %v4900_v23  ;;  %v560_v31 = vmul.f32 %v451_v52, %v4915_v28  ;;  %v576_v32 = vmul.f32 %v451_v52, %v4903_v24  ;;  %v592_v39 = vmul.f32 %v451_v52, %v4906_v25 }
  0x98   : > { %v633_v11 = vadd.f32 %v632_v63, %v631_v59  ;;  %v777_v12 = vadd.f32 %v776_v0, %v775_v60  ;;  %v849_v13 = vadd.f32 %v848_v4, %v847_v61  ;;  %v4951_v21 = vadd.f32 %v704_v5, %v703_v62 }
  0x99   : > { %v690_v44 = vsel %vm607_vm1, %v561_v10, 0.0  ;;  %v762_v45 = vsel %vm607_vm1, %v577_v19, 0.0  ;;  %v834_v46 = vsel %vm607_vm1, %v593_v20, 0.0  ;;  %v4971_v50 = vsel %vm609_vm0, %v544_v30, 0.0 }
  0x9a   : > { %954 = vperm.xlu1 %4589, %v949_v36   ;;  %973 = vperm.xlu2 %4590, %v962_v53   ;;  %7020 = vst [vmem:[#allocation7_spill] sm:$0xff] %v4951_v21  ;;  %v618_v36 = vsel %vm607_vm1, %v545_v9, 0.0  ;;  %v634_v37 = vrot.slane %v633_v11, 1  ;;  %v778_v38 = vrot.slane %v777_v12, 1  ;;  %v850_v40 = vrot.slane %v849_v13, 1 }
  0x9b   : > { %v4974_v51 = vsel %vm609_vm0, %v560_v31, 0.0  ;;  %v4977_v52 = vsel %vm609_vm0, %v576_v32, 0.0  ;;  %v550_v60 = vmul.f32 %v490_v35, %v4900_v23  ;;  %v566_v62 = vmul.f32 %v490_v35, %v4915_v28 }
  0x9c   : > { %v4982_v57 = vadd.f32 %v634_v37, %v633_v11  ;;  %v4984_v58 = vadd.f32 %v778_v38, %v777_v12  ;;  %v4986_v59 = vadd.f32 %v850_v40, %v849_v13  ;;  %v582_v63 = vmul.f32 %v490_v35, %v4903_v24 }
  0x9d   : > { %v598_v0 = vmul.f32 %v490_v35, %v4906_v25  ;;  %v637_v19 = vsel %vm609_vm0, %v550_v60, 0.0 }
  0x9e   : > { %v529_v3 = vpop.permute.xlu0 %528  ;;  %7021 = vst [vmem:[#allocation8_spill] sm:$0xff] %v4982_v57  ;;  %v5005_v30 = vsel %vm609_vm0, %v582_v63, 0.0 }
  0x9f   : > { %7022 = vst [vmem:[#allocation9_spill] sm:$0xff] %v4984_v58  ;;  %v556_v4 = vmul.f32 %v529_v3, %v4900_v23  ;;  %v572_v5 = vmul.f32 %v529_v3, %v4915_v28  ;;  %v5008_v31 = vsel %vm609_vm0, %v598_v0, 0.0 }
  0xa0   : > { %7023 = vst [vmem:[#allocation10_spill] sm:$0xff] %v4986_v59 }
  0xa1   : > { %v5011_v32 = vsel %vm609_vm0, %v556_v4, 0.0 }
  0xa2   : > { %967 = vperm.xlu1 %4589, %v962_v53   ;;  %4592 = vset.pattern.permute.xlu2 %v4848_v1  ;;  %v4980_v53 = vsel %vm609_vm0, %v592_v39, 0.0 }
  0xa4   : > { %v464_v6 = vpop.permute.xlu1 %463  ;;  %v510_v9 = vpop.permute.xlu2 %509 }
  0xa5   : > { %v546_v7 = vmul.f32 %v464_v6, %v4900_v23  ;;  %v562_v14 = vmul.f32 %v464_v6, %v4915_v28  ;;  %v578_v15 = vmul.f32 %v464_v6, %v4903_v24  ;;  %v594_v17 = vmul.f32 %v464_v6, %v4906_v25 }
  0xa6   : > { %v948_v48 = vpop.permute.xlu0 %947  ;;  %v588_v6 = vmul.f32 %v529_v3, %v4903_v24 }
  0xa7   : > { %v619_v33 = vsel %vm609_vm0, %v546_v7, 0.0  ;;  %v691_v41 = vsel %vm609_vm0, %v562_v14, 0.0  ;;  %v763_v42 = vsel %vm609_vm0, %v578_v15, 0.0  ;;  %v835_v43 = vsel %vm609_vm0, %v594_v17, 0.0 }
  0xa8   : > { %v620_v47 = vadd.f32 %v619_v33, %v618_v36  ;;  %v692_v54 = vadd.f32 %v691_v41, %v690_v44  ;;  %v764_v55 = vadd.f32 %v763_v42, %v762_v45  ;;  %v836_v56 = vadd.f32 %v835_v43, %v834_v46 }
  0xa9   : > { %v604_v7 = vmul.f32 %v529_v3, %v4906_v25  ;;  %v1008_v13 = vmul.f32 %v948_v48, %v4900_v23  ;;  %v1024_v14 = vmul.f32 %v948_v48, %v4915_v28  ;;  %v1040_v15 = vmul.f32 %v948_v48, %v4903_v24 }
  0xaa   : > { %4591 = vset.pattern.permute.xlu1 %v4852_v2  ;;  %993 = vperm.xlu2 %4592, %v988_v22   ;;  %v621_v61 = vrot.slane %v620_v47, 4  ;;  %v693_v10 = vrot.slane %v692_v54, 4  ;;  %v765_v11 = vrot.slane %v764_v55, 4  ;;  %v837_v12 = vrot.slane %v836_v56, 4 }
  0xab   : > { %v1056_v17 = vmul.f32 %v948_v48, %v4906_v25  ;;  %v709_v3 = vsel %vm609_vm0, %v566_v62, 0.0  ;;  %v5017_v33 = vsel %vm609_vm0, %v588_v6, 0.0  ;;  %v5020_v35 = vsel %vm609_vm0, %v604_v7, 0.0 }
  0xac   : > { %v622_v20 = vadd.f32 %v621_v61, %v620_v47  ;;  %v694_v37 = vadd.f32 %v693_v10, %v692_v54  ;;  %v766_v38 = vadd.f32 %v765_v11, %v764_v55  ;;  %v838_v39 = vadd.f32 %v837_v12, %v836_v56  ;;  %v523_v11 = vpop.permute.xlu2 %522 }
  0xad   : > { %v5023_v40 = vsel %vm609_vm0, %v1008_v13, 0.0  ;;  %v5026_v42 = vsel %vm609_vm0, %v1024_v14, 0.0  ;;  %v5029_v43 = vsel %vm609_vm0, %v1040_v15, 0.0  ;;  %v5032_v44 = vsel %vm609_vm0, %v1056_v17, 0.0 }
  0xae   : > { %7024 = vst [vmem:[#allocation11_spill] sm:$0xff] %v5029_v43  ;;  %v553_v45 = vmul.f32 %v510_v9, %v4909_v26  ;;  %v623_v46 = vrot.slane %v622_v20, 2  ;;  %v569_v48 = vmul.f32 %v510_v9, %v4925_v34  ;;  %v585_v54 = vmul.f32 %v510_v9, %v4912_v27 }
  0xaf   : > { %7025 = vst [vmem:[#allocation12_spill] sm:$0xff] %v5032_v44  ;;  %v695_v62 = vrot.slane %v694_v37, 2  ;;  %v767_v63 = vrot.slane %v766_v38, 2  ;;  %v839_v0 = vrot.slane %v838_v39, 2  ;;  %v601_v15 = vmul.f32 %v510_v9, %v4918_v29 }
  0xb0   : > { %v5067_v9 = vsel %vm607_vm1, %v553_v45, 0.0 }
  0xb1   : > { %v5081_v45 = vsel %vm607_vm1, %v601_v15, 0.0 }
  0xb2   : > { %986 = vperm.xlu1 %4591, %v975_v16   ;;  %v5014_v16 = vsel %vm609_vm0, %v572_v5, 0.0 }
  0xb4   : > { %v484_v36 = vpop.permute.xlu1 %483 }
  0xb5   : > { %v549_v47 = vmul.f32 %v484_v36, %v4909_v26  ;;  %v565_v4 = vmul.f32 %v484_v36, %v4925_v34  ;;  %v581_v12 = vmul.f32 %v484_v36, %v4912_v27  ;;  %v597_v13 = vmul.f32 %v484_v36, %v4918_v29 }
  0xb6   : > { %v445_v41 = vpop.permute.xlu0 %444 }
  0xb7   : > { %v543_v55 = vmul.f32 %v445_v41, %v4909_v26  ;;  %v559_v56 = vmul.f32 %v445_v41, %v4925_v34  ;;  %v575_v60 = vmul.f32 %v445_v41, %v4912_v27  ;;  %v591_v61 = vmul.f32 %v445_v41, %v4918_v29 }
  0xb8   : > { %v636_v14 = vsel %vm607_vm1, %v549_v47, 0.0  ;;  %v708_v36 = vsel %vm607_vm1, %v565_v4, 0.0 }
  0xb9   : > { %v608_v5 = vsel %vm607_vm1, %v543_v55, 0.0  ;;  %v681_v6 = vsel %vm607_vm1, %v559_v56, 0.0  ;;  %v753_v7 = vsel %vm607_vm1, %v575_v60, 0.0  ;;  %v825_v10 = vsel %vm607_vm1, %v591_v61, 0.0 }
  0xba   : > { %999 = vperm.xlu1 %4591, %v988_v22   ;;  %v611_v8 = vadd.f32 %v4971_v50, %v608_v5  ;;  %v5055_v22 = vadd.f32 %v4974_v51, %v681_v6  ;;  %v755_v17 = vadd.f32 %v4977_v52, %v753_v7  ;;  %v827_v41 = vadd.f32 %v4980_v53, %v825_v10 }
  0xbb   : > { %v624_v55 = vadd.f32 %v623_v46, %v622_v20  ;;  %v5059_v56 = vadd.f32 %v695_v62, %v694_v37  ;;  %v5061_v60 = vadd.f32 %v767_v63, %v766_v38  ;;  %v5064_v61 = vadd.f32 %v839_v0, %v838_v39 }
  0xbc   : > { %v555_v50 = vmul.f32 %v523_v11, %v4909_v26  ;;  %v571_v51 = vmul.f32 %v523_v11, %v4925_v34  ;;  %v638_v47 = vadd.f32 %v637_v19, %v636_v14  ;;  %v780_v52 = vsel %vm607_vm1, %v581_v12, 0.0  ;;  %v5091_v5 = vpop.permute.xlu2 %541 }
  0xbd   : > { %7026 = vst [vmem:[#allocation13_spill] sm:$0xff] %v5059_v56  ;;  %v5073_v53 = vsel %vm607_vm1, %v569_v48, 0.0  ;;  %v587_v20 = vmul.f32 %v523_v11, %v4912_v27  ;;  %v710_v37 = vadd.f32 %v709_v3, %v708_v36  ;;  %v852_v38 = vsel %vm607_vm1, %v597_v13, 0.0 }
  0xbe   : > { %v5078_v39 = vsel %vm607_vm1, %v585_v54, 0.0  ;;  %v497_v46 = vpop.permute.xlu0 %496  ;;  %v625_v62 = vrot.slane %v624_v55, 1  ;;  %v769_v63 = vrot.slane %v5061_v60, 1  ;;  %v603_v48 = vmul.f32 %v523_v11, %v4918_v29  ;;  %7027 = vst [vmem:[#allocation14_spill] sm:$0xff] %v5091_v5 }
  0xbf   : > { %v841_v3 = vrot.slane %v5064_v61, 1  ;;  %v782_v0 = vadd.f32 %v5005_v30, %v780_v52  ;;  %v663_v54 = vsel %vm607_vm1, %v555_v50, 0.0  ;;  %v735_v4 = vsel %vm607_vm1, %v571_v51, 0.0 }
  0xc0   : > { %v639_v6 = vrot.slane %v638_v47, 4  ;;  %v854_v7 = vadd.f32 %v5008_v31, %v852_v38  ;;  %v551_v12 = vmul.f32 %v497_v46, %v4909_v26  ;;  %v807_v11 = vsel %vm607_vm1, %v587_v20, 0.0 }
  0xc1   : > { %v711_v13 = vrot.slane %v710_v37, 4  ;;  %v612_v14 = vrot.slane %v611_v8, 4  ;;  %v756_v15 = vrot.slane %v755_v17, 4  ;;  %v567_v36 = vmul.f32 %v497_v46, %v4925_v34 }
  0xc2   : > { %4593 = vset.pattern.permute.xlu1 %v4848_v1  ;;  %v583_v52 = vmul.f32 %v497_v46, %v4912_v27  ;;  %v783_v19 = vrot.slane %v782_v0, 4  ;;  %v828_v31 = vrot.slane %v827_v41, 4  ;;  %v599_v49 = vmul.f32 %v497_v46, %v4918_v29 }
  0xc3   : > { %v640_v20 = vadd.f32 %v639_v6, %v638_v47  ;;  %v855_v1 = vrot.slane %v854_v7, 4  ;;  %v645_v2 = vsel %vm607_vm1, %v551_v12, 0.0  ;;  %v613_v56 = vadd.f32 %v612_v14, %v611_v8 }
  0xc4   : > { %v503_v10 = vpop.permute.xlu1 %502  ;;  %v684_v21 = vrot.slane %v5055_v22, 4  ;;  %v757_v58 = vadd.f32 %v756_v15, %v755_v17  ;;  %v717_v59 = vsel %vm607_vm1, %v567_v36, 0.0  ;;  %v789_v43 = vsel %vm607_vm1, %v583_v52, 0.0 }
  0xc5   : > { %v552_v30 = vmul.f32 %v503_v10, %v4900_v23  ;;  %v568_v50 = vmul.f32 %v503_v10, %v4915_v28  ;;  %v584_v51 = vmul.f32 %v503_v10, %v4903_v24  ;;  %v600_v38 = vmul.f32 %v503_v10, %v4906_v25 }
  0xc6   : > { %v829_v46 = vadd.f32 %v828_v31, %v827_v41  ;;  %v861_v47 = vsel %vm607_vm1, %v599_v49, 0.0  ;;  %v879_v12 = vsel %vm607_vm1, %v603_v48, 0.0  ;;  %v5113_v8 = vadd.f32 %v625_v62, %v624_v55 }
  0xc7   : > { %v646_v5 = vsel %vm609_vm0, %v552_v30, 0.0  ;;  %v718_v44 = vsel %vm609_vm0, %v568_v50, 0.0  ;;  %v790_v10 = vsel %vm609_vm0, %v584_v51, 0.0  ;;  %v862_v6 = vsel %vm609_vm0, %v600_v38, 0.0  ;;  %v5115_v50 = vpop.permute.xlu2 %908 }
  0xc8   : > { %v647_v57 = vadd.f32 %v646_v5, %v645_v2  ;;  %v712_v14 = vadd.f32 %v711_v13, %v710_v37  ;;  %v784_v17 = vadd.f32 %v783_v19, %v782_v0  ;;  %v856_v15 = vadd.f32 %v855_v1, %v854_v7 }
  0xc9   : > { %v641_v36 = vrot.slane %v640_v20, 2  ;;  %v719_v5 = vadd.f32 %v718_v44, %v717_v59  ;;  %v791_v30 = vadd.f32 %v790_v10, %v789_v43  ;;  %v614_v52 = vrot.slane %v613_v56, 2 }
  0xca   : > { %v648_v2 = vrot.slane %v647_v57, 4  ;;  %v685_v41 = vadd.f32 %v684_v21, %v5055_v22  ;;  %v758_v51 = vrot.slane %v757_v58, 2  ;;  %v863_v49 = vadd.f32 %v862_v6, %v861_v47 }
  0xcb   : > { %v5119_v31 = vadd.f32 %v769_v63, %v5061_v60  ;;  %v5122_v55 = vadd.f32 %v841_v3, %v5064_v61  ;;  %v830_v37 = vrot.slane %v829_v46, 2  ;;  %v5125_v1 = vadd.f32 %v5011_v32, %v663_v54 }
  0xcc   : > { %v713_v62 = vrot.slane %v712_v14, 2  ;;  %v785_v59 = vrot.slane %v784_v17, 2  ;;  %v857_v43 = vrot.slane %v856_v15, 2  ;;  %v5128_v44 = vadd.f32 %v5014_v16, %v735_v4  ;;  %v516_v19 = vpop.permute.xlu1 %515 }
  0xcd   : > { %7028 = vst [vmem:[#allocation15_spill] sm:$0xff] %v5119_v31  ;;  %v5130_v21 = vadd.f32 %v641_v36, %v640_v20  ;;  %v649_v22 = vadd.f32 %v648_v2, %v647_v57  ;;  %v720_v48 = vrot.slane %v719_v5, 4  ;;  %v792_v60 = vrot.slane %v791_v30, 4 }
  0xce   : > { %7029 = vst [vmem:[#allocation16_spill] sm:$0xff] %v5122_v55  ;;  %v615_v63 = vadd.f32 %v614_v52, %v613_v56  ;;  %v686_v0 = vrot.slane %v685_v41, 2  ;;  %v759_v61 = vadd.f32 %v758_v51, %v757_v58  ;;  %v864_v3 = vrot.slane %v863_v49, 4 }
  0xcf   : > { %v831_v7 = vadd.f32 %v830_v37, %v829_v46  ;;  %v809_v32 = vadd.f32 %v5017_v33, %v807_v11  ;;  %v554_v54 = vmul.f32 %v516_v19, %v4900_v23  ;;  %v586_v13 = vmul.f32 %v516_v19, %v4903_v24 }
  0xd0   : > { %v5135_v38 = vadd.f32 %v713_v62, %v712_v14  ;;  %v5137_v16 = vadd.f32 %v785_v59, %v784_v17  ;;  %v5139_v4 = vadd.f32 %v857_v43, %v856_v15  ;;  %v881_v57 = vadd.f32 %v5020_v35, %v879_v12 }
  0xd1   : > { %v650_v20 = vrot.slane %v649_v22, 2  ;;  %v721_v58 = vadd.f32 %v720_v48, %v719_v5  ;;  %v793_v10 = vadd.f32 %v792_v60, %v791_v30  ;;  %v616_v46 = vrot.slane %v615_v63, 1 }
  0xd2   : > { %7030 = vst [vmem:[#allocation17_spill] sm:$0xff] %v5135_v38  ;;  %v5143_v47 = vadd.f32 %v686_v0, %v685_v41  ;;  %v760_v33 = vrot.slane %v759_v61, 1  ;;  %v865_v11 = vadd.f32 %v864_v3, %v863_v49  ;;  %v832_v6 = vrot.slane %v831_v7, 1 }
  0xd3   : > { %7031 = vst [vmem:[#allocation18_spill] sm:$0xff] %v5137_v16  ;;  %v602_v14 = vmul.f32 %v516_v19, %v4906_v25  ;;  %v655_v17 = vsel %vm609_vm0, %v554_v54, 0.0  ;;  %v799_v15 = vsel %vm609_vm0, %v586_v13, 0.0  ;;  %v2744_v5 = vperm.slane %v4883_v18, 2 }
  0xd4   : > { %7032 = vst [vmem:[#allocation19_spill] sm:$0xff] %v5143_v47  ;;  %v5148_v36 = vpop.permute.xlu2 %928  ;;  %v651_v30 = vadd.f32 %v650_v20, %v649_v22  ;;  %v722_v52 = vrot.slane %v721_v58, 2  ;;  %v794_v41 = vrot.slane %v793_v10, 2  ;;  %v570_v51 = vmul.f32 %v516_v19, %v4915_v28 }
  0xd5   : > { %v866_v37 = vrot.slane %v865_v11, 2  ;;  %v656_v62 = vadd.f32 %v655_v17, %v5067_v9  ;;  %v800_v59 = vadd.f32 %v799_v15, %v5078_v39  ;;  %2749 = vperm.xlu2 %4592, %v2744_v5   ;;  %v5158_v43 = vadd.f32 %v616_v46, %v615_v63 }
  0xd6   : > { %v5160_v48 = vadd.f32 %v760_v33, %v759_v61  ;;  %v5162_v60 = vadd.f32 %v832_v6, %v831_v7  ;;  %v871_v18 = vsel %vm609_vm0, %v602_v14, 0.0  ;;  %v666_v22 = vrot.slane %v5125_v1, 4 }
  0xd7   : > { %v738_v19 = vrot.slane %v5128_v44, 4  ;;  %v810_v0 = vrot.slane %v809_v32, 4  ;;  %v882_v3 = vrot.slane %v881_v57, 4  ;;  %v652_v9 = vrot.slane %v651_v30, 1 }
  0xd8   : > { %7033 = vst [vmem:[#allocation20_spill] sm:$0xff] %v5160_v48  ;;  %v5169_v13 = vadd.f32 %v722_v52, %v721_v58  ;;  %v5171_v39 = vadd.f32 %v794_v41, %v793_v10  ;;  %v727_v63 = vsel %vm609_vm0, %v570_v51, 0.0  ;;  %v5174_v61 = vadd.f32 %v866_v37, %v865_v11 }
  0xd9   : > { %7034 = vst [vmem:[#allocation21_spill] sm:$0xff] %v5162_v60  ;;  %v657_v7 = vrot.slane %v656_v62, 4  ;;  %v801_v20 = vrot.slane %v800_v59, 4  ;;  %v872_v46 = vadd.f32 %v871_v18, %v5081_v45  ;;  %v1002_v33 = vmul.f32 %v5115_v50, %v4900_v23 }
  0xda   : > { %7036 = vst [vmem:[#allocation23_spill] sm:$0xff] %v5169_v13  ;;  %v1018_v6 = vmul.f32 %v5115_v50, %v4915_v28  ;;  %v1034_v58 = vmul.f32 %v5115_v50, %v4903_v24  ;;  %v1050_v10 = vmul.f32 %v5115_v50, %v4906_v25  ;;  %v5186_v14 = vadd.f32 %v666_v22, %v5125_v1 }
  0xdb   : > { %7037 = vst [vmem:[#allocation24_spill] sm:$0xff] %v5171_v39  ;;  %v5189_v11 = vadd.f32 %v738_v19, %v5128_v44  ;;  %v5191_v17 = vadd.f32 %v810_v0, %v809_v32  ;;  %v5193_v45 = vadd.f32 %v882_v3, %v881_v57  ;;  %v5195_v15 = vadd.f32 %v652_v9, %v651_v30 }
  0xdc   : > { %v5167_v54 = vpop.permute.xlu1 %535  ;;  %v5200_v41 = vadd.f32 %v727_v63, %v5073_v53  ;;  %v942_v50 = vpop.permute.xlu2 %941  ;;  %v5203_v51 = vadd.f32 %v657_v7, %v656_v62  ;;  %v5205_v44 = vadd.f32 %v801_v20, %v800_v59  ;;  %v873_v32 = vrot.slane %v872_v46, 4 }
  0xdd   : > { %7035 = vst [vmem:[#allocation22_spill] sm:$0xff] %v5167_v54  ;;  %v1066_v57 = vsel %vm609_vm0, %v1002_v33, 0.0  ;;  %v1138_v30 = vsel %vm609_vm0, %v1018_v6, 0.0  ;;  %v1210_v37 = vsel %vm609_vm0, %v1034_v58, 0.0  ;;  %v1282_v18 = vsel %vm609_vm0, %v1050_v10, 0.0 }
  0xde   : > { %7038 = vst [vmem:[#allocation25_spill] sm:$0xff] %v5189_v11  ;;  %v1007_v53 = vmul.f32 %v942_v50, %v4909_v26  ;;  %v1023_v19 = vmul.f32 %v942_v50, %v4925_v34  ;;  %v1039_v0 = vmul.f32 %v942_v50, %v4912_v27  ;;  %v1055_v62 = vmul.f32 %v942_v50, %v4918_v29 }
  0xdf   : > { %7039 = vst [vmem:[#allocation26_spill] sm:$0xff] %v5191_v17  ;;  %v5219_v7 = vadd.f32 %v873_v32, %v872_v46 }
  0xe0   : > { %7040 = vst [vmem:[#allocation27_spill] sm:$0xff] %v5205_v44  ;;  %v1092_v20 = vsel %vm607_vm1, %v1007_v53, 0.0  ;;  %v1164_v33 = vsel %vm607_vm1, %v1023_v19, 0.0  ;;  %v1236_v6 = vsel %vm607_vm1, %v1039_v0, 0.0  ;;  %v7041_v53 = vld [vmem:[#allocation11_spill] sm:$0xff]  ;;  %v1308_v0 = vsel %vm607_vm1, %v1055_v62, 0.0 }
  0xe1   : > { %v1094_v46 = vadd.f32 %v5023_v40, %v1092_v20  ;;  %v1166_v32 = vadd.f32 %v5026_v42, %v1164_v33  ;;  %v1238_v19 = vadd.f32 %v7041_v53, %v1236_v6  ;;  %v1005_v40 = vmul.f32 %v5148_v36, %v4909_v26 }
  0xe2   : > { %v1021_v42 = vmul.f32 %v5148_v36, %v4925_v34  ;;  %v1037_v62 = vmul.f32 %v5148_v36, %v4912_v27 }
  0xe3   : > { %v1095_v1 = vrot.slane %v1094_v46, 4  ;;  %v1239_v56 = vrot.slane %v1238_v19, 4 }
  0xe4   : > { %v903_v22 = vpop.permute.xlu1 %902 }
  0xe5   : > { %v1001_v59 = vmul.f32 %v903_v22, %v4909_v26  ;;  %v1017_v3 = vmul.f32 %v903_v22, %v4925_v34  ;;  %v1033_v9 = vmul.f32 %v903_v22, %v4912_v27  ;;  %v1049_v63 = vmul.f32 %v903_v22, %v4918_v29 }
  0xe7   : > { %v1065_v58 = vsel %vm607_vm1, %v1001_v59, 0.0  ;;  %v1137_v10 = vsel %vm607_vm1, %v1017_v3, 0.0  ;;  %v1209_v50 = vsel %vm607_vm1, %v1033_v9, 0.0  ;;  %v1281_v35 = vsel %vm607_vm1, %v1049_v63, 0.0  ;;  %v7042_v63 = vld [vmem:[#allocation12_spill] sm:$0xff] }
  0xe8   : > { %v1067_v5 = vadd.f32 %v1066_v57, %v1065_v58  ;;  %v1139_v12 = vadd.f32 %v1138_v30, %v1137_v10  ;;  %v1211_v49 = vadd.f32 %v1210_v37, %v1209_v50  ;;  %v1283_v22 = vadd.f32 %v1282_v18, %v1281_v35 }
  0xe9   : > { %v1167_v9 = vrot.slane %v1166_v32, 4  ;;  %v1310_v57 = vadd.f32 %v7042_v63, %v1308_v0  ;;  %v1053_v58 = vmul.f32 %v5148_v36, %v4918_v29  ;;  %v1096_v10 = vadd.f32 %v1095_v1, %v1094_v46  ;;  %v916_v0 = vpop.permute.xlu0 %915 }
  0xea   : > { %v1068_v52 = vrot.slane %v1067_v5, 4  ;;  %v1140_v59 = vrot.slane %v1139_v12, 4  ;;  %v1212_v2 = vrot.slane %v1211_v49, 4  ;;  %v1284_v3 = vrot.slane %v1283_v22, 4 }
  0xeb   : > { %v1311_v20 = vrot.slane %v1310_v57, 4  ;;  %v1168_v50 = vadd.f32 %v1167_v9, %v1166_v32  ;;  %v5249_v36 = vsel %vm607_vm1, %v1021_v42, 0.0  ;;  %v5252_v1 = vsel %vm607_vm1, %v1037_v62, 0.0 }
  0xec   : > { %v1069_v30 = vadd.f32 %v1068_v52, %v1067_v5  ;;  %v1141_v37 = vadd.f32 %v1140_v59, %v1139_v12  ;;  %v1213_v35 = vadd.f32 %v1212_v2, %v1211_v49  ;;  %v1285_v18 = vadd.f32 %v1284_v3, %v1283_v22 }
  0xed   : > { %v1240_v22 = vadd.f32 %v1239_v56, %v1238_v19  ;;  %v1312_v53 = vadd.f32 %v1311_v20, %v1310_v57  ;;  %v5246_v3 = vsel %vm607_vm1, %v1005_v40, 0.0  ;;  %v5255_v49 = vsel %vm607_vm1, %v1053_v58, 0.0 }
  0xee   : > { %v1070_v33 = vrot.slane %v1069_v30, 2  ;;  %v1142_v6 = vrot.slane %v1141_v37, 2  ;;  %v1214_v5 = vrot.slane %v1213_v35, 2  ;;  %v1286_v52 = vrot.slane %v1285_v18, 2 }
  0xef   : > { %v1097_v32 = vrot.slane %v1096_v10, 2  ;;  %v1003_v19 = vmul.f32 %v916_v0, %v4909_v26  ;;  %v1019_v9 = vmul.f32 %v916_v0, %v4925_v34  ;;  %v1035_v57 = vmul.f32 %v916_v0, %v4912_v27 }
  0xf0   : > { %v1071_v46 = vadd.f32 %v1070_v33, %v1069_v30  ;;  %v1143_v63 = vadd.f32 %v1142_v6, %v1141_v37  ;;  %v1215_v56 = vadd.f32 %v1214_v5, %v1213_v35  ;;  %v1287_v40 = vadd.f32 %v1286_v52, %v1285_v18 }
  0xf1   : > { %v1169_v20 = vrot.slane %v1168_v50, 2  ;;  %v1241_v42 = vrot.slane %v1240_v22, 2  ;;  %v1313_v2 = vrot.slane %v1312_v53, 2  ;;  %v1051_v62 = vmul.f32 %v916_v0, %v4918_v29 }
  0xf2   : > { %v1074_v30 = vsel %vm607_vm1, %v1003_v19, 0.0  ;;  %v1146_v37 = vsel %vm607_vm1, %v1019_v9, 0.0  ;;  %v1218_v33 = vsel %vm607_vm1, %v1035_v57, 0.0  ;;  %v1072_v5 = vrot.slane %v1071_v46, 1 }
  0xf3   : > { %v1144_v52 = vrot.slane %v1143_v63, 1  ;;  %v1216_v12 = vrot.slane %v1215_v56, 1  ;;  %v1290_v54 = vsel %vm607_vm1, %v1051_v62, 0.0  ;;  %v1288_v47 = vrot.slane %v1287_v40, 1 }
  0xf4   : > { %v922_v59 = vpop.permute.xlu1 %921  ;;  %v5273_v31 = vadd.f32 %v1097_v32, %v1096_v10  ;;  %v5277_v48 = vadd.f32 %v1241_v42, %v1240_v22 }
  0xf5   : > { %v1004_v35 = vmul.f32 %v922_v59, %v4900_v23  ;;  %v1020_v6 = vmul.f32 %v922_v59, %v4915_v28  ;;  %v1036_v58 = vmul.f32 %v922_v59, %v4903_v24  ;;  %v1052_v18 = vmul.f32 %v922_v59, %v4906_v25 }
  0xf6   : > { %v5275_v59 = vadd.f32 %v1169_v20, %v1168_v50 }
  0xf7   : > { %v1075_v0 = vsel %vm609_vm0, %v1004_v35, 0.0  ;;  %v1147_v19 = vsel %vm609_vm0, %v1020_v6, 0.0  ;;  %v1219_v9 = vsel %vm609_vm0, %v1036_v58, 0.0  ;;  %v1291_v57 = vsel %vm609_vm0, %v1052_v18, 0.0 }
  0xf8   : > { %v1076_v38 = vadd.f32 %v1075_v0, %v1074_v30  ;;  %v1148_v11 = vadd.f32 %v1147_v19, %v1146_v37  ;;  %v1220_v13 = vadd.f32 %v1219_v9, %v1218_v33  ;;  %v1292_v16 = vadd.f32 %v1291_v57, %v1290_v54  ;;  %v981_v19 = vpop.permute.xlu0 %980 }
  0xf9   : > { %v5279_v6 = vadd.f32 %v1072_v5, %v1071_v46  ;;  %v5281_v58 = vadd.f32 %v1144_v52, %v1143_v63  ;;  %v5283_v18 = vadd.f32 %v1216_v12, %v1215_v56  ;;  %v5285_v30 = vadd.f32 %v1313_v2, %v1312_v53  ;;  %v961_v2 = vpop.permute.xlu2 %960 }
  0xfa   : > { %v1077_v62 = vrot.slane %v1076_v38, 4  ;;  %v1149_v17 = vrot.slane %v1148_v11, 4  ;;  %v1221_v35 = vrot.slane %v1220_v13, 4  ;;  %v1293_v39 = vrot.slane %v1292_v16, 4 }
  0xfb   : > { %v5291_v33 = vadd.f32 %v1288_v47, %v1287_v40  ;;  %v1013_v9 = vmul.f32 %v981_v19, %v4909_v26  ;;  %v1029_v57 = vmul.f32 %v981_v19, %v4925_v34 }
  0xfc   : > { %v935_v54 = vpop.permute.xlu1 %934  ;;  %v1078_v37 = vadd.f32 %v1077_v62, %v1076_v38  ;;  %v1150_v10 = vadd.f32 %v1149_v17, %v1148_v11  ;;  %v1222_v32 = vadd.f32 %v1221_v35, %v1220_v13  ;;  %v1294_v50 = vadd.f32 %v1293_v39, %v1292_v16 }
  0xfd   : > { %v1006_v22 = vmul.f32 %v935_v54, %v4900_v23  ;;  %v1022_v20 = vmul.f32 %v935_v54, %v4915_v28  ;;  %v1038_v42 = vmul.f32 %v935_v54, %v4903_v24  ;;  %v1054_v46 = vmul.f32 %v935_v54, %v4906_v25 }
  0xfe   : > { %v1079_v63 = vrot.slane %v1078_v37, 2  ;;  %v1151_v12 = vrot.slane %v1150_v10, 2  ;;  %v1223_v56 = vrot.slane %v1222_v32, 2  ;;  %v1295_v5 = vrot.slane %v1294_v50, 2 }
  0xff   : > { %v1084_v53 = vsel %vm609_vm0, %v1006_v22, 0.0  ;;  %v1156_v38 = vsel %vm609_vm0, %v1022_v20, 0.0  ;;  %v1228_v16 = vsel %vm609_vm0, %v1038_v42, 0.0  ;;  %v1300_v13 = vsel %vm609_vm0, %v1054_v46, 0.0 }
 0x100   : > { %v1080_v39 = vadd.f32 %v1079_v63, %v1078_v37  ;;  %v1152_v11 = vadd.f32 %v1151_v12, %v1150_v10  ;;  %v1224_v17 = vadd.f32 %v1223_v56, %v1222_v32  ;;  %v1085_v52 = vadd.f32 %v1084_v53, %v5246_v3 }
 0x101   : > { %v1157_v47 = vadd.f32 %v1156_v38, %v5249_v36  ;;  %v1229_v40 = vadd.f32 %v1228_v16, %v5252_v1  ;;  %v1301_v0 = vadd.f32 %v1300_v13, %v5255_v49  ;;  %v1045_v62 = vmul.f32 %v981_v19, %v4912_v27 }
 0x102   : > { %v1061_v35 = vmul.f32 %v981_v19, %v4918_v29  ;;  %v1086_v54 = vrot.slane %v1085_v52, 4  ;;  %v1081_v3 = vrot.slane %v1080_v39, 1  ;;  %v1153_v22 = vrot.slane %v1152_v11, 1 }
 0x103   : > { %v1158_v37 = vrot.slane %v1157_v47, 4  ;;  %v1230_v10 = vrot.slane %v1229_v40, 4  ;;  %v1302_v32 = vrot.slane %v1301_v0, 4  ;;  %v1225_v36 = vrot.slane %v1224_v17, 1 }
 0x104   : > { %v1296_v20 = vadd.f32 %v1295_v5, %v1294_v50  ;;  %v1087_v1 = vadd.f32 %v1086_v54, %v1085_v52  ;;  %v1010_v63 = vmul.f32 %v961_v2, %v4900_v23  ;;  %v1026_v12 = vmul.f32 %v961_v2, %v4915_v28 }
 0x105   : > { %v1159_v42 = vadd.f32 %v1158_v37, %v1157_v47  ;;  %v1231_v49 = vadd.f32 %v1230_v10, %v1229_v40  ;;  %v1303_v46 = vadd.f32 %v1302_v32, %v1301_v0  ;;  %v1042_v56 = vmul.f32 %v961_v2, %v4903_v24  ;;  %v974_v0 = vpop.permute.xlu2 %973 }
 0x106   : > { %v1058_v53 = vmul.f32 %v961_v2, %v4906_v25  ;;  %v1088_v38 = vrot.slane %v1087_v1, 2  ;;  %v5310_v16 = vsel %vm607_vm1, %v1013_v9, 0.0  ;;  %v5313_v13 = vsel %vm607_vm1, %v1029_v57, 0.0 }
 0x107   : > { %v5316_v50 = vsel %vm607_vm1, %v1045_v62, 0.0  ;;  %v5318_v5 = vadd.f32 %v1081_v3, %v1080_v39  ;;  %v5320_v52 = vadd.f32 %v1153_v22, %v1152_v11  ;;  %v1297_v47 = vrot.slane %v1296_v20, 1 }
 0x108   : > { %v5323_v40 = vsel %vm607_vm1, %v1061_v35, 0.0  ;;  %v5325_v2 = vadd.f32 %v1225_v36, %v1224_v17  ;;  %v1160_v19 = vrot.slane %v1159_v42, 2  ;;  %v1232_v9 = vrot.slane %v1231_v49, 2 }
 0x109   : > { %v1304_v54 = vrot.slane %v1303_v46, 2  ;;  %v1102_v57 = vsel %vm609_vm0, %v1010_v63, 0.0  ;;  %v1174_v37 = vsel %vm609_vm0, %v1026_v12, 0.0  ;;  %v1246_v62 = vsel %vm609_vm0, %v1042_v56, 0.0 }
 0x10a   : > { %v1318_v39 = vsel %vm609_vm0, %v1058_v53, 0.0  ;;  %v5331_v11 = vadd.f32 %v1088_v38, %v1087_v1  ;;  %v1012_v35 = vmul.f32 %v974_v0, %v4900_v23  ;;  %v1028_v32 = vmul.f32 %v974_v0, %v4915_v28 }
 0x10b   : > { %v1044_v17 = vmul.f32 %v974_v0, %v4903_v24  ;;  %v5340_v12 = vadd.f32 %v1160_v19, %v1159_v42  ;;  %v1233_v56 = vadd.f32 %v1232_v9, %v1231_v49  ;;  %v5342_v1 = vadd.f32 %v1304_v54, %v1303_v46 }
 0x10c   : > { %v955_v10 = vpop.permute.xlu1 %954  ;;  %v1060_v53 = vmul.f32 %v974_v0, %v4906_v25  ;;  %v1111_v46 = vsel %vm609_vm0, %v1012_v35, 0.0  ;;  %v1183_v25 = vsel %vm609_vm0, %v1028_v32, 0.0 }
 0x10d   : > { %v1009_v3 = vmul.f32 %v955_v10, %v4909_v26  ;;  %v1025_v22 = vmul.f32 %v955_v10, %v4925_v34  ;;  %v1041_v36 = vmul.f32 %v955_v10, %v4912_v27  ;;  %v1057_v63 = vmul.f32 %v955_v10, %v4918_v29 }
 0x10e   : > { %v5349_v34 = vadd.f32 %v1297_v47, %v1296_v20  ;;  %v1255_v38 = vsel %vm609_vm0, %v1044_v17, 0.0  ;;  %v994_v47 = vpop.permute.xlu2 %993  ;;  %v1234_v54 = vrot.slane %v1233_v56, 1 }
 0x10f   : > { %v1101_v23 = vsel %vm607_vm1, %v1009_v3, 0.0  ;;  %v1173_v28 = vsel %vm607_vm1, %v1025_v22, 0.0  ;;  %v1245_v24 = vsel %vm607_vm1, %v1041_v36, 0.0  ;;  %v1317_v26 = vsel %vm607_vm1, %v1057_v63, 0.0  ;;  %v5363_v3 = vld [vmem:[%s4897_s16 + $0x10] sm:$0xff]  ;;  %v5367_v36 = vld [vmem:[%s4897_s16 + $0x20] sm:$0xff] }
 0x110   : > { %v1103_v27 = vadd.f32 %v1102_v57, %v1101_v23  ;;  %v1175_v29 = vadd.f32 %v1174_v37, %v1173_v28  ;;  %v1247_v42 = vadd.f32 %v1246_v62, %v1245_v24  ;;  %v1319_v20 = vadd.f32 %v1318_v39, %v1317_v26  ;;  %v5359_v62 = vld [vmem:[%s4897_s16] sm:$0xff]  ;;  %7044 = vst [vmem:[#allocation12_spill] sm:$0xff] %v5363_v3  ;;  %v5374_v28 = vld [vmem:[%s4897_s16 + $0x30] sm:$0xff] }
 0x111   : > { %v1327_v37 = vsel %vm609_vm0, %v1060_v53, 0.0  ;;  %7043 = vst [vmem:[#allocation11_spill] sm:$0xff] %v5359_v62  ;;  %v1015_v10 = vmul.f32 %v5359_v62, %v994_v47  ;;  %v1031_v22 = vmul.f32 %v5363_v3, %v994_v47  ;;  %v1047_v39 = vmul.f32 %v5367_v36, %v994_v47 }
 0x112   : > { %v1176_v19 = vrot.slane %v1175_v29, 4  ;;  %v1248_v9 = vrot.slane %v1247_v42, 4  ;;  %v1104_v35 = vrot.slane %v1103_v27, 4  ;;  %7045 = vst [vmem:[#allocation28_spill] sm:$0xff] %v5367_v36  ;;  %v1063_v57 = vmul.f32 %v5374_v28, %v994_v47 }
 0x113   : > { %7046 = vst [vmem:[#allocation29_spill] sm:$0xff] %v5374_v28  ;;  %v5383_v60 = vsel %vm607_vm1, %v1015_v10, 0.0 }
 0x114   : > { %v1249_v32 = vadd.f32 %v1248_v9, %v1247_v42  ;;  %v968_v17 = vpop.permute.xlu1 %967  ;;  %v1177_v26 = vadd.f32 %v1176_v19, %v1175_v29  ;;  %v1320_v9 = vrot.slane %v1319_v20, 4  ;;  %v4655_v19 = vld [vmem:[%s6977_s6] sm:$0xf] }
 0x115   : > { %v1011_v63 = vmul.f32 %v5359_v62, %v968_v17  ;;  %v1027_v23 = vmul.f32 %v5363_v3, %v968_v17  ;;  %v1043_v53 = vmul.f32 %v5367_v36, %v968_v17  ;;  %v1059_v24 = vmul.f32 %v5374_v28, %v968_v17 }
 0x116   : > { %v1250_v42 = vrot.slane %v1249_v32, 2  ;;  %v1105_v3 = vadd.f32 %v1104_v35, %v1103_v27  ;;  %v2737_v47 = vperm.slane %v4655_v19, 1  ;;  %v5388_v28 = vadd.f32 %v1320_v9, %v1319_v20 }
 0x117   : > { %v1110_v49 = vsel %vm607_vm1, %v1011_v63, 0.0  ;;  %v1182_v0 = vsel %vm607_vm1, %v1027_v23, 0.0  ;;  %v1254_v44 = vsel %vm607_vm1, %v1043_v53, 0.0  ;;  %v1326_v62 = vsel %vm607_vm1, %v1059_v24, 0.0 }
 0x118   : > { %v1184_v55 = vadd.f32 %v1183_v25, %v1182_v0  ;;  %v1256_v36 = vadd.f32 %v1255_v38, %v1254_v44  ;;  %v1112_v17 = vadd.f32 %v1111_v46, %v1110_v49  ;;  %v1328_v29 = vadd.f32 %v1327_v37, %v1326_v62  ;;  %2742 = vperm.xlu1 %4593, %v2737_v47  }
 0x119   : > { %v1251_v63 = vadd.f32 %v1250_v42, %v1249_v32  ;;  %v5391_v24 = vsel %vm607_vm1, %v1031_v22, 0.0  ;;  %v1178_v27 = vrot.slane %v1177_v26, 2  ;;  %v1235_v44 = vadd.f32 %v1234_v54, %v1233_v56 }
 0x11a   : > { %v1185_v23 = vrot.slane %v1184_v55, 4  ;;  %v1257_v53 = vrot.slane %v1256_v36, 4  ;;  %v1243_v25 = vrot.slane %v5277_v48, 1  ;;  %v5395_v0 = vsel %vm607_vm1, %v1047_v39, 0.0 }
 0x11b   : > { %v1252_v49 = vrot.slane %v1251_v63, 1  ;;  %v5398_v37 = vsel %vm607_vm1, %v1063_v57, 0.0  ;;  %v1106_v20 = vrot.slane %v1105_v3, 2  ;;  %v1113_v62 = vrot.slane %v1112_v17, 4 }
 0x11c   : > { %v1186_v46 = vadd.f32 %v1185_v23, %v1184_v55  ;;  %v1258_v38 = vadd.f32 %v1257_v53, %v1256_v36  ;;  %v1329_v10 = vrot.slane %v1328_v29, 4  ;;  %v1322_v35 = vrot.slane %v5388_v28, 2 }
 0x11d   : > { %v1470_v56 = vsel %vm1385_vm2, %v5325_v2, %v5283_v18  ;;  %v1244_v55 = vadd.f32 %v1243_v25, %v5277_v48  ;;  %v1253_v54 = vadd.f32 %v1252_v49, %v1251_v63  ;;  %v1179_v36 = vadd.f32 %v1178_v27, %v1177_v26 }
 0x11e   : > { %v1259_v32 = vrot.slane %v1258_v38, 2  ;;  %v1471_v22 = vsel %vm1387_vm3, %v1235_v44, %v1470_v56  ;;  %v7047_v39 = vrot.slane %v5340_v12, 1  ;;  %v1171_v9 = vrot.slane %v5275_v59, 1 }
 0x11f   : > { %v1187_v19 = vrot.slane %v1186_v46, 2  ;;  %v1114_v47 = vadd.f32 %v1113_v62, %v1112_v17  ;;  %v5410_v23 = vadd.f32 %v1329_v10, %v1328_v29  ;;  %v1180_v48 = vrot.slane %v1179_v36, 1  ;;  %v5434_v10 = vld [vmem:[%s4897_s16 + $0x18] sm:$0x7f] }
 0x120   : > { %v1260_v57 = vadd.f32 %v1259_v32, %v1258_v38  ;;  %v1163_v42 = vadd.f32 %v7047_v39, %v5340_v12  ;;  %v7048_v26 = vrot.slane %v5130_v21, 1  ;;  %v1472_v12 = vsel %vm1389_vm4, %v1244_v55, %v1471_v22  ;;  %v5430_v38 = vld [vmem:[%s4897_s16 + $0x8] sm:$0x7f] }
 0x121   : > { %v1188_v2 = vadd.f32 %v1187_v19, %v1186_v46  ;;  %v1463_v17 = vsel %vm1385_vm2, %v5320_v52, %v5281_v58  ;;  %v1107_v29 = vadd.f32 %v1106_v20, %v1105_v3  ;;  %v7049_v53 = vrot.slane %v5203_v51, 2  ;;  %v5438_v52 = vld [vmem:[%s4897_s16 + $0x28] sm:$0x7f]  ;;  %v5442_v3 = vld [vmem:[%s4897_s16 + $0x38] sm:$0x7f]  ;;  %s4528_s16 = sshll.u32 %s4890_s26, 2 }
 0x122   : > { %v1261_v18 = vrot.slane %v1260_v57, 1  ;;  %v5415_v63 = vadd.f32 %v7048_v26, %v5130_v21  ;;  %v1473_v25 = vsel %vm1391_vm5, %v1253_v54, %v1472_v12  ;;  %v1172_v49 = vadd.f32 %v1171_v9, %v5275_v59  ;;  %s6886_s20 = scalar_lea.vmem %s7093_s1, %s4528_s16  ;;  %s4525_s26 = sshll.u32 %s417_s17, 2 }
 0x123   : > { %v5424_v27 = vadd.f32 %v7049_v53, %v5203_v51  ;;  %v1189_v21 = vrot.slane %v1188_v2, 1  ;;  %v1464_v46 = vsel %vm1387_vm3, %v1163_v42, %v1463_v17  ;;  %v1181_v32 = vadd.f32 %v1180_v48, %v1179_v36  ;;  %s6908_s15 = scalar_lea.vmem [#allocation2], %s4525_s26  ;;  %s4530_s16 = sshll.u32 %s4821_s25, 2 }
 0x124   : > { %v987_v44 = vpop.permute.xlu1 %986  ;;  %v1262_v59 = vadd.f32 %v1261_v18, %v1260_v57  ;;  %v1099_v56 = vrot.slane %v5273_v31, 1  ;;  %v1115_v55 = vrot.slane %v1114_v47, 2  ;;  %v1108_v42 = vrot.slane %v1107_v29, 1  ;;  %s4443_s28 = scalar_lea.hbm %s6983_s12, %s4530_s16  ;;  %s4444_s29 = sshll.u32 %s6908_s15, 4  ;;  %s4445_s29 = int_to_ptr.vmem [resolvable:$true] %s4444_s29 }
 0x125   : > { %v1014_v62 = vmul.f32 %v5430_v38, %v987_v44  ;;  %v1030_v58 = vmul.f32 %v5434_v10, %v987_v44  ;;  %v1046_v51 = vmul.f32 %v5438_v52, %v987_v44  ;;  %v1062_v20 = vmul.f32 %v5442_v3, %v987_v44  ;;  %s4446_s25 = sshll.u32 %s4443_s28, 4  ;;  %s4433_s26 = scalar_lea.sflag [#allocation3], %s417_s17  ;;  %s4447_s25 = int_to_ptr.hbm [resolvable:$true] %s4446_s25 }
 0x126   : > { %v7050_v57 = vrot.slane %v5331_v11, 1  ;;  %v1190_v48 = vadd.f32 %v1189_v21, %v1188_v2  ;;  %v1465_v12 = vsel %vm1389_vm4, %v1172_v49, %v1464_v46  ;;  %v1456_v17 = vsel %vm1385_vm2, %v5318_v5, %v5279_v6  ;;  %s4682_s18 = sshra.s32 %s4447_s25, 4  ;;  %s4688_s28 = scalar_lea.hbm %s6983_s12, 8  ;;  %s4683_s18 = int_to_ptr.hbm [resolvable:$true] %s4682_s18 }
 0x127   : > { %v1120_v54 = vsel %vm609_vm0, %v1014_v62, 0.0  ;;  %v1192_v22 = vsel %vm609_vm0, %v1030_v58, 0.0  ;;  %v1264_v39 = vsel %vm609_vm0, %v1046_v51, 0.0  ;;  %v1336_v18 = vsel %vm609_vm0, %v1062_v20, 0.0  ;;  %s4684_s16 = scalar_lea.hbm %s4683_s18, 4  ;;  %p4689_p0 = scmp.lt.s32.totalorder %s4683_s18, %s6983_s12 }
 0x128   : > { %v1121_v9 = vadd.f32 %v1120_v54, %v5310_v16  ;;  %v1193_v19 = vadd.f32 %v1192_v22, %v5313_v13  ;;  %v1265_v26 = vadd.f32 %v1264_v39, %v5316_v50  ;;  %v1091_v36 = vadd.f32 %v7050_v57, %v5331_v11  ;;  %p4685_p11 = scmp.ne.s32.totalorder %s4683_s18, %s4684_s16  ;;  %p4690_p1 = scmp.lt.s32.totalorder %s4688_s28, %s4684_s16 }
 0x129   : > { %v1100_v13 = vadd.f32 %v1099_v56, %v5273_v31  ;;  %v5462_v50 = vsel %vm1393_vm6, %v1262_v59, %v1473_v25  ;;  %v1466_v62 = vsel %vm1391_vm5, %v1181_v32, %v1465_v12  ;;  %v1109_v11 = vadd.f32 %v1108_v42, %v1107_v29 }
 0x12a   : > { %v1122_v53 = vrot.slane %v1121_v9, 4  ;;  %v1194_v44 = vrot.slane %v1193_v19, 4  ;;  %v1266_v16 = vrot.slane %v1265_v26, 4  ;;  %v1116_v58 = vadd.f32 %v1115_v55, %v1114_v47  ;;  %p4686_p12 = pnand %p4685_p11, %p4838_p5  ;;  %p4691_p2 = por %p4690_p1, %p4689_p0 }
 0x12b   : > { %v1337_v2 = vadd.f32 %v1336_v18, %v5323_v40  ;;  %v1467_v31 = vsel %vm1393_vm6, %v1190_v48, %v1466_v62  ;;  %v1457_v42 = vsel %vm1387_vm3, %v1091_v36, %v1456_v17  ;;  %v7051_v57 = vrot.slane %v5342_v1, 1 }
 0x12c   : > { %v1000_v21 = vpop.permute.xlu1 %999  ;;  %v1267_v49 = vadd.f32 %v1266_v16, %v1265_v26  ;;  %v1195_v46 = vadd.f32 %v1194_v44, %v1193_v19  ;;  %v1123_v51 = vadd.f32 %v1122_v53, %v1121_v9  ;;  %v1117_v55 = vrot.slane %v1116_v58, 1  ;;  %p4687_p13 = pneg %p4686_p12 }
 0x12d   : > { %v1016_v6 = vmul.f32 %v5430_v38, %v1000_v21  ;;  %v1032_v5 = vmul.f32 %v5434_v10, %v1000_v21  ;;  %v1048_v20 = vmul.f32 %v5438_v52, %v1000_v21  ;;  %v1064_v25 = vmul.f32 %v5442_v3, %v1000_v21 }
 0x12e   : > { %v1268_v59 = vrot.slane %v1267_v49, 2  ;;  %v1196_v32 = vrot.slane %v1195_v46, 2  ;;  %v1124_v29 = vrot.slane %v1123_v51, 2  ;;  %v5481_v18 = vadd.f32 %v7051_v57, %v5342_v1  ;;  %p4692_p3 = pnand %p4691_p2, %p4687_p13 }
 0x12f   : > { %v1129_v47 = vsel %vm609_vm0, %v1016_v6, 0.0  ;;  %v1201_v40 = vsel %vm609_vm0, %v1032_v5, 0.0  ;;  %v1273_v56 = vsel %vm609_vm0, %v1048_v20, 0.0  ;;  %v1345_v48 = vsel %vm609_vm0, %v1064_v25, 0.0 }
 0x130   : > { %v1130_v54 = vadd.f32 %v1129_v47, %v5383_v60  ;;  %v1202_v22 = vadd.f32 %v1201_v40, %v5391_v24  ;;  %v1274_v39 = vadd.f32 %v1273_v56, %v5395_v0  ;;  %v1269_v9 = vadd.f32 %v1268_v59, %v1267_v49 }
 0x131   : > { %v1197_v19 = vadd.f32 %v1196_v32, %v1195_v46  ;;  %v1125_v26 = vadd.f32 %v1124_v29, %v1123_v51  ;;  %v1338_v44 = vrot.slane %v1337_v2, 4  ;;  %v1118_v16 = vadd.f32 %v1117_v55, %v1116_v58 }
 0x132   : > { %v1275_v12 = vrot.slane %v1274_v39, 4  ;;  %v1203_v53 = vrot.slane %v1202_v22, 4  ;;  %v1131_v60 = vrot.slane %v1130_v54, 4  ;;  %v1270_v24 = vrot.slane %v1269_v9, 1 }
 0x133   : > { %v1458_v0 = vsel %vm1389_vm4, %v1100_v13, %v1457_v42  ;;  %v1198_v17 = vrot.slane %v1197_v19, 1  ;;  %v1346_v49 = vadd.f32 %v1345_v48, %v5398_v37  ;;  %v1126_v1 = vrot.slane %v1125_v26, 1 }
 0x134   : > { %v1276_v36 = vadd.f32 %v1275_v12, %v1274_v39  ;;  %v1204_v62 = vadd.f32 %v1203_v53, %v1202_v22  ;;  %v1132_v21 = vadd.f32 %v1131_v60, %v1130_v54  ;;  %v1315_v46 = vrot.slane %v5285_v30, 1 }
 0x135   : > { %v1331_v51 = vrot.slane %v5410_v23, 2  ;;  %v1459_v25 = vsel %vm1391_vm5, %v1109_v11, %v1458_v0  ;;  %v1271_v58 = vadd.f32 %v1270_v24, %v1269_v9  ;;  %v1323_v59 = vadd.f32 %v1322_v35, %v5388_v28 }
 0x136   : > { %v1277_v6 = vrot.slane %v1276_v36, 2  ;;  %v1205_v5 = vrot.slane %v1204_v62, 2  ;;  %v1133_v20 = vrot.slane %v1132_v21, 2  ;;  %v1460_v13 = vsel %vm1393_vm6, %v1118_v16, %v1459_v25 }
 0x137   : > { %v1339_v32 = vadd.f32 %v1338_v44, %v1337_v2  ;;  %v1199_v29 = vadd.f32 %v1198_v17, %v1197_v19  ;;  %v1127_v56 = vadd.f32 %v1126_v1, %v1125_v26  ;;  %v1332_v55 = vadd.f32 %v1331_v51, %v5410_v23 }
 0x138   : > { %v1278_v37 = vadd.f32 %v1277_v6, %v1276_v36  ;;  %v1206_v47 = vadd.f32 %v1205_v5, %v1204_v62  ;;  %v1134_v40 = vadd.f32 %v1133_v20, %v1132_v21  ;;  %v1347_v22 = vrot.slane %v1346_v49, 4  ;;  %v7053_v20 = vld [vmem:[#allocation8_spill] sm:$0xff] }
 0x139   : > { %v1340_v54 = vrot.slane %v1339_v32, 2  ;;  %v1316_v9 = vadd.f32 %v1315_v46, %v5285_v30  ;;  %v1475_v57 = vsel %vm1395_vm7, %v1271_v58, %v5462_v50  ;;  %v1324_v48 = vrot.slane %v1323_v59, 1 }
 0x13a   : > { %v1279_v39 = vrot.slane %v1278_v37, 1  ;;  %v1207_v42 = vrot.slane %v1206_v47, 1  ;;  %v1135_v11 = vrot.slane %v1134_v40, 1  ;;  %v1348_v35 = vadd.f32 %v1347_v22, %v1346_v49  ;;  %v7057_v22 = vld [vmem:[#allocation21_spill] sm:$0xff] }
 0x13b   : > { %v1341_v28 = vadd.f32 %v1340_v54, %v1339_v32  ;;  %v1468_v12 = vsel %vm1395_vm7, %v1199_v29, %v1467_v31  ;;  %v1461_v23 = vsel %vm1395_vm7, %v1127_v56, %v1460_v13  ;;  %v1333_v53 = vrot.slane %v1332_v55, 1 }
 0x13c   : > { %v1280_v2 = vadd.f32 %v1279_v39, %v1278_v37  ;;  %v1208_v19 = vadd.f32 %v1207_v42, %v1206_v47  ;;  %v1136_v26 = vadd.f32 %v1135_v11, %v1134_v40  ;;  %v1349_v60 = vrot.slane %v1348_v35, 2  ;;  %v7059_v11 = vld [vmem:[#allocation10_spill] sm:$0xff] }
 0x13d   : > { %v661_v44 = vrot.slane %v5424_v27, 1  ;;  %v1342_v16 = vrot.slane %v1341_v28, 1  ;;  %v1325_v31 = vadd.f32 %v1324_v48, %v1323_v59  ;;  %v1477_v36 = vsel %vm1385_vm2, %v5349_v34, %v5291_v33 }
 0x13e   : > { %v1476_v24 = vsel %vm1397_vm8, %v1280_v2, %v1475_v57  ;;  %v1469_v30 = vsel %vm1397_vm8, %v1208_v19, %v1468_v12  ;;  %v1462_v50 = vsel %vm1397_vm8, %v1136_v26, %v1461_v23  ;;  %v1350_v0 = vadd.f32 %v1349_v60, %v1348_v35  ;;  %v7060_v57 = vld [vmem:[#allocation27_spill] sm:$0xff]  ;;  %v7062_v35 = vld [vmem:[#allocation24_spill] sm:$0xff]  ;;  %v7064_v26 = vld [vmem:[#allocation26_spill] sm:$0xff] }
 0x13f   : > { %1488 = vrot.lane.b32.xlu1 %v1476_v24, %s4732_s19  ;;  %1486 = vrot.lane.b32.xlu0 %v1469_v30, %s4732_s19  ;;  %v668_v17 = vrot.slane %v5186_v14, 2  ;;  %v1478_v62 = vsel %vm1387_vm3, %v5481_v18, %v1477_v36  ;;  %v1386_v21 = vsel %vm1385_vm2, %v5113_v8, %v5158_v43  ;;  %v7052_v49 = vrot.slane %v5219_v7, 2  ;;  %v7065_v24 = vld [vmem:[#allocation20_spill] sm:$0xff]  ;;  %v7066_v30 = vld [vmem:[#allocation15_spill] sm:$0xff] }
 0x140   : > { %1484 = vrot.lane.b32.xlu2 %v1462_v50, %s4732_s19  ;;  %v884_v46 = vrot.slane %v5193_v45, 2  ;;  %v1334_v51 = vadd.f32 %v1333_v53, %v1332_v55  ;;  %v1351_v6 = vrot.slane %v1350_v0, 1  ;;  %v662_v33 = vadd.f32 %v661_v44, %v5424_v27 }
 0x141   : > { %v876_v1 = vadd.f32 %v7052_v49, %v5219_v7  ;;  %v669_v34 = vadd.f32 %v668_v17, %v5186_v14  ;;  %v1343_v5 = vadd.f32 %v1342_v16, %v1341_v28  ;;  %v1388_v18 = vsel %vm1387_vm3, %v7053_v20, %v1386_v21  ;;  %v7067_v16 = vld [vmem:[#allocation19_spill] sm:$0xff]  ;;  %v7069_v17 = vld [vmem:[#allocation18_spill] sm:$0xff]  ;;  %v7074_v20 = vld [vmem:[#allocation13_spill] sm:$0xff] }
 0x142   : > { %v885_v58 = vadd.f32 %v884_v46, %v5193_v45  ;;  %v1352_v8 = vadd.f32 %v1351_v6, %v1350_v0  ;;  %v1479_v43 = vsel %vm1389_vm4, %v1316_v9, %v1478_v62  ;;  %v1390_v7 = vsel %vm1389_vm4, %v5415_v63, %v1388_v18 }
 0x143   : > { %v877_v25 = vrot.slane %v876_v1, 1  ;;  %v670_v13 = vrot.slane %v669_v34, 1  ;;  %v7054_v59 = vrot.slane %v5174_v61, 1  ;;  %v7055_v14 = vrot.slane %v5200_v41, 4 }
 0x144   : > { %v1480_v37 = vsel %vm1391_vm5, %v1325_v31, %v1479_v43  ;;  %v1392_v45 = vsel %vm1391_vm5, %v5195_v15, %v1390_v7  ;;  %v886_v56 = vrot.slane %v885_v58, 1  ;;  %v7061_v48 = vrot.slane %v7060_v57, 2  ;;  %v7076_v43 = vld [vmem:[#allocation23_spill] sm:$0xff] }
 0x145   : > { %v869_v27 = vadd.f32 %v7054_v59, %v5174_v61  ;;  %v730_v32 = vadd.f32 %v7055_v14, %v5200_v41  ;;  %v1481_v29 = vsel %vm1393_vm6, %v1334_v51, %v1480_v37  ;;  %v671_v47 = vadd.f32 %v670_v13, %v669_v34  ;;  %v7058_v41 = vld [vmem:[#allocation16_spill] sm:$0xff]  ;;  %v7071_v51 = vld [vmem:[#allocation9_spill] sm:$0xff] }
 0x146   : > { %v1394_v40 = vsel %vm1393_vm6, %v662_v33, %v1392_v45  ;;  %v1482_v63 = vsel %vm1395_vm7, %v1343_v5, %v1481_v29  ;;  %v7056_v61 = vrot.slane %v5139_v4, 1  ;;  %v878_v54 = vadd.f32 %v877_v25, %v876_v1  ;;  %v7072_v33 = vld [vmem:[#allocation7_spill] sm:$0xff]  ;;  %v7078_v14 = vld [vmem:[#allocation25_spill] sm:$0xff] }
 0x147   : > { %v1413_v39 = vsel %vm1385_vm2, %v7058_v41, %v7057_v22  ;;  %v1483_v42 = vsel %vm1397_vm8, %v1352_v8, %v1482_v63  ;;  %v5547_v15 = vsel %vm1395_vm7, %v671_v47, %v1394_v40  ;;  %v804_v28 = vadd.f32 %v7061_v48, %v7060_v57  ;;  %v7079_v47 = vld [vmem:[#allocation17_spill] sm:$0xff]  ;;  %v7081_v48 = vld [vmem:[#allocation14_spill] sm:$0xff] }
 0x148   : > { %v860_v55 = vadd.f32 %v7056_v61, %v5139_v4  ;;  %v1414_v9 = vsel %vm1387_vm3, %v7059_v11, %v1413_v39  ;;  %v7063_v4 = vrot.slane %v7062_v35, 1  ;;  %v731_v19 = vrot.slane %v730_v32, 2  ;;  %1490 = vrot.lane.b32.xlu2 %v1483_v42, %s4732_s19 }
 0x149   : > { %v812_v23 = vrot.slane %v7064_v26, 2  ;;  %v887_v53 = vadd.f32 %v886_v56, %v885_v58  ;;  %v805_v44 = vrot.slane %v804_v28, 1  ;;  %v1406_v50 = vsel %vm1385_vm2, %v7066_v30, %v7065_v24  ;;  %v7084_v24 = vld [vmem:[#allocation12_spill] sm:$0xff] }
 0x14a   : > { %v797_v2 = vadd.f32 %v7063_v4, %v7062_v35  ;;  %v1415_v12 = vsel %vm1389_vm4, %v860_v55, %v1414_v9  ;;  %v7068_v31 = vrot.slane %v7067_v16, 1  ;;  %v7070_v62 = vrot.slane %v7069_v17, 1  ;;  %v7082_v35 = vld [vmem:[#allocation22_spill] sm:$0xff]  ;;  %v7083_v4 = vld [vmem:[#allocation11_spill] sm:$0xff] }
 0x14b   : > { %v1416_v60 = vsel %vm1391_vm5, %v869_v27, %v1415_v12  ;;  %v813_v49 = vadd.f32 %v812_v23, %v7064_v26  ;;  %v806_v46 = vadd.f32 %v805_v44, %v804_v28  ;;  %v1407_v6 = vsel %vm1387_vm3, %v7071_v51, %v1406_v50 }
 0x14c   : > { %v689_v0 = vadd.f32 %v7068_v31, %v7067_v16  ;;  %v1417_v36 = vsel %vm1393_vm6, %v878_v54, %v1416_v60  ;;  %v788_v21 = vadd.f32 %v7070_v62, %v7069_v17  ;;  %v7073_v34 = vrot.slane %v7072_v33, 1  ;;  %v5615_v31 = vpop.permute.xlu2 %2749 }
 0x14d   : > { %v5573_v1 = vsel %vm1395_vm7, %v887_v53, %v1417_v36  ;;  %v7075_v18 = vrot.slane %v7074_v20, 1  ;;  %v814_v58 = vrot.slane %v813_v49, 1  ;;  %v7077_v13 = vrot.slane %v7076_v43, 1 }
 0x14e   : > { %v707_v5 = vadd.f32 %v7073_v34, %v7072_v33  ;;  %v1408_v8 = vsel %vm1389_vm4, %v788_v21, %v1407_v6  ;;  %v732_v27 = vadd.f32 %v731_v19, %v730_v32  ;;  %v740_v37 = vrot.slane %v7078_v14, 2  ;;  %v7085_v21 = vld [vmem:[#allocation28_spill] sm:$0xff] }
 0x14f   : > { %v698_v25 = vadd.f32 %v7075_v18, %v7074_v20  ;;  %v725_v7 = vadd.f32 %v7077_v13, %v7076_v43  ;;  %v1409_v59 = vsel %vm1391_vm5, %v797_v2, %v1408_v8  ;;  %v815_v45 = vadd.f32 %v814_v58, %v813_v49  ;;  %v5632_v18 = vpop.permute.xlu0 %2735 }
 0x150   : > { %v1410_v29 = vsel %vm1393_vm6, %v806_v46, %v1409_v59  ;;  %v7080_v40 = vrot.slane %v7079_v47, 1  ;;  %v733_v61 = vrot.slane %v732_v27, 1  ;;  %v741_v55 = vadd.f32 %v740_v37, %v7078_v14 }
 0x151   : > { %v1399_v63 = vsel %vm1385_vm2, %v698_v25, %v689_v0  ;;  %v5597_v22 = vsel %vm1395_vm7, %v815_v45, %v1410_v29  ;;  %v558_v28 = vmul.f32 %v5430_v38, %v7081_v48  ;;  %v557_v2 = vmul.f32 %v7083_v4, %v7082_v35 }
 0x152   : > { %v716_v56 = vadd.f32 %v7080_v40, %v7079_v47  ;;  %v1400_v54 = vsel %vm1387_vm3, %v707_v5, %v1399_v63  ;;  %v734_v41 = vadd.f32 %v733_v61, %v732_v27  ;;  %v742_v39 = vrot.slane %v741_v55, 1 }
 0x153   : > { %v673_v19 = vsel %vm609_vm0, %v558_v28, 0.0  ;;  %v672_v12 = vsel %vm607_vm1, %v557_v2, 0.0  ;;  %v574_v44 = vmul.f32 %v5434_v10, %v7081_v48  ;;  %v573_v30 = vmul.f32 %v7084_v24, %v7082_v35 }
 0x154   : > { %v1401_v32 = vsel %vm1389_vm4, %v716_v56, %v1400_v54  ;;  %v743_v11 = vadd.f32 %v742_v39, %v741_v55  ;;  %v674_v26 = vadd.f32 %v673_v19, %v672_v12  ;;  %v590_v62 = vmul.f32 %v5438_v52, %v7081_v48 }
 0x155   : > { %v1402_v42 = vsel %vm1391_vm5, %v725_v7, %v1401_v32  ;;  %v745_v38 = vsel %vm609_vm0, %v574_v44, 0.0  ;;  %v744_v16 = vsel %vm607_vm1, %v573_v30, 0.0  ;;  %v589_v49 = vmul.f32 %v7085_v21, %v7082_v35  ;;  %v7087_v32 = vld [vmem:[#allocation29_spill] sm:$0xff] }
 0x156   : > { %v1403_v9 = vsel %vm1393_vm6, %v734_v41, %v1402_v42  ;;  %v675_v23 = vrot.slane %v674_v26, 4  ;;  %v746_v36 = vadd.f32 %v745_v38, %v744_v16  ;;  %v817_v34 = vsel %vm609_vm0, %v590_v62, 0.0 }
 0x157   : > { %v1404_v57 = vsel %vm1395_vm7, %v743_v11, %v1403_v9  ;;  %v816_v5 = vsel %vm607_vm1, %v589_v49, 0.0  ;;  %v5634_v45 = vpop.permute.xlu0 %2756  ;;  %v606_v54 = vmul.f32 %v5442_v3, %v7081_v48  ;;  %v605_v41 = vmul.f32 %v7087_v32, %v7082_v35 }
 0x158   : > { %v676_v53 = vadd.f32 %v675_v23, %v674_v26  ;;  %v747_v10 = vrot.slane %v746_v36, 4  ;;  %v818_v8 = vadd.f32 %v817_v34, %v816_v5  ;;  %7086 = vst [vmem:[#allocation8_spill] sm:$0xff] %v5634_v45 }
 0x159   : > { %v889_v4 = vsel %vm609_vm0, %v606_v54, 0.0  ;;  %v888_v2 = vsel %vm607_vm1, %v605_v41, 0.0  ;;  %vm4427_vm0 = vcmask 114688  }
 0x15a   : > { %v677_v60 = vrot.slane %v676_v53, 2  ;;  %v748_v20 = vadd.f32 %v747_v10, %v746_v36  ;;  %v819_v13 = vrot.slane %v818_v8, 4  ;;  %v890_v12 = vadd.f32 %v889_v4, %v888_v2 }
 0x15c   : > { %v678_v50 = vadd.f32 %v677_v60, %v676_v53  ;;  %v749_v43 = vrot.slane %v748_v20, 2  ;;  %v820_v37 = vadd.f32 %v819_v13, %v818_v8  ;;  %v891_v23 = vrot.slane %v890_v12, 4 }
 0x15e   : > { %v679_v0 = vrot.slane %v678_v50, 1  ;;  %v750_v7 = vadd.f32 %v749_v43, %v748_v20  ;;  %v821_v47 = vrot.slane %v820_v37, 2  ;;  %v892_v30 = vadd.f32 %v891_v23, %v890_v12  ;;  %v5692_v23 = vld [vmem:[%s6975_s4 + $0x10] sm:$0x3f] }
 0x160   : > { %v680_v17 = vadd.f32 %v679_v0, %v678_v50  ;;  %v751_v29 = vrot.slane %v750_v7, 1  ;;  %v822_v55 = vadd.f32 %v821_v47, %v820_v37  ;;  %v893_v16 = vrot.slane %v892_v30, 2 }
 0x162   : > { %v1398_v51 = vsel %vm1397_vm8, %v680_v17, %v5547_v15  ;;  %v752_v40 = vadd.f32 %v751_v29, %v750_v7  ;;  %v823_v28 = vrot.slane %v822_v55, 1  ;;  %v894_v62 = vadd.f32 %v893_v16, %v892_v30 }
 0x164   : > { %v1405_v42 = vsel %vm1397_vm8, %v752_v40, %v1404_v57  ;;  %v824_v57 = vadd.f32 %v823_v28, %v822_v55  ;;  %v895_v21 = vrot.slane %v894_v62, 1 }
 0x166   : > { %v1412_v53 = vsel %vm1397_vm8, %v824_v57, %v5597_v22 }
 0x18a   : > { %v5636_v63 = vpop.permute.xlu1 %2742 }
 0x19a   : > { %v1485_v46 = vpop.permute.xlu2 %1484 }
 0x19b   : > { %v5624_v6 = vsel %vm607_vm1, %v1398_v51, %v1485_v46  ;;  %v896_v46 = vadd.f32 %v895_v21, %v894_v62 }
 0x19c   : > { %v1509_v33 = vrot.slane %v5624_v6, 6 }
 0x19d   : > { %v1419_v5 = vsel %vm1397_vm8, %v896_v46, %v5573_v1 }
 0x19e   : > { %v1518_v52 = vsel %vm1517_vm9, 0.0, %v1509_v33  ;;  %v1522_v47 = vsel %vm1517_vm9, %v1509_v33, 0.0  ;;  %v5676_v33 = vld [vmem:[%s6975_s4] sm:$0x3f] }
 0x19f   : > { %v1540_v25 = vperm.slane %v1518_v52, 2  ;;  %v1533_v58 = vperm.slane %v1518_v52, 1  ;;  %v1526_v15 = vperm.slane %v1518_v52, 0  ;;  %v1561_v59 = vperm.slane %v1518_v52, 5 }
 0x1a0   : > { %v1554_v27 = vperm.slane %v1518_v52, 4  ;;  %v1547_v14 = vperm.slane %v1518_v52, 3  ;;  %v1575_v56 = vperm.slane %v1518_v52, 7  ;;  %v1568_v61 = vperm.slane %v1518_v52, 6 }
 0x1a1   : > { %1545 = vperm.xlu2 %4592, %v1540_v25   ;;  %1538 = vperm.xlu1 %4593, %v1533_v58   ;;  %v2014_v55 = vperm.slane %v1522_v47, 1  ;;  %v2351_v28 = vperm.slane %v1522_v47, 2  ;;  %v2358_v12 = vperm.slane %v1522_v47, 3 }
 0x1a2   : > { %1531 = vperm.xlu0 %4588, %v1526_v15   ;;  %v1491_v34 = vpop.permute.xlu2 %1490 }
 0x1a3   : > { %v1499_v20 = vsel %vm607_vm1, %v1419_v5, %v1491_v34 }
 0x1a4   : > { %v1512_v58 = vrot.slane %v1499_v20, 6 }
 0x1a6   : > { %v1521_v8 = vsel %vm1517_vm9, 0.0, %v1512_v58  ;;  %v5671_v6 = vsel %vm1517_vm9, %v1512_v58, 0.0 }
 0x1a7   : > { %v1701_v13 = vperm.slane %v1521_v8, 1  ;;  %v1694_v7 = vperm.slane %v1521_v8, 0  ;;  %v1715_v1 = vperm.slane %v1521_v8, 3  ;;  %v1743_v37 = vperm.slane %v1521_v8, 7 }
 0x1a8   : > { %v1736_v29 = vperm.slane %v1521_v8, 6 }
 0x1a9   : > { %1566 = vperm.xlu2 %4592, %v1561_v59   ;;  %1559 = vperm.xlu1 %4593, %v1554_v27   ;;  %v1708_v59 = vperm.slane %v1521_v8, 2  ;;  %v1722_v27 = vperm.slane %v1521_v8, 4 }
 0x1aa   : > { %1552 = vperm.xlu0 %4588, %v1547_v14   ;;  %v1729_v14 = vperm.slane %v1521_v8, 5 }
 0x1b1   : > { %1580 = vperm.xlu1 %4593, %v1575_v56   ;;  %v1487_v39 = vpop.permute.xlu0 %1486  ;;  %v1489_v26 = vpop.permute.xlu1 %1488  ;;  %v2007_v56 = vperm.slane %v1522_v47, 0 }
 0x1b2   : > { %1573 = vperm.xlu0 %4588, %v1568_v61   ;;  %v5644_v11 = vsel %vm607_vm1, %v1405_v42, %v1487_v39  ;;  %v5655_v60 = vsel %vm607_vm1, %v1412_v53, %v1489_v26 }
 0x1b3   : > { %v1510_v9 = vrot.slane %v5644_v11, 6  ;;  %v1511_v50 = vrot.slane %v5655_v60, 6  ;;  %v5681_v11 = vld [vmem:[%s6975_s4 + $0x8] sm:$0x3f] }
 0x1b5   : > { %v1519_v3 = vsel %vm1517_vm9, 0.0, %v1510_v9  ;;  %v1520_v0 = vsel %vm1517_vm9, 0.0, %v1511_v50  ;;  %v1523_v40 = vsel %vm1517_vm9, %v1510_v9, 0.0  ;;  %v1524_v54 = vsel %vm1517_vm9, %v1511_v50, 0.0 }
 0x1b6   : > { %v1582_v48 = vperm.slane %v1519_v3, 0  ;;  %v1596_v35 = vperm.slane %v1519_v3, 2  ;;  %v1589_v19 = vperm.slane %v1519_v3, 1  ;;  %v1603_v44 = vperm.slane %v1519_v3, 3 }
 0x1b7   : > { %v1617_v24 = vperm.slane %v1519_v3, 5  ;;  %v1610_v38 = vperm.slane %v1519_v3, 4  ;;  %v1624_v36 = vperm.slane %v1519_v3, 6  ;;  %v1638_v17 = vperm.slane %v1520_v0, 0 }
 0x1b8   : > { %1587 = vperm.xlu2 %4592, %v1582_v48   ;;  %v1631_v22 = vperm.slane %v1519_v3, 7  ;;  %v1645_v49 = vperm.slane %v1520_v0, 1  ;;  %v1659_v10 = vperm.slane %v1520_v0, 3  ;;  %v1652_v51 = vperm.slane %v1520_v0, 2 }
 0x1b9   : > { %1601 = vperm.xlu1 %4593, %v1596_v35   ;;  %v1666_v52 = vperm.slane %v1520_v0, 4  ;;  %v1680_v25 = vperm.slane %v1520_v0, 6  ;;  %v1673_v15 = vperm.slane %v1520_v0, 5  ;;  %v1687_v43 = vperm.slane %v1520_v0, 7 }
 0x1ba   : > { %1594 = vperm.xlu0 %4588, %v1589_v19   ;;  %v2021_v61 = vperm.slane %v1523_v40, 0  ;;  %v2028_v32 = vperm.slane %v1523_v40, 1  ;;  %v2042_v41 = vperm.slane %v1524_v54, 1  ;;  %v2035_v42 = vperm.slane %v1524_v54, 0 }
 0x1bb   : > { %v2049_v9 = vperm.slane %v5671_v6, 0  ;;  %v2056_v3 = vperm.slane %v5671_v6, 1  ;;  %v2372_v60 = vperm.slane %v1523_v40, 3  ;;  %v2386_v8 = vperm.slane %v1524_v54, 3 }
 0x1c0   : > { %1608 = vperm.xlu2 %4592, %v1603_v44   ;;  %v2365_v44 = vperm.slane %v1523_v40, 2 }
 0x1c1   : > { %1622 = vperm.xlu1 %4593, %v1617_v24  }
 0x1c2   : > { %1615 = vperm.xlu0 %4588, %v1610_v38  }
 0x1c8   : > { %1629 = vperm.xlu2 %4592, %v1624_v36  }
 0x1c9   : > { %1643 = vperm.xlu1 %4593, %v1638_v17  }
 0x1ca   : > { %1636 = vperm.xlu0 %4588, %v1631_v22  }
 0x1d0   : > { %1650 = vperm.xlu2 %4592, %v1645_v49  }
 0x1d1   : > { %1664 = vperm.xlu1 %4593, %v1659_v10  }
 0x1d2   : > { %1657 = vperm.xlu0 %4588, %v1652_v51   ;;  %v2379_v51 = vperm.slane %v1524_v54, 2 }
 0x1d8   : > { %1671 = vperm.xlu2 %4592, %v1666_v52   ;;  %v2393_v52 = vperm.slane %v5671_v6, 2 }
 0x1d9   : > { %1685 = vperm.xlu1 %4593, %v1680_v25  }
 0x1da   : > { %1678 = vperm.xlu0 %4588, %v1673_v15  }
 0x1e0   : > { %1692 = vperm.xlu2 %4592, %v1687_v43  }
 0x1e1   : > { %1706 = vperm.xlu1 %4593, %v1701_v13  }
 0x1e2   : > { %1699 = vperm.xlu0 %4588, %v1694_v7  }
 0x1e8   : > { %1713 = vperm.xlu2 %4592, %v1708_v59  }
 0x1e9   : > { %1727 = vperm.xlu1 %4593, %v1722_v27  }
 0x1ea   : > { %1720 = vperm.xlu0 %4588, %v1715_v1  }
 0x1f0   : > { %1734 = vperm.xlu2 %4592, %v1729_v14  }
 0x1f1   : > { %1748 = vperm.xlu1 %4593, %v1743_v37  }
 0x1f2   : > { %1741 = vperm.xlu0 %4588, %v1736_v29  }
 0x1f8   : > { %2012 = vperm.xlu2 %4592, %v2007_v56  }
 0x1f9   : > { %2026 = vperm.xlu1 %4593, %v2021_v61  }
 0x1fa   : > { %2019 = vperm.xlu0 %4588, %v2014_v55  }
 0x1fb   : > { %v1546_v39 = vpop.permute.xlu2 %1545 }
 0x1fc   : > { %v1752_v4 = vmul.f32 %v1546_v39, %v5676_v33  ;;  %v2063_v2 = vmul.f32 %v1546_v39, %v5681_v11 }
 0x1fe   : > { %v1797_v35 = vsel %vm1782_vm10, %v1752_v4, 0.0  ;;  %v2095_v19 = vsel %vm1782_vm10, %v2063_v2, 0.0 }
 0x1ff   : > { %v1798_v57 = vrot.slane %v1797_v35, 4  ;;  %v2096_v26 = vrot.slane %v2095_v19, 4 }
 0x200   : > { %2033 = vperm.xlu2 %4592, %v2028_v32  }
 0x201   : > { %2047 = vperm.xlu1 %4593, %v2042_v41   ;;  %v1799_v38 = vadd.f32 %v1798_v57, %v1797_v35  ;;  %v2097_v16 = vadd.f32 %v2096_v26, %v2095_v19 }
 0x202   : > { %2040 = vperm.xlu0 %4588, %v2035_v42   ;;  %v2400_v42 = vperm.slane %v5671_v6, 3 }
 0x203   : > { %v1567_v48 = vpop.permute.xlu2 %1566  ;;  %v1800_v34 = vrot.slane %v1799_v38, 2  ;;  %v2098_v5 = vrot.slane %v2097_v16, 2 }
 0x204   : > { %v1755_v53 = vmul.f32 %v1567_v48, %v5676_v33  ;;  %v2066_v24 = vmul.f32 %v1567_v48, %v5681_v11  ;;  %v2408_v30 = vmul.f32 %v1567_v48, %v5692_v23 }
 0x205   : > { %v1801_v47 = vadd.f32 %v1800_v34, %v1799_v38  ;;  %v2099_v40 = vadd.f32 %v2098_v5, %v2097_v16 }
 0x206   : > { %v1818_v0 = vsel %vm1782_vm10, %v1755_v53, 0.0  ;;  %v2116_v10 = vsel %vm1782_vm10, %v2066_v24, 0.0  ;;  %v2446_v46 = vsel %vm1782_vm10, %v2408_v30, 0.0 }
 0x207   : > { %v1819_v49 = vrot.slane %v1818_v0, 4  ;;  %v2117_v43 = vrot.slane %v2116_v10, 4  ;;  %v2447_v13 = vrot.slane %v2446_v46, 4  ;;  %v1802_v48 = vrot.slane %v1801_v47, 1 }
 0x208   : > { %2054 = vperm.xlu2 %4592, %v2049_v9   ;;  %v2100_v35 = vrot.slane %v2099_v40, 1 }
 0x209   : > { %2356 = vperm.xlu1 %4593, %v2351_v28   ;;  %v1820_v7 = vadd.f32 %v1819_v49, %v1818_v0  ;;  %v2118_v61 = vadd.f32 %v2117_v43, %v2116_v10  ;;  %v2448_v55 = vadd.f32 %v2447_v13, %v2446_v46 }
 0x20a   : > { %2061 = vperm.xlu0 %4588, %v2056_v3   ;;  %v2101_v43 = vadd.f32 %v2100_v35, %v2099_v40 }
 0x20b   : > { %v1821_v32 = vrot.slane %v1820_v7, 2  ;;  %v2119_v57 = vrot.slane %v2118_v61, 2  ;;  %v2449_v26 = vrot.slane %v2448_v55, 2 }
 0x20d   : > { %v2120_v34 = vadd.f32 %v2119_v57, %v2118_v61  ;;  %v2450_v5 = vadd.f32 %v2449_v26, %v2448_v55 }
 0x210   : > { %2363 = vperm.xlu2 %4592, %v2358_v12  }
 0x211   : > { %2377 = vperm.xlu1 %4593, %v2372_v60  }
 0x212   : > { %2370 = vperm.xlu0 %4588, %v2365_v44   ;;  %v1588_v50 = vpop.permute.xlu2 %1587  ;;  %v1822_v44 = vadd.f32 %v1821_v32, %v1820_v7 }
 0x213   : > { %v1539_v36 = vpop.permute.xlu1 %1538  ;;  %v1758_v17 = vmul.f32 %v1588_v50, %v5676_v33 }
 0x214   : > { %v1751_v62 = vmul.f32 %v1539_v36, %v5676_v33  ;;  %v1532_v22 = vpop.permute.xlu0 %1531  ;;  %v5719_v36 = vadd.f32 %v1802_v48, %v1801_v47  ;;  %v2121_v47 = vrot.slane %v2120_v34, 1 }
 0x215   : > { %v1750_v21 = vmul.f32 %v1532_v22, %v5676_v33  ;;  %v1839_v25 = vsel %vm1782_vm10, %v1758_v17, 0.0 }
 0x216   : > { %v1790_v58 = vsel %vm1782_vm10, %v1751_v62, 0.0  ;;  %v1840_v27 = vrot.slane %v1839_v25, 4 }
 0x217   : > { %v1783_v20 = vsel %vm1782_vm10, %v1750_v21, 0.0  ;;  %v1791_v1 = vrot.slane %v1790_v58, 4 }
 0x218   : > { %v1784_v15 = vrot.slane %v1783_v20, 4  ;;  %2384 = vperm.xlu2 %4592, %v2379_v51   ;;  %v1841_v9 = vadd.f32 %v1840_v27, %v1839_v25  ;;  %v1823_v25 = vrot.slane %v1822_v44, 1  ;;  %v7088_v27 = vld [vmem:[#allocation6_spill] sm:$0xff] }
 0x219   : > { %2398 = vperm.xlu1 %4593, %v2393_v52   ;;  %v1792_v28 = vadd.f32 %v1791_v1, %v1790_v58 }
 0x21a   : > { %2391 = vperm.xlu0 %4588, %v2386_v8   ;;  %v1609_v59 = vpop.permute.xlu2 %1608  ;;  %v1785_v56 = vadd.f32 %v1784_v15, %v1783_v20  ;;  %v1842_v50 = vrot.slane %v1841_v9, 2 }
 0x21b   : > { %v1761_v14 = vmul.f32 %v1609_v59, %v5676_v33  ;;  %v2072_v37 = vmul.f32 %v1609_v59, %v5681_v11  ;;  %v1560_v29 = vpop.permute.xlu1 %1559  ;;  %v1793_v38 = vrot.slane %v1792_v28, 2 }
 0x21c   : > { %v2407_v54 = vmul.f32 %v1560_v29, %v5692_v23  ;;  %v1754_v39 = vmul.f32 %v1560_v29, %v5676_v33  ;;  %v1553_v3 = vpop.permute.xlu0 %1552  ;;  %v1786_v19 = vrot.slane %v1785_v56, 2  ;;  %v2065_v12 = vmul.f32 %v1560_v29, %v5681_v11 }
 0x21d   : > { %v1860_v41 = vsel %vm1782_vm10, %v1761_v14, 0.0  ;;  %v2158_v4 = vsel %vm1782_vm10, %v2072_v37, 0.0  ;;  %v1753_v30 = vmul.f32 %v1553_v3, %v5676_v33  ;;  %v2064_v0 = vmul.f32 %v1553_v3, %v5681_v11 }
 0x21e   : > { %v2439_v2 = vsel %vm1782_vm10, %v2407_v54, 0.0  ;;  %v1861_v53 = vrot.slane %v1860_v41, 4  ;;  %v2159_v24 = vrot.slane %v2158_v4, 4  ;;  %v1811_v6 = vsel %vm1782_vm10, %v1754_v39, 0.0 }
 0x21f   : > { %v2440_v60 = vrot.slane %v2439_v2, 4  ;;  %v1787_v17 = vadd.f32 %v1786_v19, %v1785_v56  ;;  %v2109_v62 = vsel %vm1782_vm10, %v2065_v12, 0.0  ;;  %v1804_v22 = vsel %vm1782_vm10, %v1753_v30, 0.0 }
 0x220   : > { %2405 = vperm.xlu2 %4592, %v2400_v42   ;;  %v1862_v21 = vadd.f32 %v1861_v53, %v1860_v41  ;;  %v1812_v49 = vrot.slane %v1811_v6, 4  ;;  %v1805_v46 = vrot.slane %v1804_v22, 4  ;;  %v2160_v20 = vadd.f32 %v2159_v24, %v2158_v4 }
 0x221   : > { %v2441_v16 = vadd.f32 %v2440_v60, %v2439_v2  ;;  %v2102_v52 = vsel %vm1782_vm10, %v2064_v0, 0.0  ;;  %v1843_v58 = vadd.f32 %v1842_v50, %v1841_v9  ;;  %v1794_v15 = vadd.f32 %v1793_v38, %v1792_v28 }
 0x222   : > { %v1630_v51 = vpop.permute.xlu2 %1629  ;;  %v2110_v8 = vrot.slane %v2109_v62, 4  ;;  %v1806_v13 = vadd.f32 %v1805_v46, %v1804_v22  ;;  %v2103_v7 = vrot.slane %v2102_v52, 4  ;;  %v1788_v1 = vrot.slane %v1787_v17, 1 }
 0x223   : > { %v2442_v10 = vrot.slane %v2441_v16, 2  ;;  %v1764_v59 = vmul.f32 %v1630_v51, %v5676_v33  ;;  %v1863_v14 = vrot.slane %v1862_v21, 2  ;;  %v1813_v37 = vadd.f32 %v1812_v49, %v1811_v6  ;;  %v1581_v24 = vpop.permute.xlu1 %1580 }
 0x224   : > { %v2451_v56 = vrot.slane %v2450_v5, 1  ;;  %v2161_v61 = vrot.slane %v2160_v20, 2  ;;  %v2104_v55 = vadd.f32 %v2103_v7, %v2102_v52  ;;  %v5726_v54 = vadd.f32 %v1823_v25, %v1822_v44  ;;  %v1574_v22 = vpop.permute.xlu0 %1573 }
 0x225   : > { %v2443_v29 = vadd.f32 %v2442_v10, %v2441_v16  ;;  %v1844_v32 = vrot.slane %v1843_v58, 1  ;;  %v1795_v41 = vrot.slane %v1794_v15, 1  ;;  %v2111_v39 = vadd.f32 %v2110_v8, %v2109_v62 }
 0x226   : > { %v1807_v40 = vrot.slane %v1806_v13, 2  ;;  %v2105_v42 = vrot.slane %v2104_v55, 2  ;;  %v1881_v9 = vsel %vm1782_vm10, %v1764_v59, 0.0  ;;  %v2075_v28 = vmul.f32 %v1630_v51, %v5681_v11 }
 0x227   : > { %v1789_v4 = vadd.f32 %v1788_v1, %v1787_v17  ;;  %v1864_v2 = vadd.f32 %v1863_v14, %v1862_v21  ;;  %v1814_v3 = vrot.slane %v1813_v37, 2  ;;  %v2444_v48 = vrot.slane %v2443_v29, 1 }
 0x228   : > { %4594 = vset.pattern.permute.xlu2 %v7088_v27  ;;  %v2452_v35 = vadd.f32 %v2451_v56, %v2450_v5  ;;  %v2162_v19 = vadd.f32 %v2161_v61, %v2160_v20  ;;  %v2122_v12 = vadd.f32 %v2121_v47, %v2120_v34  ;;  %v2106_v57 = vadd.f32 %v2105_v42, %v2104_v55 }
 0x229   : > { %v5730_v26 = vadd.f32 %v1844_v32, %v1843_v58  ;;  %v2112_v53 = vrot.slane %v2111_v39, 2  ;;  %v1882_v60 = vrot.slane %v1881_v9, 4  ;;  %v2417_v44 = vmul.f32 %v1630_v51, %v5692_v23 }
 0x22a   : > { %v1796_v6 = vadd.f32 %v1795_v41, %v1794_v15  ;;  %v1808_v30 = vadd.f32 %v1807_v40, %v1806_v13  ;;  %v2107_v50 = vrot.slane %v2106_v57, 1  ;;  %v2179_v38 = vsel %vm1782_vm10, %v2075_v28, 0.0 }
 0x22b   : > { %v2319_v16 = vadd.f32 %v2101_v43, %v1789_v4  ;;  %v1865_v0 = vrot.slane %v1864_v2, 1  ;;  %v1815_v17 = vadd.f32 %v1814_v3, %v1813_v37  ;;  %v2445_v62 = vadd.f32 %v2444_v48, %v2443_v29  ;;  %v5744_v43 = vld [vmem:[%s6976_s5] ss:$0 sm:$0xff] }
 0x22c   : > { %v2163_v21 = vrot.slane %v2162_v19, 1  ;;  %v2108_v49 = vadd.f32 %v2107_v50, %v2106_v57  ;;  %v2068_v10 = vmul.f32 %v1581_v24, %v5681_v11  ;;  %v2410_v46 = vmul.f32 %v1581_v24, %v5692_v23 }
 0x22d   : > { %v2113_v34 = vadd.f32 %v2112_v53, %v2111_v39  ;;  %v1883_v5 = vadd.f32 %v1882_v60, %v1881_v9  ;;  %v2180_v51 = vrot.slane %v2179_v38, 4  ;;  %v2509_v20 = vsel %vm1782_vm10, %v2417_v44, 0.0  ;;  %v1602_v44 = vpop.permute.xlu1 %1601 }
 0x22e   : > { %v1809_v52 = vrot.slane %v1808_v30, 1  ;;  %v2320_v25 = vadd.f32 %v2108_v49, %v1796_v6  ;;  %v1757_v58 = vmul.f32 %v1581_v24, %v5676_v33  ;;  %v2460_v15 = vsel %vm1782_vm10, %v2410_v46, 0.0  ;;  %v1595_v24 = vpop.permute.xlu0 %1594 }
 0x22f   : > { %v5739_v8 = vadd.f32 %v1865_v0, %v1864_v2  ;;  %v1816_v13 = vrot.slane %v1815_v17, 1  ;;  %v2663_v7 = vadd.f32 %v2445_v62, %v2319_v16  ;;  %v2461_v59 = vrot.slane %v2460_v15, 4 }
 0x230   : > { %v2664_v1 = vadd.f32 %v2452_v35, %v2320_v25  ;;  %v2510_v14 = vrot.slane %v2509_v20, 4  ;;  %v2130_v37 = vsel %vm1782_vm10, %v2068_v10, 0.0  ;;  %v1756_v29 = vmul.f32 %v1574_v22, %v5676_v33 }
 0x231   : > { %v5748_v47 = vadd.f32 %v2163_v21, %v2162_v19  ;;  %v1884_v56 = vrot.slane %v1883_v5, 2  ;;  %v2181_v61 = vadd.f32 %v2180_v51, %v2179_v38  ;;  %v2067_v55 = vmul.f32 %v1574_v22, %v5681_v11 }
 0x232   : > { %v2114_v32 = vrot.slane %v2113_v34, 1  ;;  %v1810_v41 = vadd.f32 %v1809_v52, %v1808_v30  ;;  %v2699_v39 = vadd.f32 %v5744_v43, %v2664_v1  ;;  %v1832_v40 = vsel %vm1782_vm10, %v1757_v58, 0.0 }
 0x233   : > { %v5753_v42 = vadd.f32 %v1816_v13, %v1815_v17  ;;  %v2698_v9 = vadd.f32 %v5744_v43, %v2663_v7  ;;  %v2131_v28 = vrot.slane %v2130_v37, 4  ;;  %v2462_v4 = vadd.f32 %v2461_v59, %v2460_v15 }
 0x234   : > { %v2790_v2 = vrot.slane %v2699_v39, 7  ;;  %v2511_v3 = vadd.f32 %v2510_v14, %v2509_v20  ;;  %v1825_v48 = vsel %vm1782_vm10, %v1756_v29, 0.0  ;;  %v2409_v35 = vmul.f32 %v1574_v22, %v5692_v23  ;;  %v1651_v22 = vpop.permute.xlu2 %1650 }
 0x235   : > { %v1885_v19 = vadd.f32 %v1884_v56, %v1883_v5  ;;  %v2182_v57 = vrot.slane %v2181_v61, 2  ;;  %v1833_v53 = vrot.slane %v1832_v40, 4  ;;  %v2123_v60 = vsel %vm1782_vm10, %v2067_v55, 0.0 }
 0x236   : > { %v2115_v6 = vadd.f32 %v2114_v32, %v2113_v34  ;;  %v5759_v30 = vadd.f32 %v2122_v12, %v1810_v41  ;;  %v5762_v50 = vsel %vm1385_vm2, %v2790_v2, %v2698_v9  ;;  %v2453_v38 = vsel %vm1782_vm10, %v2409_v35, 0.0 }
 0x237   : > { %v2132_v16 = vadd.f32 %v2131_v28, %v2130_v37  ;;  %v2463_v0 = vrot.slane %v2462_v4, 2  ;;  %v1826_v17 = vrot.slane %v1825_v48, 4  ;;  %v2454_v62 = vrot.slane %v2453_v38, 4 }
 0x238   : > { %v2512_v21 = vrot.slane %v2511_v3, 2  ;;  %v2124_v49 = vrot.slane %v2123_v60, 4  ;;  %v2071_v10 = vmul.f32 %v1602_v44, %v5681_v11  ;;  %v1759_v46 = vmul.f32 %v1595_v24, %v5676_v33 }
 0x239   : > { %v1886_v5 = vrot.slane %v1885_v19, 1  ;;  %v2183_v34 = vadd.f32 %v2182_v57, %v2181_v61  ;;  %v1834_v12 = vadd.f32 %v1833_v53, %v1832_v40  ;;  %v2455_v51 = vadd.f32 %v2454_v62, %v2453_v38 }
 0x23a   : > { %v1767_v20 = vmul.f32 %v1651_v22, %v5676_v33  ;;  %v1760_v52 = vmul.f32 %v1602_v44, %v5676_v33  ;;  %v2151_v25 = vsel %vm1782_vm10, %v2071_v10, 0.0  ;;  %v1846_v58 = vsel %vm1782_vm10, %v1759_v46, 0.0  ;;  %v1623_v10 = vpop.permute.xlu1 %1622 }
 0x23b   : > { %v2133_v15 = vrot.slane %v2132_v16, 2  ;;  %v2464_v13 = vadd.f32 %v2463_v0, %v2462_v4  ;;  %v1827_v7 = vadd.f32 %v1826_v17, %v1825_v48  ;;  %v2456_v59 = vrot.slane %v2455_v51, 2 }
 0x23c   : > { %v2513_v1 = vadd.f32 %v2512_v21, %v2511_v3  ;;  %v2125_v14 = vadd.f32 %v2124_v49, %v2123_v60  ;;  %v2152_v37 = vrot.slane %v2151_v25, 4  ;;  %v1847_v29 = vrot.slane %v1846_v58, 4  ;;  %v1672_v49 = vpop.permute.xlu2 %1671 }
 0x23d   : > { %v2184_v56 = vrot.slane %v2183_v34, 1  ;;  %v1835_v61 = vrot.slane %v1834_v12, 2  ;;  %v2321_v55 = vadd.f32 %v2115_v6, %v5719_v36  ;;  %v2457_v32 = vadd.f32 %v2456_v59, %v2455_v51 }
 0x23e   : > { %v1902_v41 = vsel %vm1782_vm10, %v1767_v20, 0.0  ;;  %v1853_v39 = vsel %vm1782_vm10, %v1760_v52, 0.0  ;;  %v2153_v40 = vadd.f32 %v2152_v37, %v2151_v25  ;;  %v1848_v9 = vadd.f32 %v1847_v29, %v1846_v58 }
 0x23f   : > { %v2134_v28 = vadd.f32 %v2133_v15, %v2132_v16  ;;  %v2465_v2 = vrot.slane %v2464_v13, 1  ;;  %v1828_v4 = vrot.slane %v1827_v7, 2  ;;  %v2458_v48 = vrot.slane %v2457_v32, 1 }
 0x240   : > { %v2514_v35 = vrot.slane %v2513_v1, 1  ;;  %v2126_v3 = vrot.slane %v2125_v14, 2  ;;  %v2154_v57 = vrot.slane %v2153_v40, 2  ;;  %v1849_v53 = vrot.slane %v1848_v9, 2 }
 0x241   : > { %v5774_v60 = vadd.f32 %v1835_v61, %v1834_v12  ;;  %v2459_v44 = vadd.f32 %v2458_v48, %v2457_v32  ;;  %v1903_v24 = vrot.slane %v1902_v41, 4  ;;  %v1854_v36 = vrot.slane %v1853_v39, 4 }
 0x242   : > { %v5776_v6 = vadd.f32 %v1886_v5, %v1885_v19  ;;  %v5778_v38 = vadd.f32 %v2184_v56, %v2183_v34  ;;  %v2155_v0 = vadd.f32 %v2154_v57, %v2153_v40  ;;  %v1850_v17 = vadd.f32 %v1849_v53, %v1848_v9 }
 0x243   : > { %v2135_v62 = vrot.slane %v2134_v28, 1  ;;  %v2466_v16 = vadd.f32 %v2465_v2, %v2464_v13  ;;  %v1829_v22 = vadd.f32 %v1828_v4, %v1827_v7  ;;  %v2665_v21 = vadd.f32 %v2459_v44, %v2321_v55  ;;  %v1616_v55 = vpop.permute.xlu0 %1615 }
 0x244   : > { %v5780_v46 = vadd.f32 %v2514_v35, %v2513_v1  ;;  %v2127_v51 = vadd.f32 %v2126_v3, %v2125_v14  ;;  %v2156_v12 = vrot.slane %v2155_v0, 1  ;;  %v1851_v20 = vrot.slane %v1850_v17, 1 }
 0x245   : > { %v2700_v19 = vadd.f32 %v5744_v43, %v2665_v21  ;;  %v1904_v5 = vadd.f32 %v1903_v24, %v1902_v41  ;;  %v1855_v34 = vadd.f32 %v1854_v36, %v1853_v39  ;;  %v1770_v15 = vmul.f32 %v1672_v49, %v5676_v33 }
 0x246   : > { %v2157_v25 = vadd.f32 %v2156_v12, %v2155_v0  ;;  %v1852_v58 = vadd.f32 %v1851_v20, %v1850_v17  ;;  %v2074_v13 = vmul.f32 %v1623_v10, %v5681_v11  ;;  %v5786_v7 = vadd.f32 %v2135_v62, %v2134_v28 }
 0x247   : > { %v2666_v59 = vadd.f32 %v2466_v16, %v5759_v30  ;;  %v1830_v1 = vrot.slane %v1829_v22, 1  ;;  %v2792_v14 = vrot.slane %v2700_v19, 6  ;;  %v2128_v37 = vrot.slane %v2127_v51, 1 }
 0x248   : > { %v5790_v29 = vadd.f32 %v2157_v25, %v5730_v26  ;;  %v5793_v56 = vadd.f32 %v5748_v47, %v1852_v58  ;;  %v2081_v61 = vmul.f32 %v1672_v49, %v5681_v11  ;;  %v1905_v41 = vrot.slane %v1904_v5, 2 }
 0x249   : > { %v5798_v32 = vsel %vm1387_vm3, %v2792_v14, %v5762_v50  ;;  %v1856_v39 = vrot.slane %v1855_v34, 2  ;;  %v2172_v30 = vsel %vm1782_vm10, %v2074_v13, 0.0  ;;  %v1923_v40 = vsel %vm1782_vm10, %v1770_v15, 0.0 }
 0x24a   : > { %v2423_v9 = vmul.f32 %v1672_v49, %v5692_v23  ;;  %v2173_v26 = vrot.slane %v2172_v30, 4  ;;  %v2416_v28 = vmul.f32 %v1623_v10, %v5692_v23  ;;  %v5805_v47 = vadd.f32 %v5744_v43, %v2666_v59 }
 0x24b   : > { %v5807_v2 = vadd.f32 %v1830_v1, %v1829_v22  ;;  %v1762_v4 = vmul.f32 %v1616_v55, %v5676_v33  ;;  %v2073_v50 = vmul.f32 %v1616_v55, %v5681_v11  ;;  %v5811_v48 = vadd.f32 %v2128_v37, %v2127_v51  ;;  %v1693_v37 = vpop.permute.xlu2 %1692 }
 0x24c   : > { %v2221_v35 = vsel %vm1782_vm10, %v2081_v61, 0.0  ;;  %v2174_v3 = vadd.f32 %v2173_v26, %v2172_v30  ;;  %v2502_v57 = vsel %vm1782_vm10, %v2416_v28, 0.0  ;;  %v1924_v53 = vrot.slane %v1923_v40, 4 }
 0x24d   : > { %v1763_v44 = vmul.f32 %v1623_v10, %v5676_v33  ;;  %v2503_v24 = vrot.slane %v2502_v57, 4  ;;  %v1867_v36 = vsel %vm1782_vm10, %v1762_v4, 0.0  ;;  %v1857_v0 = vadd.f32 %v1856_v39, %v1855_v34 }
 0x24e   : > { %v2551_v17 = vsel %vm1782_vm10, %v2423_v9, 0.0  ;;  %v2175_v62 = vrot.slane %v2174_v3, 2  ;;  %v1868_v16 = vrot.slane %v1867_v36, 4  ;;  %v2222_v22 = vrot.slane %v2221_v35, 4 }
 0x24f   : > { %v2504_v21 = vadd.f32 %v2503_v24, %v2502_v57  ;;  %v2165_v49 = vsel %vm1782_vm10, %v2073_v50, 0.0  ;;  %v2415_v51 = vmul.f32 %v1616_v55, %v5692_v23  ;;  %v1906_v12 = vadd.f32 %v1905_v41, %v1904_v5 }
 0x250   : > { %v2176_v20 = vadd.f32 %v2175_v62, %v2174_v3  ;;  %v1869_v19 = vadd.f32 %v1868_v16, %v1867_v36  ;;  %v2166_v25 = vrot.slane %v2165_v49, 4  ;;  %v1925_v58 = vadd.f32 %v1924_v53, %v1923_v40 }
 0x251   : > { %v1874_v10 = vsel %vm1782_vm10, %v1763_v44, 0.0  ;;  %v2505_v15 = vrot.slane %v2504_v21, 2  ;;  %v2495_v34 = vsel %vm1782_vm10, %v2415_v51, 0.0  ;;  %v2552_v13 = vrot.slane %v2551_v17, 4 }
 0x252   : > { %v2177_v59 = vrot.slane %v2176_v20, 1  ;;  %v1870_v1 = vrot.slane %v1869_v19, 2  ;;  %v2167_v14 = vadd.f32 %v2166_v25, %v2165_v49  ;;  %v1858_v61 = vrot.slane %v1857_v0, 1  ;;  %v1644_v25 = vpop.permute.xlu1 %1643 }
 0x253   : > { %v2223_v39 = vadd.f32 %v2222_v22, %v2221_v35  ;;  %v2506_v30 = vadd.f32 %v2505_v15, %v2504_v21  ;;  %v2496_v9 = vrot.slane %v2495_v34, 4  ;;  %v1875_v55 = vrot.slane %v1874_v10, 4 }
 0x254   : > { %v2178_v5 = vadd.f32 %v2177_v59, %v2176_v20  ;;  %v1871_v41 = vadd.f32 %v1870_v1, %v1869_v19  ;;  %v2168_v26 = vrot.slane %v2167_v14, 2  ;;  %v1926_v28 = vrot.slane %v1925_v58, 2 }
 0x255   : > { %v2507_v40 = vrot.slane %v2506_v30, 1  ;;  %v2497_v4 = vadd.f32 %v2496_v9, %v2495_v34  ;;  %v1773_v50 = vmul.f32 %v1693_v37, %v5676_v33  ;;  %v2553_v3 = vadd.f32 %v2552_v13, %v2551_v17 }
 0x256   : > { %v5824_v57 = vadd.f32 %v2178_v5, %v5739_v8  ;;  %v1872_v53 = vrot.slane %v1871_v41, 1  ;;  %v2169_v44 = vadd.f32 %v2168_v26, %v2167_v14  ;;  %v1907_v24 = vrot.slane %v1906_v12, 1 }
 0x257   : > { %v2508_v36 = vadd.f32 %v2507_v40, %v2506_v30  ;;  %v2498_v35 = vrot.slane %v2497_v4, 2  ;;  %v2084_v62 = vmul.f32 %v1693_v37, %v5681_v11  ;;  %v2224_v16 = vrot.slane %v2223_v39, 2 }
 0x258   : > { %v1876_v22 = vadd.f32 %v1875_v55, %v1874_v10  ;;  %v1873_v21 = vadd.f32 %v1872_v53, %v1871_v41  ;;  %v2170_v49 = vrot.slane %v2169_v44, 1  ;;  %v1927_v51 = vadd.f32 %v1926_v28, %v1925_v58  ;;  %v1637_v55 = vpop.permute.xlu0 %1636 }
 0x259   : > { %v2672_v20 = vadd.f32 %v2508_v36, %v5793_v56  ;;  %v2499_v19 = vadd.f32 %v2498_v35, %v2497_v4  ;;  %v1944_v17 = vsel %vm1782_vm10, %v1773_v50, 0.0  ;;  %v1859_v8 = vadd.f32 %v1858_v61, %v1857_v0 }
 0x25a   : > { %v2554_v15 = vrot.slane %v2553_v3, 2  ;;  %v2171_v34 = vadd.f32 %v2170_v49, %v2169_v44  ;;  %v5830_v13 = vadd.f32 %v5778_v38, %v1873_v21  ;;  %v2794_v59 = vrot.slane %v5805_v47, 5 }
 0x25b   : > { %v2707_v1 = vadd.f32 %v5744_v43, %v2672_v20  ;;  %v2500_v10 = vrot.slane %v2499_v19, 1  ;;  %v2242_v14 = vsel %vm1782_vm10, %v2084_v62, 0.0  ;;  %v2225_v58 = vadd.f32 %v2224_v16, %v2223_v39  ;;  %v1665_v20 = vpop.permute.xlu1 %1664 }
 0x25c   : > { %v1877_v30 = vrot.slane %v1876_v22, 2  ;;  %v2329_v56 = vadd.f32 %v2171_v34, %v1859_v8  ;;  %v1945_v9 = vrot.slane %v1944_v17, 4  ;;  %v5837_v0 = vadd.f32 %v5811_v48, %v5753_v42 }
 0x25d   : > { %v5839_v61 = vadd.f32 %v1907_v24, %v1906_v12  ;;  %v1928_v38 = vrot.slane %v1927_v51, 1  ;;  %v2501_v5 = vadd.f32 %v2500_v10, %v2499_v19  ;;  %v2555_v41 = vadd.f32 %v2554_v15, %v2553_v3  ;;  %v1714_v15 = vpop.permute.xlu2 %1713 }
 0x25e   : > { %v2673_v26 = vadd.f32 %v5780_v46, %v2329_v56  ;;  %v2243_v28 = vrot.slane %v2242_v14, 4  ;;  %v1766_v40 = vmul.f32 %v1644_v25, %v5676_v33  ;;  %v2804_v4 = vrot.slane %v2707_v1, 7 }
 0x25f   : > { %v2671_v39 = vadd.f32 %v2501_v5, %v5790_v29  ;;  %v2426_v50 = vmul.f32 %v1693_v37, %v5692_v23  ;;  %v2076_v53 = vmul.f32 %v1637_v55, %v5681_v11  ;;  %v2226_v44 = vrot.slane %v2225_v58, 1 }
 0x260   : > { %v1878_v42 = vadd.f32 %v1877_v30, %v1876_v22  ;;  %v2708_v48 = vadd.f32 %v5744_v43, %v2673_v26  ;;  %v1946_v12 = vadd.f32 %v1945_v9, %v1944_v17  ;;  %v1765_v3 = vmul.f32 %v1637_v55, %v5676_v33  ;;  %v1658_v5 = vpop.permute.xlu0 %1657 }
 0x261   : > { %v2706_v24 = vadd.f32 %v5744_v43, %v2671_v39  ;;  %v2186_v46 = vsel %vm1782_vm10, %v2076_v53, 0.0  ;;  %v2418_v36 = vmul.f32 %v1637_v55, %v5692_v23  ;;  %v2556_v35 = vrot.slane %v2555_v41, 1 }
 0x262   : > { %v2806_v62 = vrot.slane %v2708_v48, 6  ;;  %v2244_v29 = vadd.f32 %v2243_v28, %v2242_v14  ;;  %v1895_v37 = vsel %vm1782_vm10, %v1766_v40, 0.0  ;;  %v2572_v22 = vsel %vm1782_vm10, %v2426_v50, 0.0 }
 0x263   : > { %v2805_v16 = vsel %vm1385_vm2, %v2804_v4, %v2706_v24  ;;  %v2187_v21 = vrot.slane %v2186_v46, 4  ;;  %v2516_v49 = vsel %vm1782_vm10, %v2418_v36, 0.0  ;;  %v1879_v19 = vrot.slane %v1878_v42, 1 }
 0x264   : > { %v5856_v17 = vsel %vm1387_vm3, %v2806_v62, %v2805_v16  ;;  %v1947_v25 = vrot.slane %v1946_v12, 2  ;;  %v2517_v8 = vrot.slane %v2516_v49, 4  ;;  %v5858_v34 = vadd.f32 %v1928_v38, %v1927_v51 }
 0x265   : > { %v1896_v1 = vrot.slane %v1895_v37, 4  ;;  %v1888_v10 = vsel %vm1782_vm10, %v1765_v3, 0.0  ;;  %v2188_v14 = vadd.f32 %v2187_v21, %v2186_v46  ;;  %v2245_v30 = vrot.slane %v2244_v29, 2 }
 0x266   : > { %v2573_v56 = vrot.slane %v2572_v22, 4  ;;  %v2518_v9 = vadd.f32 %v2517_v8, %v2516_v49  ;;  %v2080_v55 = vmul.f32 %v1665_v20, %v5681_v11  ;;  %v5862_v26 = vadd.f32 %v2226_v44, %v2225_v58 }
 0x267   : > { %v5864_v28 = vadd.f32 %v2556_v35, %v2555_v41  ;;  %v2189_v40 = vrot.slane %v2188_v14, 2  ;;  %v1776_v4 = vmul.f32 %v1714_v15, %v5676_v33  ;;  %v1880_v39 = vadd.f32 %v1879_v19, %v1878_v42 }
 0x268   : > { %v1948_v51 = vadd.f32 %v1947_v25, %v1946_v12  ;;  %v1889_v38 = vrot.slane %v1888_v10, 4  ;;  %v2519_v50 = vrot.slane %v2518_v9, 2  ;;  %v1897_v53 = vadd.f32 %v1896_v1, %v1895_v37 }
 0x269   : > { %v2190_v48 = vadd.f32 %v2189_v40, %v2188_v14  ;;  %v2214_v24 = vsel %vm1782_vm10, %v2080_v55, 0.0  ;;  %v1768_v3 = vmul.f32 %v1658_v5, %v5676_v33  ;;  %v2246_v46 = vadd.f32 %v2245_v30, %v2244_v29 }
 0x26a   : > { %v2574_v36 = vadd.f32 %v2573_v56, %v2572_v22  ;;  %v2520_v62 = vadd.f32 %v2519_v50, %v2518_v9  ;;  %v1769_v58 = vmul.f32 %v1665_v20, %v5676_v33  ;;  %v1965_v44 = vsel %vm1782_vm10, %v1776_v4, 0.0 }
 0x26b   : > { %v2191_v41 = vrot.slane %v2190_v48, 1  ;;  %v2215_v35 = vrot.slane %v2214_v24, 4  ;;  %v1909_v42 = vsel %vm1782_vm10, %v1768_v3, 0.0  ;;  %v1949_v12 = vrot.slane %v1948_v51, 1 }
 0x26c   : > { %v1890_v16 = vadd.f32 %v1889_v38, %v1888_v10  ;;  %v2521_v21 = vrot.slane %v2520_v62, 1  ;;  %v1910_v37 = vrot.slane %v1909_v42, 4  ;;  %v1898_v49 = vrot.slane %v1897_v53, 2 }
 0x26d   : > { %v2192_v19 = vadd.f32 %v2191_v41, %v2190_v48  ;;  %v2216_v25 = vadd.f32 %v2215_v35, %v2214_v24  ;;  %v2079_v8 = vmul.f32 %v1658_v5, %v5681_v11  ;;  %v1966_v22 = vrot.slane %v1965_v44, 4 }
 0x26e   : > { %v2522_v29 = vadd.f32 %v2521_v21, %v2520_v62  ;;  %v1916_v1 = vsel %vm1782_vm10, %v1769_v58, 0.0  ;;  %v1911_v20 = vadd.f32 %v1910_v37, %v1909_v42  ;;  %v2087_v30 = vmul.f32 %v1714_v15, %v5681_v11 }
 0x26f   : > { %v5874_v14 = vadd.f32 %v2192_v19, %v1880_v39  ;;  %v2217_v56 = vrot.slane %v2216_v25, 2  ;;  %v2207_v9 = vsel %vm1782_vm10, %v2079_v8, 0.0  ;;  %v2575_v10 = vrot.slane %v2574_v36, 2  ;;  %v1735_v19 = vpop.permute.xlu2 %1734 }
 0x270   : > { %v1891_v55 = vrot.slane %v1890_v16, 2  ;;  %v2674_v40 = vadd.f32 %v2522_v29, %v5824_v57  ;;  %v1912_v4 = vrot.slane %v1911_v20, 2  ;;  %v1899_v38 = vadd.f32 %v1898_v49, %v1897_v53 }
 0x271   : > { %v1917_v50 = vrot.slane %v1916_v1, 4  ;;  %v2218_v5 = vadd.f32 %v2217_v56, %v2216_v25  ;;  %v2208_v48 = vrot.slane %v2207_v9, 4  ;;  %v2247_v24 = vrot.slane %v2246_v46, 1  ;;  %v1679_v56 = vpop.permute.xlu0 %1678 }
 0x272   : > { %v2709_v3 = vadd.f32 %v5744_v43, %v2674_v40  ;;  %v1967_v62 = vadd.f32 %v1966_v22, %v1965_v44  ;;  %v1913_v39 = vadd.f32 %v1912_v4, %v1911_v20  ;;  %v5880_v58 = vadd.f32 %v1949_v12, %v1948_v51  ;;  %v1686_v22 = vpop.permute.xlu1 %1685 }
 0x273   : > { %v2263_v15 = vsel %vm1782_vm10, %v2087_v30, 0.0  ;;  %v2219_v41 = vrot.slane %v2218_v5, 1  ;;  %v2209_v35 = vadd.f32 %v2208_v48, %v2207_v9  ;;  %v2576_v42 = vadd.f32 %v2575_v10, %v2574_v36 }
 0x274   : > { %v1892_v21 = vadd.f32 %v1891_v55, %v1890_v16  ;;  %v2808_v37 = vrot.slane %v2709_v3, 5  ;;  %v1914_v57 = vrot.slane %v1913_v39, 1  ;;  %v1900_v53 = vrot.slane %v1899_v38, 1 }
 0x275   : > { %v1918_v49 = vadd.f32 %v1917_v50, %v1916_v1  ;;  %v2220_v25 = vadd.f32 %v2219_v41, %v2218_v5  ;;  %v2210_v8 = vrot.slane %v2209_v35, 2  ;;  %v1968_v44 = vrot.slane %v1967_v62, 2 }
 0x276   : > { %v5885_v29 = vsel %vm1389_vm4, %v2808_v37, %v5856_v17  ;;  %v2264_v51 = vrot.slane %v2263_v15, 4  ;;  %v1915_v12 = vadd.f32 %v1914_v57, %v1913_v39  ;;  %v5887_v20 = vadd.f32 %v2247_v24, %v2246_v46 }
 0x277   : > { %v5890_v36 = vadd.f32 %v2220_v25, %v5839_v61  ;;  %v2211_v16 = vadd.f32 %v2210_v8, %v2209_v35  ;;  %v1779_v30 = vmul.f32 %v1735_v19, %v5676_v33  ;;  %v2577_v1 = vrot.slane %v2576_v42, 1 }
 0x278   : > { %v1893_v9 = vrot.slane %v1892_v21, 1  ;;  %v5894_v10 = vadd.f32 %v5862_v26, %v1915_v12  ;;  %v2090_v17 = vmul.f32 %v1735_v19, %v5681_v11  ;;  %v1919_v55 = vrot.slane %v1918_v49, 2 }
 0x279   : > { %v2212_v40 = vrot.slane %v2211_v16, 1  ;;  %v2083_v4 = vmul.f32 %v1686_v22, %v5681_v11  ;;  %v2425_v46 = vmul.f32 %v1686_v22, %v5692_v23  ;;  %v1901_v50 = vadd.f32 %v1900_v53, %v1899_v38 }
 0x27a   : > { %v5899_v61 = vadd.f32 %v1968_v44, %v1967_v62  ;;  %v5901_v5 = vadd.f32 %v2264_v51, %v2263_v15  ;;  %v1771_v48 = vmul.f32 %v1679_v56, %v5676_v33  ;;  %v1986_v3 = vsel %vm1782_vm10, %v1779_v30, 0.0 }
 0x27b   : > { %v2213_v24 = vadd.f32 %v2212_v40, %v2211_v16  ;;  %v2235_v26 = vsel %vm1782_vm10, %v2083_v4, 0.0  ;;  %v2565_v39 = vsel %vm1782_vm10, %v2425_v46, 0.0  ;;  %v5907_v41 = vadd.f32 %v2577_v1, %v2576_v42  ;;  %v2013_v46 = vpop.permute.xlu2 %2012 }
 0x27c   : > { %v5909_v35 = vadd.f32 %v1893_v9, %v1892_v21  ;;  %v2284_v37 = vsel %vm1782_vm10, %v2090_v17, 0.0  ;;  %v2236_v38 = vrot.slane %v2235_v26, 4  ;;  %v1920_v62 = vadd.f32 %v1919_v55, %v1918_v49 }
 0x27d   : > { %v2335_v57 = vadd.f32 %v2213_v24, %v1901_v50  ;;  %v2566_v15 = vrot.slane %v2565_v39, 4  ;;  %v1930_v53 = vsel %vm1782_vm10, %v1771_v48, 0.0  ;;  %v1970_v25 = vrot.slane %v5899_v61, 1 }
 0x27e   : > { %v2266_v8 = vrot.slane %v5901_v5, 2  ;;  %v1987_v44 = vrot.slane %v1986_v3, 4  ;;  %v2237_v51 = vadd.f32 %v2236_v38, %v2235_v26  ;;  %v2285_v42 = vrot.slane %v2284_v37, 4 }
 0x27f   : > { %v5916_v12 = vadd.f32 %v5864_v28, %v2335_v57  ;;  %v2567_v21 = vadd.f32 %v2566_v15, %v2565_v39  ;;  %v1931_v16 = vrot.slane %v1930_v53, 4  ;;  %v2432_v30 = vmul.f32 %v1735_v19, %v5692_v23 }
 0x280   : > { %v2238_v1 = vrot.slane %v2237_v51, 2  ;;  %v2082_v49 = vmul.f32 %v1679_v56, %v5681_v11  ;;  %v2424_v9 = vmul.f32 %v1679_v56, %v5692_v23  ;;  %v1921_v17 = vrot.slane %v1920_v62, 1 }
 0x281   : > { %v1772_v55 = vmul.f32 %v1686_v22, %v5676_v33  ;;  %v2568_v40 = vrot.slane %v2567_v21, 2  ;;  %v1932_v4 = vadd.f32 %v1931_v16, %v1930_v53  ;;  %v1988_v50 = vadd.f32 %v1987_v44, %v1986_v3 }
 0x282   : > { %v2239_v48 = vadd.f32 %v2238_v1, %v2237_v51  ;;  %v2228_v28 = vsel %vm1782_vm10, %v2082_v49, 0.0  ;;  %v2558_v24 = vsel %vm1782_vm10, %v2424_v9, 0.0  ;;  %v2286_v26 = vadd.f32 %v2285_v42, %v2284_v37 }
 0x283   : > { %v2569_v39 = vadd.f32 %v2568_v40, %v2567_v21  ;;  %v1933_v19 = vrot.slane %v1932_v4, 2  ;;  %v2229_v38 = vrot.slane %v2228_v28, 4  ;;  %v2614_v11 = vsel %vm1782_vm10, %v2432_v30, 0.0 }
 0x284   : > { %v2240_v57 = vrot.slane %v2239_v48, 1  ;;  %v2559_v56 = vrot.slane %v2558_v24, 4  ;;  %v2411_v15 = vmul.f32 %v2013_v46, %v5692_v23  ;;  %v5930_v3 = vsel %vm1389_vm4, %v2794_v59, %v5798_v32  ;;  %v1700_v23 = vpop.permute.xlu0 %1699 }
 0x285   : > { %v2570_v33 = vrot.slane %v2569_v39, 1  ;;  %v1934_v22 = vadd.f32 %v1933_v19, %v1932_v4  ;;  %v2230_v53 = vadd.f32 %v2229_v38, %v2228_v28  ;;  %v1937_v37 = vsel %vm1782_vm10, %v1772_v55, 0.0  ;;  %v5941_v55 = vld [vmem:[%s6975_s4 + $0x8] sm:$0x3f] }
 0x286   : > { %v2241_v44 = vadd.f32 %v2240_v57, %v2239_v48  ;;  %v2560_v51 = vadd.f32 %v2559_v56, %v2558_v24  ;;  %v2467_v42 = vsel %vm1782_vm10, %v2411_v15, 0.0  ;;  %v1989_v21 = vrot.slane %v1988_v50, 2  ;;  %v1707_v15 = vpop.permute.xlu1 %1706 }
 0x287   : > { %v2571_v16 = vadd.f32 %v2570_v33, %v2569_v39  ;;  %v1935_v30 = vrot.slane %v1934_v22, 1  ;;  %v2231_v1 = vrot.slane %v2230_v53, 2  ;;  %v2287_v49 = vrot.slane %v2286_v26, 2 }
 0x288   : > { %v5935_v9 = vadd.f32 %v2241_v44, %v5858_v34  ;;  %v2561_v40 = vrot.slane %v2560_v51, 2  ;;  %v2468_v47 = vrot.slane %v2467_v42, 4  ;;  %v2069_v48 = vmul.f32 %v5941_v55, %v2013_v46  ;;  %v5947_v34 = vld [vmem:[%s6975_s4] sm:$0x3f] }
 0x289   : > { %v2681_v32 = vadd.f32 %v2571_v16, %v5894_v10  ;;  %v1936_v59 = vadd.f32 %v1935_v30, %v1934_v22  ;;  %v2232_v4 = vadd.f32 %v2231_v1, %v2230_v53  ;;  %v2615_v28 = vrot.slane %v2614_v11, 4 }
 0x28a   : > { %v2562_v24 = vadd.f32 %v2561_v40, %v2560_v51  ;;  %v2469_v39 = vadd.f32 %v2468_v47, %v2467_v42  ;;  %v1774_v19 = vmul.f32 %v5947_v34, %v1700_v23  ;;  %v2267_v10 = vadd.f32 %v2266_v8, %v5901_v5 }
 0x28b   : > { %v1922_v38 = vadd.f32 %v1921_v17, %v1920_v62  ;;  %v2233_v57 = vrot.slane %v2232_v4, 1  ;;  %v5952_v56 = vadd.f32 %v5887_v20, %v1936_v59  ;;  %v1938_v33 = vrot.slane %v1937_v37, 4 }
 0x28c   : > { %v2563_v46 = vrot.slane %v2562_v24, 1  ;;  %v2470_v22 = vrot.slane %v2469_v39, 2  ;;  %v1951_v53 = vsel %vm1782_vm10, %v1774_v19, 0.0  ;;  %v1990_v44 = vadd.f32 %v1989_v21, %v1988_v50 }
 0x28d   : > { %v2234_v51 = vadd.f32 %v2233_v57, %v2232_v4  ;;  %v2137_v42 = vsel %vm1782_vm10, %v2069_v48, 0.0  ;;  %v1952_v16 = vrot.slane %v1951_v53, 4  ;;  %v2288_v30 = vadd.f32 %v2287_v49, %v2286_v26 }
 0x28e   : > { %v2616_v1 = vadd.f32 %v2615_v28, %v2614_v11  ;;  %v2564_v23 = vadd.f32 %v2563_v46, %v2562_v24  ;;  %v2471_v5 = vadd.f32 %v2470_v22, %v2469_v39  ;;  %v2716_v62 = vadd.f32 %v5744_v43, %v2681_v32  ;;  %v2034_v11 = vpop.permute.xlu2 %2033 }
 0x28f   : > { %v2338_v8 = vadd.f32 %v2234_v51, %v1922_v38  ;;  %v1775_v20 = vmul.f32 %v5947_v34, %v1707_v15  ;;  %v1953_v17 = vadd.f32 %v1952_v16, %v1951_v53  ;;  %v2268_v40 = vrot.slane %v2267_v10, 1  ;;  %v1728_v51 = vpop.permute.xlu1 %1727 }
 0x290   : > { %v2680_v47 = vadd.f32 %v2564_v23, %v5890_v36  ;;  %v2138_v59 = vrot.slane %v2137_v42, 4  ;;  %v2472_v19 = vrot.slane %v2471_v5, 1  ;;  %v1991_v50 = vrot.slane %v1990_v44, 1 }
 0x291   : > { %v1939_v21 = vadd.f32 %v1938_v33, %v1937_v37  ;;  %v5960_v4 = vadd.f32 %v5907_v41, %v2338_v8  ;;  %v1954_v26 = vrot.slane %v1953_v17, 2  ;;  %v2289_v49 = vrot.slane %v2288_v30, 1  ;;  %v5970_v41 = vld [vmem:[%s6975_s4 + $0x10] sm:$0x3f] }
 0x292   : > { %v2617_v48 = vrot.slane %v2616_v1, 2  ;;  %v2715_v32 = vadd.f32 %v5744_v43, %v2680_v47  ;;  %v2473_v28 = vadd.f32 %v2472_v19, %v2471_v5  ;;  %v2714_v24 = vadd.f32 %v5744_v43, %v5916_v12  ;;  %v1721_v5 = vpop.permute.xlu0 %1720 }
 0x293   : > { %v2820_v39 = vrot.slane %v2716_v62, 6  ;;  %v1958_v36 = vsel %vm1782_vm10, %v1775_v20, 0.0  ;;  %v1955_v38 = vadd.f32 %v1954_v26, %v1953_v17  ;;  %v2139_v15 = vadd.f32 %v2138_v59, %v2137_v42 }
 0x294   : > { %v2818_v57 = vrot.slane %v2715_v32, 7  ;;  %v2667_v37 = vadd.f32 %v2473_v28, %v5837_v0  ;;  %v2420_v33 = vmul.f32 %v5970_v41, %v2034_v11  ;;  %v5976_v46 = vadd.f32 %v1970_v25, %v5899_v61 }
 0x295   : > { %v2269_v12 = vadd.f32 %v2268_v40, %v2267_v10  ;;  %v1940_v22 = vrot.slane %v1939_v21, 2  ;;  %v1956_v53 = vrot.slane %v1955_v38, 1  ;;  %v5978_v16 = vadd.f32 %v1991_v50, %v1990_v44 }
 0x296   : > { %v2819_v0 = vsel %vm1385_vm2, %v2818_v57, %v2714_v24  ;;  %v2702_v42 = vadd.f32 %v5744_v43, %v2667_v37  ;;  %v1959_v23 = vrot.slane %v1958_v36, 4  ;;  %v5982_v62 = vadd.f32 %v2289_v49, %v2288_v30  ;;  %v2055_v57 = vpop.permute.xlu2 %2054 }
 0x297   : > { %v2618_v8 = vadd.f32 %v2617_v48, %v2616_v1  ;;  %v5985_v20 = vsel %vm1387_vm3, %v2820_v39, %v2819_v0  ;;  %v1957_v61 = vadd.f32 %v1956_v53, %v1955_v38  ;;  %v2140_v25 = vrot.slane %v2139_v15, 2 }
 0x298   : > { %v2796_v10 = vrot.slane %v2702_v42, 4  ;;  %v2530_v17 = vsel %vm1782_vm10, %v2420_v33, 0.0  ;;  %v2089_v44 = vmul.f32 %v5941_v55, %v1728_v51  ;;  %v1941_v40 = vadd.f32 %v1940_v22, %v1939_v21 }
 0x299   : > { %v2343_v47 = vadd.f32 %v2269_v12, %v1957_v61  ;;  %v2431_v59 = vmul.f32 %v5970_v41, %v1728_v51  ;;  %v1777_v19 = vmul.f32 %v5947_v34, %v1721_v5  ;;  %v1960_v1 = vadd.f32 %v1959_v23, %v1958_v36 }
 0x29a   : > { %v5993_v30 = vsel %vm1391_vm5, %v2796_v10, %v5930_v3  ;;  %v2078_v50 = vmul.f32 %v5941_v55, %v2034_v11  ;;  %v2277_v26 = vsel %vm1782_vm10, %v2089_v44, 0.0  ;;  %v2531_v49 = vrot.slane %v2530_v17, 4 }
 0x29b   : > { %v2278_v48 = vrot.slane %v2277_v26, 4  ;;  %v2607_v32 = vsel %vm1782_vm10, %v2431_v59, 0.0  ;;  %v1972_v21 = vsel %vm1782_vm10, %v1777_v19, 0.0  ;;  %v2619_v28 = vrot.slane %v2618_v8, 1 }
 0x29c   : > { %v2141_v24 = vadd.f32 %v2140_v25, %v2139_v15  ;;  %v2608_v39 = vrot.slane %v2607_v32, 4  ;;  %v1973_v38 = vrot.slane %v1972_v21, 4  ;;  %v1942_v37 = vrot.slane %v1941_v40, 1 }
 0x29d   : > { %v1778_v3 = vmul.f32 %v5947_v34, %v1728_v51  ;;  %v2279_v33 = vadd.f32 %v2278_v48, %v2277_v26  ;;  %v2088_v36 = vmul.f32 %v5941_v55, %v1721_v5  ;;  %v1961_v11 = vrot.slane %v1960_v1, 2 }
 0x29e   : > { %v2200_v12 = vsel %vm1782_vm10, %v2078_v50, 0.0  ;;  %v2609_v22 = vadd.f32 %v2608_v39, %v2607_v32  ;;  %v1974_v53 = vadd.f32 %v1973_v38, %v1972_v21  ;;  %v2532_v0 = vadd.f32 %v2531_v49, %v2530_v17  ;;  %v1749_v38 = vpop.permute.xlu1 %1748 }
 0x29f   : > { %v2280_v42 = vrot.slane %v2279_v33, 2  ;;  %v2270_v23 = vsel %vm1782_vm10, %v2088_v36, 0.0  ;;  %v2435_v15 = vmul.f32 %v5970_v41, %v2055_v57  ;;  %v2620_v61 = vadd.f32 %v2619_v28, %v2618_v8 }
 0x2a0   : > { %v2142_v25 = vrot.slane %v2141_v24, 1  ;;  %v2610_v10 = vrot.slane %v2609_v22, 2  ;;  %v1975_v44 = vrot.slane %v1974_v53, 2  ;;  %v2201_v59 = vrot.slane %v2200_v12, 4 }
 0x2a1   : > { %v1979_v51 = vsel %vm1782_vm10, %v1778_v3, 0.0  ;;  %v2281_v19 = vadd.f32 %v2280_v42, %v2279_v33  ;;  %v2271_v5 = vrot.slane %v2270_v23, 4  ;;  %v6005_v26 = vadd.f32 %v1942_v37, %v1941_v40 }
 0x2a2   : > { %v1962_v50 = vadd.f32 %v1961_v11, %v1960_v1  ;;  %v2611_v48 = vadd.f32 %v2610_v10, %v2609_v22  ;;  %v1976_v32 = vadd.f32 %v1975_v44, %v1974_v53  ;;  %v2533_v17 = vrot.slane %v2532_v0, 2 }
 0x2a3   : > { %v2282_v49 = vrot.slane %v2281_v19, 1  ;;  %v2272_v21 = vadd.f32 %v2271_v5, %v2270_v23  ;;  %v2635_v39 = vsel %vm1782_vm10, %v2435_v15, 0.0  ;;  %v2143_v8 = vadd.f32 %v2142_v25, %v2141_v24 }
 0x2a4   : > { %v1980_v28 = vrot.slane %v1979_v51, 4  ;;  %v2612_v36 = vrot.slane %v2611_v48, 1  ;;  %v1977_v52 = vrot.slane %v1976_v32, 1  ;;  %v2202_v27 = vadd.f32 %v2201_v59, %v2200_v12 }
 0x2a5   : > { %v2283_v45 = vadd.f32 %v2282_v49, %v2281_v19  ;;  %v2273_v3 = vrot.slane %v2272_v21, 2  ;;  %v2093_v33 = vmul.f32 %v5941_v55, %v2055_v57  ;;  %v2636_v1 = vrot.slane %v2635_v39, 4 }
 0x2a6   : > { %v2613_v40 = vadd.f32 %v2612_v36, %v2611_v48  ;;  %v1978_v37 = vadd.f32 %v1977_v52, %v1976_v32  ;;  %v2092_v11 = vmul.f32 %v5941_v55, %v1749_v38  ;;  %v1963_v22 = vrot.slane %v1962_v50, 1 }
 0x2a7   : > { %v2534_v53 = vadd.f32 %v2533_v17, %v2532_v0  ;;  %v6011_v42 = vadd.f32 %v2283_v45, %v5976_v46  ;;  %v2274_v23 = vadd.f32 %v2273_v3, %v2272_v21  ;;  %v1981_v24 = vadd.f32 %v1980_v28, %v1979_v51  ;;  %v1742_v0 = vpop.permute.xlu0 %1741 }
 0x2a8   : > { %v2687_v15 = vadd.f32 %v2613_v40, %v2343_v47  ;;  %v6014_v25 = vadd.f32 %v5982_v62, %v1978_v37  ;;  %v2298_v12 = vsel %vm1782_vm10, %v2092_v11, 0.0  ;;  %v6019_v57 = vadd.f32 %v5744_v43, %v5960_v4 }
 0x2a9   : > { %v2275_v52 = vrot.slane %v2274_v23, 1  ;;  %v2305_v10 = vsel %vm1782_vm10, %v2093_v33, 0.0  ;;  %v2299_v44 = vrot.slane %v2298_v12, 4  ;;  %v6023_v45 = vadd.f32 %v2143_v8, %v5807_v2 }
 0x2aa   : > { %v2203_v46 = vrot.slane %v2202_v27, 2  ;;  %v2637_v59 = vadd.f32 %v2636_v1, %v2635_v39  ;;  %v2434_v47 = vmul.f32 %v5970_v41, %v1749_v38  ;;  %v1964_v62 = vadd.f32 %v1963_v22, %v1962_v50 }
 0x2ab   : > { %v2535_v51 = vrot.slane %v2534_v53, 1  ;;  %v2276_v19 = vadd.f32 %v2275_v52, %v2274_v23  ;;  %v2300_v5 = vadd.f32 %v2299_v44, %v2298_v12  ;;  %v1982_v48 = vrot.slane %v1981_v24, 2  ;;  %v6035_v23 = vld [vmem:[%s6976_s5] ss:$0 sm:$0xff] }
 0x2ac   : > { %v2306_v32 = vrot.slane %v2305_v10, 4  ;;  %v2628_v43 = vsel %vm1782_vm10, %v2434_v47, 0.0  ;;  %v2091_v4 = vmul.f32 %v5941_v55, %v1742_v0  ;;  %v2822_v17 = vrot.slane %v6019_v57, 5 }
 0x2ad   : > { %v2344_v49 = vadd.f32 %v2276_v19, %v1964_v62  ;;  %v2301_v21 = vrot.slane %v2300_v5, 2  ;;  %v2629_v2 = vrot.slane %v2628_v43, 4  ;;  %v2204_v8 = vadd.f32 %v2203_v46, %v2202_v27  ;;  %v2364_v19 = vpop.permute.xlu2 %2363 }
 0x2ae   : > { %v2638_v28 = vrot.slane %v2637_v59, 2  ;;  %v2291_v39 = vsel %vm1782_vm10, %v2091_v4, 0.0  ;;  %v2433_v50 = vmul.f32 %v5970_v41, %v1742_v0  ;;  %v2536_v37 = vadd.f32 %v2535_v51, %v2534_v53  ;;  %v2027_v4 = vpop.permute.xlu1 %2026 }
 0x2af   : > { %v2688_v36 = vadd.f32 %v2620_v61, %v2344_v49  ;;  %v2302_v3 = vadd.f32 %v2301_v21, %v2300_v5  ;;  %v2630_v33 = vadd.f32 %v2629_v2, %v2628_v43  ;;  %v2292_v40 = vrot.slane %v2291_v39, 4 }
 0x2b0   : > { %v1983_v1 = vadd.f32 %v1982_v48, %v1981_v24  ;;  %v2307_v11 = vadd.f32 %v2306_v32, %v2305_v10  ;;  %v2621_v22 = vsel %vm1782_vm10, %v2433_v50, 0.0  ;;  %v2722_v61 = vadd.f32 %v6035_v23, %v2687_v15 }
 0x2b1   : > { %v2723_v27 = vadd.f32 %v6035_v23, %v2688_v36  ;;  %v2303_v12 = vrot.slane %v2302_v3, 1  ;;  %v2631_v52 = vrot.slane %v2630_v33, 2  ;;  %v2293_v44 = vadd.f32 %v2292_v40, %v2291_v39 }
 0x2b2   : > { %v2639_v46 = vadd.f32 %v2638_v28, %v2637_v59  ;;  %v1781_v47 = vmul.f32 %v5947_v34, %v1749_v38  ;;  %v2622_v53 = vrot.slane %v2621_v22, 4  ;;  %v2205_v5 = vrot.slane %v2204_v8, 1 }
 0x2b3   : > { %v2832_v24 = vrot.slane %v2723_v27, 7  ;;  %v2304_v10 = vadd.f32 %v2303_v12, %v2302_v3  ;;  %v2632_v62 = vadd.f32 %v2631_v52, %v2630_v33  ;;  %v2294_v51 = vrot.slane %v2293_v44, 2 }
 0x2b4   : > { %v2676_v48 = vadd.f32 %v2536_v37, %v5874_v14  ;;  %v1984_v32 = vrot.slane %v1983_v1, 1  ;;  %v2623_v43 = vadd.f32 %v2622_v53, %v2621_v22  ;;  %v2308_v21 = vrot.slane %v2307_v11, 2  ;;  %v2020_v22 = vpop.permute.xlu0 %2019 }
 0x2b5   : > { %v6042_v49 = vsel %vm1385_vm2, %v2832_v24, %v2722_v61  ;;  %v6045_v15 = vadd.f32 %v2304_v10, %v5978_v16  ;;  %v2633_v59 = vrot.slane %v2632_v62, 1  ;;  %v2295_v38 = vadd.f32 %v2294_v51, %v2293_v44 }
 0x2b6   : > { %v2000_v2 = vsel %vm1782_vm10, %v1781_v47, 0.0  ;;  %v1780_v28 = vmul.f32 %v5947_v34, %v1742_v0  ;;  %v2624_v39 = vrot.slane %v2623_v43, 2  ;;  %v2640_v50 = vrot.slane %v2639_v46, 1 }
 0x2b7   : > { %v2634_v36 = vadd.f32 %v2633_v59, %v2632_v62  ;;  %v2296_v14 = vrot.slane %v2295_v38, 1  ;;  %v2419_v3 = vmul.f32 %v5970_v41, %v2027_v4  ;;  %v6050_v33 = vadd.f32 %v2205_v5, %v2204_v8 }
 0x2b8   : > { %v6053_v40 = vadd.f32 %v6035_v23, %v2676_v48  ;;  %v2625_v16 = vadd.f32 %v2624_v39, %v2623_v43  ;;  %v2414_v37 = vmul.f32 %v5970_v41, %v2364_v19  ;;  %v1985_v27 = vadd.f32 %v1984_v32, %v1983_v1 }
 0x2b9   : > { %v2690_v12 = vadd.f32 %v2634_v36, %v6014_v25  ;;  %v2297_v52 = vadd.f32 %v2296_v14, %v2295_v38  ;;  %v2523_v34 = vsel %vm1782_vm10, %v2419_v3, 0.0  ;;  %v6058_v0 = vadd.f32 %v2308_v21, %v2307_v11  ;;  %v2048_v21 = vpop.permute.xlu1 %2047 }
 0x2ba   : > { %v2001_v44 = vrot.slane %v2000_v2, 4  ;;  %v2626_v61 = vrot.slane %v2625_v16, 1  ;;  %v2524_v47 = vrot.slane %v2523_v34, 4  ;;  %v2641_v8 = vadd.f32 %v2640_v50, %v2639_v46  ;;  %v2385_v46 = vpop.permute.xlu2 %2384 }
 0x2bb   : > { %v1993_v53 = vsel %vm1782_vm10, %v1780_v28, 0.0  ;;  %v2347_v24 = vadd.f32 %v2297_v52, %v1985_v27  ;;  %v2070_v10 = vmul.f32 %v5941_v55, %v2020_v22  ;;  %v2488_v51 = vsel %vm1782_vm10, %v2414_v37, 0.0 }
 0x2bc   : > { %v2627_v62 = vadd.f32 %v2626_v61, %v2625_v16  ;;  %v2525_v1 = vadd.f32 %v2524_v47, %v2523_v34  ;;  %v2412_v25 = vmul.f32 %v5970_v41, %v2020_v22  ;;  %v2725_v19 = vadd.f32 %v6035_v23, %v2690_v12 }
 0x2bd   : > { %v6065_v5 = vadd.f32 %v2641_v8, %v2347_v24  ;;  %v2077_v11 = vmul.f32 %v5941_v55, %v2027_v4  ;;  %v2144_v48 = vsel %vm1782_vm10, %v2070_v10, 0.0  ;;  %v1994_v32 = vrot.slane %v1993_v53, 4 }
 0x2be   : > { %v2689_v43 = vadd.f32 %v2627_v62, %v6011_v42  ;;  %v2526_v59 = vrot.slane %v2525_v1, 2  ;;  %v2145_v38 = vrot.slane %v2144_v48, 4  ;;  %v2812_v28 = vrot.slane %v6053_v40, 3 }
 0x2bf   : > { %v2002_v39 = vadd.f32 %v2001_v44, %v2000_v2  ;;  %v2489_v50 = vrot.slane %v2488_v51, 4  ;;  %v2474_v36 = vsel %vm1782_vm10, %v2412_v25, 0.0  ;;  %v2310_v14 = vrot.slane %v6058_v0, 1  ;;  %v2041_v25 = vpop.permute.xlu0 %2040 }
 0x2c0   : > { %v2724_v3 = vadd.f32 %v6035_v23, %v2689_v43  ;;  %v2527_v4 = vadd.f32 %v2526_v59, %v2525_v1  ;;  %v2429_v16 = vmul.f32 %v5970_v41, %v2385_v46  ;;  %v2836_v37 = vrot.slane %v2725_v19, 5 }
 0x2c1   : > { %v2193_v22 = vsel %vm1782_vm10, %v2077_v11, 0.0  ;;  %v2475_v42 = vrot.slane %v2474_v36, 4  ;;  %v2086_v27 = vmul.f32 %v5941_v55, %v2048_v21  ;;  %v1995_v12 = vadd.f32 %v1994_v32, %v1993_v53 }
 0x2c2   : > { %v2834_v52 = vrot.slane %v2724_v3, 6  ;;  %v2528_v34 = vrot.slane %v2527_v4, 1  ;;  %v2146_v2 = vadd.f32 %v2145_v38, %v2144_v48  ;;  %v2003_v44 = vrot.slane %v2002_v39, 2 }
 0x2c3   : > { %v2490_v61 = vadd.f32 %v2489_v50, %v2488_v51  ;;  %v2256_v47 = vsel %vm1782_vm10, %v2086_v27, 0.0  ;;  %v2428_v8 = vmul.f32 %v5970_v41, %v2048_v21  ;;  %v2194_v10 = vrot.slane %v2193_v22, 4 }
 0x2c4   : > { %v2835_v24 = vsel %vm1387_vm3, %v2834_v52, %v6042_v49  ;;  %v2529_v62 = vadd.f32 %v2528_v34, %v2527_v4  ;;  %v2593_v1 = vsel %vm1782_vm10, %v2429_v16, 0.0  ;;  %v2476_v53 = vadd.f32 %v2475_v42, %v2474_v36 }
 0x2c5   : > { %v6083_v19 = vsel %vm1389_vm4, %v2836_v37, %v2835_v24  ;;  %v2257_v11 = vrot.slane %v2256_v47, 4  ;;  %v2586_v48 = vsel %vm1782_vm10, %v2428_v8, 0.0  ;;  %v1996_v51 = vrot.slane %v1995_v12, 2 }
 0x2c6   : > { %v2675_v46 = vadd.f32 %v2529_v62, %v5830_v13  ;;  %v2147_v32 = vrot.slane %v2146_v2, 2  ;;  %v2587_v43 = vrot.slane %v2586_v48, 4  ;;  %v2491_v59 = vrot.slane %v2490_v61, 2 }
 0x2c7   : > { %v2258_v38 = vadd.f32 %v2257_v11, %v2256_v47  ;;  %v6091_v49 = vsel %vm1389_vm4, %v2822_v17, %v5985_v20  ;;  %v2085_v21 = vmul.f32 %v5941_v55, %v2041_v25  ;;  %v2195_v50 = vadd.f32 %v2194_v10, %v2193_v22  ;;  %v2357_v11 = vpop.permute.xlu1 %2356 }
 0x2c8   : > { %v2710_v36 = vadd.f32 %v6035_v23, %v2675_v46  ;;  %v2594_v3 = vrot.slane %v2593_v1, 4  ;;  %v2588_v4 = vadd.f32 %v2587_v43, %v2586_v48  ;;  %v2477_v16 = vrot.slane %v2476_v53, 2 }
 0x2c9   : > { %v2259_v37 = vrot.slane %v2258_v38, 2  ;;  %v2249_v13 = vsel %vm1782_vm10, %v2085_v21, 0.0  ;;  %v2427_v42 = vmul.f32 %v5970_v41, %v2041_v25  ;;  %v1997_v27 = vadd.f32 %v1996_v51, %v1995_v12 }
 0x2ca   : > { %v2810_v52 = vrot.slane %v2710_v36, 4  ;;  %v2148_v34 = vadd.f32 %v2147_v32, %v2146_v2  ;;  %v2589_v57 = vrot.slane %v2588_v4, 2  ;;  %v2492_v47 = vadd.f32 %v2491_v59, %v2490_v61 }
 0x2cb   : > { %v2260_v20 = vadd.f32 %v2259_v37, %v2258_v38  ;;  %v2250_v17 = vrot.slane %v2249_v13, 4  ;;  %v2579_v8 = vsel %vm1782_vm10, %v2427_v42, 0.0  ;;  %v2196_v22 = vrot.slane %v2195_v50, 2 }
 0x2cc   : > { %v2811_v24 = vsel %vm1391_vm5, %v2810_v52, %v5885_v29  ;;  %v2595_v10 = vadd.f32 %v2594_v3, %v2593_v1  ;;  %v2590_v62 = vadd.f32 %v2589_v57, %v2588_v4  ;;  %v2478_v48 = vadd.f32 %v2477_v16, %v2476_v53 }
 0x2cd   : > { %v2261_v46 = vrot.slane %v2260_v20, 1  ;;  %v2251_v43 = vadd.f32 %v2250_v17, %v2249_v13  ;;  %v2580_v25 = vrot.slane %v2579_v8, 4  ;;  %v6100_v12 = vadd.f32 %v2003_v44, %v2002_v39  ;;  %v2406_v17 = vpop.permute.xlu2 %2405 }
 0x2ce   : > { %v2726_v2 = vadd.f32 %v6035_v23, %v6065_v5  ;;  %v2149_v61 = vrot.slane %v2148_v34, 1  ;;  %v2591_v51 = vrot.slane %v2590_v62, 1  ;;  %v1998_v32 = vrot.slane %v1997_v27, 1 }
 0x2cf   : > { %v2262_v59 = vadd.f32 %v2261_v46, %v2260_v20  ;;  %v2252_v38 = vrot.slane %v2251_v43, 2  ;;  %v2581_v21 = vadd.f32 %v2580_v25, %v2579_v8  ;;  %v2311_v29 = vadd.f32 %v2310_v14, %v6058_v0  ;;  %v2062_v46 = vpop.permute.xlu0 %2061 }
 0x2d0   : > { %v2493_v1 = vrot.slane %v2492_v47, 1  ;;  %v6107_v53 = vadd.f32 %v2196_v22, %v2195_v50  ;;  %v2592_v36 = vadd.f32 %v2591_v51, %v2590_v62  ;;  %v2479_v3 = vrot.slane %v2478_v48, 1 }
 0x2d1   : > { %v2596_v39 = vrot.slane %v2595_v10, 2  ;;  %v6110_v44 = vadd.f32 %v2262_v59, %v5880_v58  ;;  %v2582_v5 = vrot.slane %v2581_v21, 2  ;;  %v2838_v4 = vrot.slane %v2726_v2, 4 }
 0x2d2   : > { %v2150_v16 = vadd.f32 %v2149_v61, %v2148_v34  ;;  %v2684_v37 = vadd.f32 %v2592_v36, %v5952_v56  ;;  %v2413_v13 = vmul.f32 %v5970_v41, %v2357_v11  ;;  %v2005_v42 = vrot.slane %v6100_v12, 1 }
 0x2d3   : > { %v1999_v52 = vadd.f32 %v1998_v32, %v1997_v27  ;;  %v2253_v0 = vadd.f32 %v2252_v38, %v2251_v43  ;;  %v2583_v14 = vadd.f32 %v2582_v5, %v2581_v21  ;;  %v2494_v50 = vadd.f32 %v2493_v1, %v2492_v47  ;;  %v2378_v43 = vpop.permute.xlu1 %2377 }
 0x2d4   : > { %v7089_v57 = vrot.slane %v5774_v60, 1  ;;  %v2324_v58 = vadd.f32 %v5786_v7, %v5726_v54  ;;  %v2481_v34 = vsel %vm1782_vm10, %v2413_v13, 0.0  ;;  %v2480_v8 = vadd.f32 %v2479_v3, %v2478_v48 }
 0x2d5   : > { %v2597_v56 = vadd.f32 %v2596_v39, %v2595_v10  ;;  %v2584_v22 = vrot.slane %v2583_v14, 1  ;;  %v2482_v62 = vrot.slane %v2481_v34, 4  ;;  %v2198_v11 = vrot.slane %v6107_v53, 1 }
 0x2d6   : > { %v1838_v20 = vadd.f32 %v7089_v57, %v5774_v60  ;;  %v6124_v47 = vsel %vm1391_vm5, %v2838_v4, %v6083_v19  ;;  %v6129_v54 = vsel %vm1393_vm6, %v2812_v28, %v2811_v24  ;;  %v2254_v60 = vrot.slane %v2253_v0, 1 }
 0x2d7   : > { %v2585_v7 = vadd.f32 %v2584_v22, %v2583_v14  ;;  %v2438_v10 = vmul.f32 %v5970_v41, %v2406_v17  ;;  %v2483_v48 = vadd.f32 %v2482_v62, %v2481_v34  ;;  %v2719_v25 = vadd.f32 %v6035_v23, %v2684_v37 }
 0x2d8   : > { %v2326_v27 = vadd.f32 %v2150_v16, %v1838_v20  ;;  %v2094_v2 = vmul.f32 %v5941_v55, %v2062_v46  ;;  %v2436_v61 = vmul.f32 %v5970_v41, %v2062_v46  ;;  %v2422_v19 = vmul.f32 %v5970_v41, %v2378_v43 }
 0x2d9   : > { %v2668_v51 = vadd.f32 %v2480_v8, %v2324_v58  ;;  %v2598_v32 = vrot.slane %v2597_v56, 1  ;;  %v2683_v40 = vadd.f32 %v2585_v7, %v5935_v9  ;;  %v2484_v59 = vrot.slane %v2483_v48, 2 }
 0x2da   : > { %v2312_v28 = vsel %vm1782_vm10, %v2094_v2, 0.0  ;;  %v2642_v24 = vsel %vm1782_vm10, %v2436_v61, 0.0  ;;  %v2544_v38 = vsel %vm1782_vm10, %v2422_v19, 0.0  ;;  %v6140_v21 = vadd.f32 %v2311_v29, %v1999_v52  ;;  %v2371_v52 = vpop.permute.xlu0 %2370 }
 0x2db   : > { %v2255_v1 = vadd.f32 %v2254_v60, %v2253_v0  ;;  %v2718_v55 = vadd.f32 %v6035_v23, %v2683_v40  ;;  %v2656_v36 = vsel %vm1782_vm10, %v2438_v10, 0.0  ;;  %v2485_v3 = vadd.f32 %v2484_v59, %v2483_v48 }
 0x2dc   : > { %v2826_v39 = vrot.slane %v2719_v25, 3  ;;  %v2313_v5 = vrot.slane %v2312_v28, 4  ;;  %v2643_v4 = vrot.slane %v2642_v24, 4  ;;  %v2545_v16 = vrot.slane %v2544_v38, 4 }
 0x2dd   : > { %v2670_v9 = vadd.f32 %v2494_v50, %v2326_v27  ;;  %v2703_v37 = vadd.f32 %v6035_v23, %v2668_v51  ;;  %v2824_v13 = vrot.slane %v2718_v55, 4  ;;  %v2486_v14 = vrot.slane %v2485_v3, 1 }
 0x2de   : > { %v2657_v57 = vrot.slane %v2656_v36, 4  ;;  %v2314_v20 = vadd.f32 %v2313_v5, %v2312_v28  ;;  %v2644_v58 = vadd.f32 %v2643_v4, %v2642_v24  ;;  %v2546_v29 = vadd.f32 %v2545_v16, %v2544_v38  ;;  %v7090_v16 = vld [vmem:[#allocation8_spill] sm:$0xff] }
 0x2df   : > { %v2341_v0 = vadd.f32 %v2255_v1, %v6005_v26  ;;  %v2825_v17 = vsel %vm1391_vm5, %v2824_v13, %v6091_v49  ;;  %v2487_v34 = vadd.f32 %v2486_v14, %v2485_v3  ;;  %v2421_v8 = vmul.f32 %v5970_v41, %v2371_v52 }
 0x2e0   : > { %v6150_v22 = vsel %vm1393_vm6, %v2826_v39, %v2825_v17  ;;  %v2315_v50 = vrot.slane %v2314_v20, 2  ;;  %v2645_v62 = vrot.slane %v2644_v58, 2  ;;  %v2547_v27 = vrot.slane %v2546_v29, 2  ;;  %v2399_v39 = vpop.permute.xlu1 %2398 }
 0x2e1   : > { %v2705_v46 = vadd.f32 %v6035_v23, %v2670_v9  ;;  %v2599_v43 = vadd.f32 %v2598_v32, %v2597_v56  ;;  %v2669_v60 = vadd.f32 %v2487_v34, %v6023_v45  ;;  %v2537_v7 = vsel %vm1782_vm10, %v2421_v8, 0.0 }
 0x2e2   : > { %v2798_v26 = vrot.slane %v2703_v37, 3  ;;  %v2646_v10 = vadd.f32 %v2645_v62, %v2644_v58  ;;  %v2548_v48 = vadd.f32 %v2547_v27, %v2546_v29  ;;  %v2538_v49 = vrot.slane %v2537_v7, 4 }
 0x2e3   : > { %v2199_v25 = vadd.f32 %v2198_v11, %v6107_v53  ;;  %v2685_v2 = vadd.f32 %v2599_v43, %v2341_v0  ;;  %v2658_v61 = vadd.f32 %v2657_v57, %v2656_v36  ;;  %v2704_v19 = vadd.f32 %v6035_v23, %v2669_v60 }
 0x2e4   : > { %v2316_v51 = vadd.f32 %v2315_v50, %v2314_v20  ;;  %v2647_v40 = vrot.slane %v2646_v10, 1  ;;  %v2549_v59 = vrot.slane %v2548_v48, 1  ;;  %v2539_v28 = vadd.f32 %v2538_v49, %v2537_v7 }
 0x2e5   : > { %v2334_v56 = vadd.f32 %v6050_v33, %v5909_v35  ;;  %v2006_v45 = vadd.f32 %v2005_v42, %v6100_v12  ;;  %v2802_v32 = vrot.slane %v2705_v46, 1  ;;  %v2800_v24 = vrot.slane %v2704_v19, 2 }
 0x2e6   : > { %v2799_v53 = vsel %vm1393_vm6, %v2798_v26, %v5993_v30  ;;  %v2648_v11 = vadd.f32 %v2647_v40, %v2646_v10  ;;  %v2550_v38 = vadd.f32 %v2549_v59, %v2548_v48  ;;  %v2540_v1 = vrot.slane %v2539_v28, 2 }
 0x2e7   : > { %v2333_v55 = vadd.f32 %v2199_v25, %v5776_v6  ;;  %v2659_v36 = vrot.slane %v2658_v61, 2  ;;  %v2801_v3 = vsel %vm1395_vm7, %v2800_v24, %v2799_v53  ;;  %v2720_v35 = vadd.f32 %v6035_v23, %v2685_v2 }
 0x2e8   : > { %v2803_v33 = vsel %vm1397_vm8, %v2802_v32, %v2801_v3  ;;  %v2317_v12 = vrot.slane %v2316_v51, 1  ;;  %v2692_v42 = vadd.f32 %v2648_v11, %v6045_v15  ;;  %v2678_v37 = vadd.f32 %v2550_v38, %v2334_v56 }
 0x2e9   : > { %v2850_v5 = vmul.f32 %v2803_v33, %v5632_v18  ;;  %v2851_v30 = vmul.f32 %v2803_v33, %v5636_v63  ;;  %v2852_v4 = vmul.f32 %v2803_v33, %v5615_v31  ;;  %v2853_v6 = vmul.f32 %v2803_v33, %v7090_v16 }
 0x2ea   : > { %v2727_v9 = vadd.f32 %v6035_v23, %v2692_v42  ;;  %v2541_v13 = vadd.f32 %v2540_v1, %v2539_v28  ;;  %v2437_v14 = vmul.f32 %v5970_v41, %v2399_v39  ;;  %v2828_v34 = vrot.slane %v2720_v35, 2 }
 0x2eb   : > { %v2867_v57 = vsel %vm2866_vm11, %v2850_v5, 0.0  ;;  %v2874_v20 = vsel %vm2866_vm11, %v2851_v30, 0.0  ;;  %v2881_v15 = vsel %vm2866_vm11, %v2852_v4, 0.0  ;;  %v2888_v58 = vsel %vm2866_vm11, %v2853_v6, 0.0 }
 0x2ec   : > { %v2868_v29 = vrot.slane %v2867_v57, 4  ;;  %v2875_v52 = vrot.slane %v2874_v20, 4  ;;  %v2882_v0 = vrot.slane %v2881_v15, 4  ;;  %v2889_v17 = vrot.slane %v2888_v58, 4 }
 0x2ed   : > { %v2660_v8 = vadd.f32 %v2659_v36, %v2658_v61  ;;  %v2840_v50 = vrot.slane %v2727_v9, 3  ;;  %v2542_v62 = vrot.slane %v2541_v13, 1  ;;  %v2318_v60 = vadd.f32 %v2317_v12, %v2316_v51  ;;  %v2392_v51 = vpop.permute.xlu0 %2391 }
 0x2ee   : > { %v2869_v27 = vadd.f32 %v2868_v29, %v2867_v57  ;;  %v2876_v46 = vadd.f32 %v2875_v52, %v2874_v20  ;;  %v2883_v43 = vadd.f32 %v2882_v0, %v2881_v15  ;;  %v2713_v26 = vadd.f32 %v6035_v23, %v2678_v37 }
 0x2ef   : > { %v6181_v7 = vsel %vm1393_vm6, %v2840_v50, %v6124_v47  ;;  %v2543_v10 = vadd.f32 %v2542_v62, %v2541_v13  ;;  %v2649_v48 = vsel %vm1782_vm10, %v2437_v14, 0.0  ;;  %v2890_v19 = vadd.f32 %v2889_v17, %v2888_v58 }
 0x2f0   : > { %v2870_v49 = vrot.slane %v2869_v27, 2  ;;  %v2877_v25 = vrot.slane %v2876_v46, 2  ;;  %v2884_v2 = vrot.slane %v2883_v43, 2  ;;  %v2661_v61 = vrot.slane %v2660_v8, 1 }
 0x2f1   : > { %v2677_v40 = vadd.f32 %v2543_v10, %v2333_v55  ;;  %v2650_v59 = vrot.slane %v2649_v48, 4  ;;  %v2350_v32 = vadd.f32 %v2318_v60, %v2006_v45  ;;  %v6188_v53 = vsel %vm1395_vm7, %v2828_v34, %v6150_v22 }
 0x2f2   : > { %v2871_v28 = vadd.f32 %v2870_v49, %v2869_v27  ;;  %v2878_v56 = vadd.f32 %v2877_v25, %v2876_v46  ;;  %v2430_v11 = vmul.f32 %v5970_v41, %v2392_v51  ;;  %v2885_v38 = vadd.f32 %v2884_v2, %v2883_v43 }
 0x2f3   : > { %v2712_v24 = vadd.f32 %v6035_v23, %v2677_v40  ;;  %v2651_v47 = vadd.f32 %v2650_v59, %v2649_v48  ;;  %v2891_v1 = vrot.slane %v2890_v19, 2  ;;  %v2816_v36 = vrot.slane %v2713_v26, 1 }
 0x2f4   : > { %v2662_v3 = vadd.f32 %v2661_v61, %v2660_v8  ;;  %v2600_v35 = vsel %vm1782_vm10, %v2430_v11, 0.0  ;;  %v2872_v33 = vrot.slane %v2871_v28, 1  ;;  %v2879_v45 = vrot.slane %v2878_v56, 1 }
 0x2f5   : > { %v2814_v39 = vrot.slane %v2712_v24, 2  ;;  %v2652_v55 = vrot.slane %v2651_v47, 2  ;;  %v2601_v12 = vrot.slane %v2600_v35, 4  ;;  %v2886_v22 = vrot.slane %v2885_v38, 1 }
 0x2f6   : > { %v2694_v42 = vadd.f32 %v2662_v3, %v2350_v32  ;;  %v2892_v4 = vadd.f32 %v2891_v1, %v2890_v19  ;;  %v2873_v57 = vadd.f32 %v2872_v33, %v2871_v28  ;;  %v2880_v20 = vadd.f32 %v2879_v45, %v2878_v56 }
 0x2f7   : > { %v2815_v5 = vsel %vm1395_vm7, %v2814_v39, %v6129_v54  ;;  %v2653_v30 = vadd.f32 %v2652_v55, %v2651_v47  ;;  %v2602_v6 = vadd.f32 %v2601_v12, %v2600_v35  ;;  %v2887_v46 = vadd.f32 %v2886_v22, %v2885_v38 }
 0x2f8   : > { %v2817_v41 = vsel %vm1397_vm8, %v2816_v36, %v2815_v5  ;;  %v2893_v43 = vrot.slane %v2892_v4, 1  ;;  %v3003_v49 = vsel %vm1389_vm4, %v2880_v20, %v2873_v57  ;;  %v2729_v25 = vadd.f32 %v6035_v23, %v2694_v42 }
 0x2f9   : > { %v2854_v9 = vmul.f32 %v2817_v41, %v5632_v18  ;;  %v2855_v37 = vmul.f32 %v2817_v41, %v5636_v63  ;;  %v2856_v13 = vmul.f32 %v2817_v41, %v5615_v31  ;;  %v2857_v14 = vmul.f32 %v2817_v41, %v7090_v16 }
 0x2fa   : > { %v2654_v15 = vrot.slane %v2653_v30, 1  ;;  %v2603_v58 = vrot.slane %v2602_v6, 2  ;;  %v2894_v59 = vadd.f32 %v2893_v43, %v2892_v4  ;;  %v3004_v28 = vsel %vm1391_vm5, %v2887_v46, %v3003_v49 }
 0x2fb   : > { %v2895_v54 = vsel %vm2866_vm11, %v2854_v9, 0.0  ;;  %v2902_v29 = vsel %vm2866_vm11, %v2855_v37, 0.0  ;;  %v2909_v52 = vsel %vm2866_vm11, %v2856_v13, 0.0  ;;  %v2916_v0 = vsel %vm2866_vm11, %v2857_v14, 0.0 }
 0x2fc   : > { %v2896_v17 = vrot.slane %v2895_v54, 4  ;;  %v2903_v34 = vrot.slane %v2902_v29, 4  ;;  %v2910_v8 = vrot.slane %v2909_v52, 4  ;;  %v2917_v50 = vrot.slane %v2916_v0, 4 }
 0x2fd   : > { %v2655_v62 = vadd.f32 %v2654_v15, %v2653_v30  ;;  %v2604_v27 = vadd.f32 %v2603_v58, %v2602_v6  ;;  %v2844_v47 = vrot.slane %v2729_v25, 1  ;;  %v7091_v25 = vld [vmem:[#allocation6_spill] sm:$0xff] }
 0x2fe   : > { %v2897_v60 = vadd.f32 %v2896_v17, %v2895_v54  ;;  %v2904_v26 = vadd.f32 %v2903_v34, %v2902_v29  ;;  %v2911_v2 = vadd.f32 %v2910_v8, %v2909_v52  ;;  %v2918_v19 = vadd.f32 %v2917_v50, %v2916_v0 }
 0x2ff   : > { %v2693_v10 = vadd.f32 %v2655_v62, %v6140_v21  ;;  %v2605_v48 = vrot.slane %v2604_v27, 1  ;;  %v3005_v21 = vsel %vm1393_vm6, %v2894_v59, %v3004_v28 }
 0x300   : > { %v2898_v56 = vrot.slane %v2897_v60, 2  ;;  %v2905_v32 = vrot.slane %v2904_v26, 2  ;;  %v2912_v11 = vrot.slane %v2911_v2, 2  ;;  %v3019_v38 = vsel %vm1517_vm9, 0.0, %v3005_v21 }
 0x301   : > { %v2728_v61 = vadd.f32 %v6035_v23, %v2693_v10  ;;  %v2606_v40 = vadd.f32 %v2605_v48, %v2604_v27  ;;  %v2919_v1 = vrot.slane %v2918_v19, 2  ;;  %v6215_v39 = vsel %vm3023_vm12, %v3019_v38, 0.0 }
 0x302   : > { %v2899_v55 = vadd.f32 %v2898_v56, %v2897_v60  ;;  %v2906_v35 = vadd.f32 %v2905_v32, %v2904_v26  ;;  %v7092_v56 = vld [vmem:[#allocation5_spill] sm:$0xff]  ;;  %v3054_v38 = vperm.slane %v6215_v39, 2 }
 0x303   : > { %v2842_v51 = vrot.slane %v2728_v61, 2  ;;  %v2686_v24 = vadd.f32 %v2606_v40, %v6110_v44  ;;  %v3041_v44 = vperm.slane %v6215_v39, 1  ;;  %v6230_v15 = vadd.f32 %v2919_v1, %v2918_v19 }
 0x304   : > { %v2900_v57 = vrot.slane %v2899_v55, 1  ;;  %v2907_v20 = vrot.slane %v2906_v35, 1 }
 0x305   : > { %v2843_v36 = vsel %vm1395_vm7, %v2842_v51, %v6181_v7  ;;  %v2721_v3 = vadd.f32 %v6035_v23, %v2686_v24  ;;  %v2913_v7 = vadd.f32 %v2912_v11, %v2911_v2  ;;  %3046 = vperm.xlu0 %4588, %v3041_v44   ;;  %v3028_v23 = vperm.slane %v6215_v39, 0 }
 0x306   : > { %v2845_v33 = vsel %vm1397_vm8, %v2844_v47, %v2843_v36  ;;  %v2901_v61 = vadd.f32 %v2900_v57, %v2899_v55  ;;  %v2908_v40 = vadd.f32 %v2907_v20, %v2906_v35 }
 0x307   : > { %v2862_v45 = vmul.f32 %v2845_v33, %v5632_v18  ;;  %v2863_v12 = vmul.f32 %v2845_v33, %v5636_v63  ;;  %v2864_v42 = vmul.f32 %v2845_v33, %v5615_v31  ;;  %v2865_v5 = vmul.f32 %v2845_v33, %v7090_v16  ;;  %3039 = vperm.xlu2 %4594, %v3028_v23  }
 0x308   : > { %v2830_v30 = vrot.slane %v2721_v3, 1  ;;  %3033 = vperm.xlu1 %4593, %v3028_v23   ;;  %v2914_v62 = vrot.slane %v2913_v7, 1 }
 0x309   : > { %v2951_v22 = vsel %vm2866_vm11, %v2862_v45, 0.0  ;;  %v2958_v4 = vsel %vm2866_vm11, %v2863_v12, 0.0  ;;  %v2965_v41 = vsel %vm2866_vm11, %v2864_v42, 0.0  ;;  %v2972_v6 = vsel %vm2866_vm11, %v2865_v5, 0.0 }
 0x30a   : > { %v2952_v9 = vrot.slane %v2951_v22, 4  ;;  %v2959_v37 = vrot.slane %v2958_v4, 4  ;;  %v2966_v13 = vrot.slane %v2965_v41, 4  ;;  %v2973_v14 = vrot.slane %v2972_v6, 4 }
 0x30b   : > { %v2831_v58 = vsel %vm1397_vm8, %v2830_v30, %v6188_v53  ;;  %v2915_v1 = vadd.f32 %v2914_v62, %v2913_v7  ;;  %v2921_v12 = vrot.slane %v6230_v15, 1  ;;  %v3006_v42 = vsel %vm1389_vm4, %v2908_v40, %v2901_v61  ;;  %v6302_v40 = vld [vmem:[%s6978_s7 + $0x8] sm:$0xf] }
 0x30c   : > { %v2953_v54 = vadd.f32 %v2952_v9, %v2951_v22  ;;  %v2960_v29 = vadd.f32 %v2959_v37, %v2958_v4  ;;  %v2967_v52 = vadd.f32 %v2966_v13, %v2965_v41  ;;  %v2974_v0 = vadd.f32 %v2973_v14, %v2972_v6 }
 0x30d   : > { %v2858_v17 = vmul.f32 %v2831_v58, %v5632_v18  ;;  %v2859_v34 = vmul.f32 %v2831_v58, %v5636_v63  ;;  %v2860_v8 = vmul.f32 %v2831_v58, %v5615_v31  ;;  %v2861_v50 = vmul.f32 %v2831_v58, %v7090_v16  ;;  %4597 = vset.pattern.permute.xlu0 %v7091_v25 }
 0x30e   : > { %v2954_v27 = vrot.slane %v2953_v54, 2  ;;  %v2961_v46 = vrot.slane %v2960_v29, 2  ;;  %v2968_v43 = vrot.slane %v2967_v52, 2  ;;  %v2975_v63 = vrot.slane %v2974_v0, 2 }
 0x30f   : > { %v2923_v60 = vsel %vm2866_vm11, %v2858_v17, 0.0  ;;  %v2930_v53 = vsel %vm2866_vm11, %v2859_v34, 0.0  ;;  %v2937_v26 = vsel %vm2866_vm11, %v2860_v8, 0.0  ;;  %v2944_v10 = vsel %vm2866_vm11, %v2861_v50, 0.0  ;;  %4596 = vset.pattern.permute.xlu2 %v7092_v56 }
 0x310   : > { %v2955_v48 = vadd.f32 %v2954_v27, %v2953_v54  ;;  %v2962_v18 = vadd.f32 %v2961_v46, %v2960_v29  ;;  %v2969_v49 = vadd.f32 %v2968_v43, %v2967_v52  ;;  %v2924_v31 = vrot.slane %v2923_v60, 4  ;;  %4595 = vset.pattern.permute.xlu1 %v7091_v25 }
 0x311   : > { %v2931_v16 = vrot.slane %v2930_v53, 4  ;;  %v2938_v2 = vrot.slane %v2937_v26, 4  ;;  %v2945_v19 = vrot.slane %v2944_v10, 4  ;;  %v2976_v11 = vadd.f32 %v2975_v63, %v2974_v0 }
 0x312   : > { %v2956_v59 = vrot.slane %v2955_v48, 1  ;;  %v2963_v28 = vrot.slane %v2962_v18, 1  ;;  %v2925_v32 = vadd.f32 %v2924_v31, %v2923_v60  ;;  %v2970_v47 = vrot.slane %v2969_v49, 1 }
 0x313   : > { %v2932_v51 = vadd.f32 %v2931_v16, %v2930_v53  ;;  %v2939_v24 = vadd.f32 %v2938_v2, %v2937_v26  ;;  %v2946_v21 = vadd.f32 %v2945_v19, %v2944_v10  ;;  %v2977_v41 = vrot.slane %v2976_v11, 1 }
 0x314   : > { %v2926_v36 = vrot.slane %v2925_v32, 2  ;;  %v2957_v35 = vadd.f32 %v2956_v59, %v2955_v48  ;;  %v2964_v45 = vadd.f32 %v2963_v28, %v2962_v18  ;;  %v2971_v4 = vadd.f32 %v2970_v47, %v2969_v49 }
 0x315   : > { %v2933_v3 = vrot.slane %v2932_v51, 2  ;;  %v2940_v33 = vrot.slane %v2939_v24, 2  ;;  %v2947_v55 = vrot.slane %v2946_v21, 2  ;;  %3065 = vperm.xlu0 %4597, %v3054_v38   ;;  %v3007_v13 = vsel %vm1391_vm5, %v2915_v1, %v3006_v42  ;;  %v6332_v42 = vld [vmem:[%s6978_s7 + $0x18] sm:$0xf] }
 0x316   : > { %v2927_v5 = vadd.f32 %v2926_v36, %v2925_v32  ;;  %v3012_v14 = vsel %vm1389_vm4, %v2964_v45, %v2957_v35  ;;  %v2922_v54 = vadd.f32 %v2921_v12, %v6230_v15  ;;  %v2978_v29 = vadd.f32 %v2977_v41, %v2976_v11  ;;  %v6310_v32 = vld [vmem:[%s6978_s7] sm:$0xff]  ;;  %v6321_v36 = vld [vmem:[%s6978_s7 + $0x10] sm:$0xff] }
 0x317   : > { %v2934_v30 = vadd.f32 %v2933_v3, %v2932_v51  ;;  %v2941_v23 = vadd.f32 %v2940_v33, %v2939_v24  ;;  %v2948_v22 = vadd.f32 %v2947_v55, %v2946_v21  ;;  %3059 = vperm.xlu2 %4596, %v3054_v38   ;;  %v3013_v34 = vsel %vm1391_vm5, %v2971_v4, %v3012_v14 }
 0x318   : > { %v2928_v6 = vrot.slane %v2927_v5, 1  ;;  %3052 = vperm.xlu1 %4595, %v3041_v44   ;;  %v3008_v52 = vsel %vm1393_vm6, %v2922_v54, %v3007_v13  ;;  %v3014_v44 = vsel %vm1393_vm6, %v2978_v29, %v3013_v34  ;;  %v3067_v26 = vperm.slane %v6215_v39, 3 }
 0x319   : > { %v2935_v9 = vrot.slane %v2934_v30, 1  ;;  %v2942_v7 = vrot.slane %v2941_v23, 1  ;;  %v2949_v37 = vrot.slane %v2948_v22, 1  ;;  %v3022_v62 = vsel %vm1517_vm9, 0.0, %v3014_v44 }
 0x31a   : > { %v2929_v57 = vadd.f32 %v2928_v6, %v2927_v5  ;;  %v3020_v15 = vsel %vm1517_vm9, 0.0, %v3008_v52  ;;  %v6264_v46 = vsel %vm3023_vm12, %v3022_v62, 0.0  ;;  %v3427_v61 = vperm.slane %v6215_v39, 5 }
 0x31b   : > { %v2936_v20 = vadd.f32 %v2935_v9, %v2934_v30  ;;  %v2943_v58 = vadd.f32 %v2942_v7, %v2941_v23  ;;  %v2950_v0 = vadd.f32 %v2949_v37, %v2948_v22  ;;  %v6272_v60 = vsel %vm3023_vm12, %v3020_v15, 0.0 }
 0x31c   : > { %v3093_v53 = vperm.slane %v6272_v60, 1  ;;  %v3080_v10 = vperm.slane %v6272_v60, 0  ;;  %v3119_v48 = vperm.slane %v6272_v60, 3  ;;  %v3106_v18 = vperm.slane %v6272_v60, 2 }
 0x31d   : > { %v3009_v17 = vsel %vm1389_vm4, %v2936_v20, %v2929_v57  ;;  %4600 = vset.pattern.permute.xlu0 %v7092_v56  ;;  %v3184_v63 = vperm.slane %v6264_v46, 0  ;;  %v3223_v2 = vperm.slane %v6264_v46, 3  ;;  %v3197_v35 = vperm.slane %v6264_v46, 1 }
 0x31e   : > { %v3010_v8 = vsel %vm1391_vm5, %v2943_v58, %v3009_v17  ;;  %v3492_v15 = vperm.slane %v6264_v46, 4 }
 0x31f   : > { %v3011_v50 = vsel %vm1393_vm6, %v2950_v0, %v3010_v8  ;;  %4599 = vset.pattern.permute.xlu2 %v7091_v25  ;;  %v3210_v0 = vperm.slane %v6264_v46, 2 }
 0x320   : > { %v3021_v27 = vsel %vm1517_vm9, 0.0, %v3011_v50  ;;  %4598 = vset.pattern.permute.xlu1 %v7092_v56 }
 0x321   : > { %v6267_v43 = vsel %vm3023_vm12, %v3021_v27, 0.0 }
 0x322   : > { %v3158_v49 = vperm.slane %v6267_v43, 2  ;;  %v3132_v31 = vperm.slane %v6267_v43, 0  ;;  %v3145_v16 = vperm.slane %v6267_v43, 1  ;;  %v3171_v19 = vperm.slane %v6267_v43, 3 }
 0x323   : > { %v3466_v33 = vperm.slane %v6267_v43, 4 }
 0x325   : > { %3098 = vperm.xlu0 %4600, %v3093_v53  }
 0x327   : > { %3078 = vperm.xlu2 %4599, %v3067_v26  }
 0x328   : > { %3072 = vperm.xlu1 %4598, %v3067_v26  }
 0x32d   : > { %4603 = vset.pattern.permute.xlu0 %v7091_v25 }
 0x32f   : > { %3091 = vperm.xlu2 %4599, %v3080_v10  }
 0x330   : > { %3085 = vperm.xlu1 %4598, %v3080_v10  }
 0x335   : > { %3130 = vperm.xlu0 %4603, %v3119_v48  }
 0x337   : > { %4602 = vset.pattern.permute.xlu2 %v7092_v56 }
 0x338   : > { %4601 = vset.pattern.permute.xlu1 %v7091_v25 }
 0x33d   : > { %4606 = vset.pattern.permute.xlu0 %v7092_v56 }
 0x33f   : > { %3111 = vperm.xlu2 %4602, %v3106_v18  }
 0x340   : > { %3104 = vperm.xlu1 %4601, %v3093_v53  }
 0x345   : > { %3163 = vperm.xlu0 %4606, %v3158_v49  }
 0x347   : > { %3124 = vperm.xlu2 %4602, %v3119_v48  }
 0x348   : > { %3117 = vperm.xlu1 %4601, %v3106_v18  }
 0x34d   : > { %4609 = vset.pattern.permute.xlu0 %v7091_v25 }
 0x34f   : > { %4605 = vset.pattern.permute.xlu2 %v7091_v25 }
 0x350   : > { %4604 = vset.pattern.permute.xlu1 %v7092_v56 }
 0x355   : > { %3195 = vperm.xlu0 %4609, %v3184_v63  }
 0x357   : > { %3143 = vperm.xlu2 %4605, %v3132_v31  }
 0x358   : > { %3137 = vperm.xlu1 %4604, %v3132_v31  }
 0x35d   : > { %4612 = vset.pattern.permute.xlu0 %v7092_v56 }
 0x35f   : > { %3156 = vperm.xlu2 %4605, %v3145_v16  }
 0x360   : > { %3150 = vperm.xlu1 %4604, %v3145_v16  }
 0x361   : > { %v3040_v59 = vpop.permute.xlu2 %3039 }
 0x362   : > { %v3237_v28 = vmul.f32 %v3040_v59, %v6302_v40 }
 0x364   : > { %v3271_v21 = vsel %vm3270_vm13, %v3237_v28, 0.0 }
 0x365   : > { %3228 = vperm.xlu0 %4612, %v3223_v2  }
 0x367   : > { %4608 = vset.pattern.permute.xlu2 %v7092_v56 }
 0x368   : > { %4607 = vset.pattern.permute.xlu1 %v7091_v25 }
 0x36d   : > { %4615 = vset.pattern.permute.xlu0 %v7091_v25 }
 0x36f   : > { %3176 = vperm.xlu2 %4608, %v3171_v19  }
 0x370   : > { %3169 = vperm.xlu1 %4607, %v3158_v49  }
 0x371   : > { %v3060_v38 = vpop.permute.xlu2 %3059 }
 0x372   : > { %v3240_v55 = vmul.f32 %v3060_v38, %v6310_v32  ;;  %v3518_v45 = vmul.f32 %v3060_v38, %v6321_v36 }
 0x374   : > { %v3288_v41 = vsel %vm3268_vm14, %v3240_v55, 0.0  ;;  %v3550_v9 = vsel %vm3268_vm14, %v3518_v45, 0.0 }
 0x375   : > { %3438 = vperm.xlu0 %4615, %v3427_v61  }
 0x377   : > { %3189 = vperm.xlu2 %4608, %v3184_v63   ;;  %v3047_v1 = vpop.permute.xlu0 %3046 }
 0x378   : > { %3182 = vperm.xlu1 %4607, %v3171_v19   ;;  %v3238_v23 = vmul.f32 %v3047_v1, %v6310_v32  ;;  %v3414_v1 = vperm.slane %v6215_v39, 4 }
 0x37a   : > { %v3034_v51 = vpop.permute.xlu1 %3033  ;;  %v3279_v58 = vsel %vm3268_vm14, %v3238_v23, 0.0 }
 0x37b   : > { %v3236_v24 = vmul.f32 %v3034_v51, %v6310_v32 }
 0x37d   : > { %v3269_v47 = vsel %vm3268_vm14, %v3236_v24, 0.0  ;;  %4618 = vset.pattern.permute.xlu0 %v7092_v56 }
 0x37e   : > { %v3272_v11 = vadd.f32 %v3271_v21, %v3269_v47 }
 0x37f   : > { %4611 = vset.pattern.permute.xlu2 %v7091_v25 }
 0x380   : > { %4610 = vset.pattern.permute.xlu1 %v7092_v56  ;;  %v3273_v3 = vrot.slane %v3272_v11, 4 }
 0x381   : > { %v3079_v5 = vpop.permute.xlu2 %3078 }
 0x382   : > { %v3274_v12 = vadd.f32 %v3273_v3, %v3272_v11  ;;  %v3243_v48 = vmul.f32 %v3079_v5, %v6302_v40  ;;  %v3521_v18 = vmul.f32 %v3079_v5, %v6332_v42 }
 0x384   : > { %v3275_v14 = vrot.slane %v3274_v12, 2  ;;  %v3298_v28 = vsel %vm3270_vm13, %v3243_v48, 0.0  ;;  %v3560_v51 = vsel %vm3270_vm13, %v3521_v18, 0.0  ;;  %v3440_v18 = vperm.slane %v6272_v60, 4 }
 0x385   : > { %3471 = vperm.xlu0 %4618, %v3466_v33  }
 0x386   : > { %v3276_v17 = vadd.f32 %v3275_v14, %v3274_v12 }
 0x387   : > { %3208 = vperm.xlu2 %4611, %v3197_v35   ;;  %v3066_v30 = vpop.permute.xlu0 %3065 }
 0x388   : > { %3202 = vperm.xlu1 %4610, %v3197_v35   ;;  %v3241_v22 = vmul.f32 %v3066_v30, %v6302_v40  ;;  %v3519_v4 = vmul.f32 %v3066_v30, %v6332_v42  ;;  %v3277_v50 = vrot.slane %v3276_v17, 1 }
 0x389   : > { %v3092_v8 = vpop.permute.xlu2 %3091 }
 0x38a   : > { %v3053_v6 = vpop.permute.xlu1 %3052  ;;  %v3289_v37 = vsel %vm3270_vm13, %v3241_v22, 0.0  ;;  %v3551_v13 = vsel %vm3270_vm13, %v3519_v4, 0.0  ;;  %v3278_v26 = vadd.f32 %v3277_v50, %v3276_v17  ;;  %v3245_v35 = vmul.f32 %v3092_v8, %v6302_v40 }
 0x38b   : > { %v3239_v7 = vmul.f32 %v3053_v6, %v6302_v40  ;;  %v6342_v57 = vadd.f32 %v3289_v37, %v3288_v41  ;;  %v3552_v20 = vadd.f32 %v3551_v13, %v3550_v9  ;;  %v3723_v4 = vperm.slane %v6215_v39, 7 }
 0x38c   : > { %v3307_v41 = vsel %vm3270_vm13, %v3245_v35, 0.0 }
 0x38d   : > { %v3280_v54 = vsel %vm3270_vm13, %v3239_v7, 0.0  ;;  %v3553_v52 = vrot.slane %v3552_v20, 4  ;;  %4621 = vset.pattern.permute.xlu0 %v7091_v25 }
 0x38e   : > { %v3281_v29 = vadd.f32 %v3280_v54, %v3279_v58 }
 0x38f   : > { %v3554_v34 = vadd.f32 %v3553_v52, %v3552_v20  ;;  %3221 = vperm.xlu2 %4611, %v3210_v0  }
 0x390   : > { %3215 = vperm.xlu1 %4610, %v3210_v0   ;;  %v3282_v27 = vrot.slane %v3281_v29, 4 }
 0x391   : > { %v3555_v44 = vrot.slane %v3554_v34, 2 }
 0x392   : > { %v3283_v49 = vadd.f32 %v3282_v27, %v3281_v29 }
 0x393   : > { %v3556_v62 = vadd.f32 %v3555_v44, %v3554_v34 }
 0x394   : > { %v3284_v47 = vrot.slane %v3283_v49, 2 }
 0x395   : > { %v3557_v53 = vrot.slane %v3556_v62, 1  ;;  %3503 = vperm.xlu0 %4621, %v3492_v15  }
 0x396   : > { %v3285_v45 = vadd.f32 %v3284_v47, %v3283_v49 }
 0x397   : > { %v3558_v10 = vadd.f32 %v3557_v53, %v3556_v62  ;;  %4614 = vset.pattern.permute.xlu2 %v7092_v56  ;;  %v3099_v55 = vpop.permute.xlu0 %3098  ;;  %v3749_v62 = vperm.slane %v6272_v60, 7 }
 0x398   : > { %4613 = vset.pattern.permute.xlu1 %v7091_v25  ;;  %v3286_v9 = vrot.slane %v3285_v45, 1 }
 0x399   : > { %v6355_v63 = vadd.f32 %v3558_v10, %v3278_v26  ;;  %v6357_v16 = vpop.permute.xlu2 %3111 }
 0x39a   : > { %v3073_v31 = vpop.permute.xlu1 %3072  ;;  %v3287_v58 = vadd.f32 %v3286_v9, %v3285_v45  ;;  %v3248_v49 = vmul.f32 %v6357_v16, %v6310_v32 }
 0x39b   : > { %v3242_v19 = vmul.f32 %v3073_v31, %v6310_v32  ;;  %v3520_v59 = vmul.f32 %v3073_v31, %v6321_v36 }
 0x39d   : > { %v3297_v24 = vsel %vm3268_vm14, %v3242_v19, 0.0  ;;  %v3559_v21 = vsel %vm3268_vm14, %v3520_v59, 0.0  ;;  %4624 = vset.pattern.permute.xlu0 %v7092_v56  ;;  %v3526_v59 = vmul.f32 %v6357_v16, %v6321_v36 }
 0x39e   : > { %v6365_v11 = vadd.f32 %v3298_v28, %v3297_v24  ;;  %v3561_v38 = vadd.f32 %v3560_v51, %v3559_v21 }
 0x39f   : > { %3419 = vperm.xlu2 %4614, %v3414_v1   ;;  %v3586_v35 = vsel %vm3268_vm14, %v3526_v59, 0.0  ;;  %v3479_v59 = vperm.slane %v6267_v43, 5 }
 0x3a0   : > { %v3562_v3 = vrot.slane %v3561_v38, 4  ;;  %3234 = vperm.xlu1 %4613, %v3223_v2  }
 0x3a1   : > { %v6373_v22 = vpop.permute.xlu2 %3124 }
 0x3a2   : > { %v3563_v12 = vadd.f32 %v3562_v3, %v3561_v38  ;;  %v3086_v5 = vpop.permute.xlu1 %3085  ;;  %v3528_v2 = vmul.f32 %v6373_v22, %v6321_v36 }
 0x3a3   : > { %v3244_v30 = vmul.f32 %v3086_v5, %v6310_v32 }
 0x3a4   : > { %v3564_v23 = vrot.slane %v3563_v12, 2  ;;  %v3595_v29 = vsel %vm3268_vm14, %v3528_v2, 0.0 }
 0x3a5   : > { %v3306_v6 = vsel %vm3268_vm14, %v3244_v30, 0.0  ;;  %3728 = vperm.xlu0 %4624, %v3723_v4  }
 0x3a6   : > { %v3565_v7 = vadd.f32 %v3564_v23, %v3563_v12  ;;  %v3308_v37 = vadd.f32 %v3307_v41, %v3306_v6 }
 0x3a7   : > { %3432 = vperm.xlu2 %4614, %v3427_v61   ;;  %v6384_v14 = vpop.permute.xlu0 %3130  ;;  %v3246_v61 = vmul.f32 %v3099_v55, %v6310_v32  ;;  %v3453_v55 = vperm.slane %v6272_v60, 5 }
 0x3a8   : > { %v3566_v13 = vrot.slane %v3565_v7, 1  ;;  %3425 = vperm.xlu1 %4613, %v3414_v1   ;;  %v3529_v20 = vmul.f32 %v6384_v14, %v6332_v42  ;;  %v3309_v53 = vrot.slane %v3308_v37, 4  ;;  %v3324_v1 = vsel %vm3268_vm14, %v3248_v49, 0.0 }
 0x3a9   : > { %v3315_v27 = vsel %vm3268_vm14, %v3246_v61, 0.0 }
 0x3aa   : > { %v3567_v54 = vadd.f32 %v3566_v13, %v3565_v7  ;;  %v3596_v52 = vsel %vm3270_vm13, %v3529_v20, 0.0  ;;  %v3310_v28 = vadd.f32 %v3309_v53, %v3308_v37 }
 0x3ab   : > { %v3597_v17 = vadd.f32 %v3596_v52, %v3595_v29  ;;  %v3788_v29 = vperm.slane %v6264_v46, 6 }
 0x3ac   : > { %v6390_v0 = vadd.f32 %v3567_v54, %v3287_v58  ;;  %v3311_v45 = vrot.slane %v3310_v28, 2 }
 0x3ad   : > { %v3598_v34 = vrot.slane %v3597_v17, 4  ;;  %4627 = vset.pattern.permute.xlu0 %v7091_v25 }
 0x3ae   : > { %v3312_v7 = vadd.f32 %v3311_v45, %v3310_v28 }
 0x3af   : > { %4617 = vset.pattern.permute.xlu2 %v7091_v25  ;;  %v3599_v8 = vadd.f32 %v3598_v34, %v3597_v17 }
 0x3b0   : > { %4616 = vset.pattern.permute.xlu1 %v7092_v56  ;;  %v3313_v52 = vrot.slane %v3312_v7, 1 }
 0x3b1   : > { %v3600_v10 = vrot.slane %v3599_v8, 2  ;;  %v3144_v19 = vpop.permute.xlu2 %3143 }
 0x3b2   : > { %v3105_v44 = vpop.permute.xlu1 %3104 }
 0x3b3   : > { %v3247_v50 = vmul.f32 %v3105_v44, %v6302_v40  ;;  %v3601_v51 = vadd.f32 %v3600_v10, %v3599_v8  ;;  %v3253_v8 = vmul.f32 %v3144_v19, %v6302_v40  ;;  %v3314_v44 = vadd.f32 %v3313_v52, %v3312_v7 }
 0x3b4   : > { %v3505_v52 = vperm.slane %v6264_v46, 5 }
 0x3b5   : > { %v3316_v26 = vsel %vm3270_vm13, %v3247_v50, 0.0  ;;  %3760 = vperm.xlu0 %4627, %v3749_v62   ;;  %v3602_v5 = vrot.slane %v3601_v51, 1 }
 0x3b6   : > { %v3317_v48 = vadd.f32 %v3316_v26, %v3315_v27 }
 0x3b7   : > { %3451 = vperm.xlu2 %4617, %v3440_v18   ;;  %v3603_v37 = vadd.f32 %v3602_v5, %v3601_v51  ;;  %v3164_v34 = vpop.permute.xlu0 %3163 }
 0x3b8   : > { %v3318_v31 = vrot.slane %v3317_v48, 4  ;;  %3445 = vperm.xlu1 %4616, %v3440_v18  }
 0x3b9   : > { %v3157_v20 = vpop.permute.xlu2 %3156 }
 0x3ba   : > { %v3319_v24 = vadd.f32 %v3318_v31, %v3317_v48  ;;  %v3118_v21 = vpop.permute.xlu1 %3117  ;;  %v3343_v48 = vsel %vm3270_vm13, %v3253_v8, 0.0  ;;  %v3255_v19 = vmul.f32 %v3157_v20, %v6302_v40 }
 0x3bb   : > { %v3249_v47 = vmul.f32 %v3118_v21, %v6302_v40  ;;  %v3527_v38 = vmul.f32 %v3118_v21, %v6332_v42 }
 0x3bc   : > { %v3320_v3 = vrot.slane %v3319_v24, 2 }
 0x3bd   : > { %v3325_v12 = vsel %vm3270_vm13, %v3249_v47, 0.0  ;;  %v3587_v16 = vsel %vm3270_vm13, %v3527_v38, 0.0  ;;  %4630 = vset.pattern.permute.xlu0 %v7092_v56  ;;  %v3352_v38 = vsel %vm3270_vm13, %v3255_v19, 0.0 }
 0x3be   : > { %v3321_v30 = vadd.f32 %v3320_v3, %v3319_v24  ;;  %v6414_v23 = vadd.f32 %v3325_v12, %v3324_v1  ;;  %v3588_v41 = vadd.f32 %v3587_v16, %v3586_v35  ;;  %v3256_v12 = vmul.f32 %v3164_v34, %v6310_v32 }
 0x3bf   : > { %3464 = vperm.xlu2 %4617, %v3453_v55   ;;  %v3534_v16 = vmul.f32 %v3164_v34, %v6321_v36 }
 0x3c0   : > { %v3322_v6 = vrot.slane %v3321_v30, 1  ;;  %v3589_v9 = vrot.slane %v3588_v41, 4  ;;  %3458 = vperm.xlu1 %4616, %v3453_v55  }
 0x3c2   : > { %v3323_v2 = vadd.f32 %v3322_v6, %v3321_v30  ;;  %v3590_v13 = vadd.f32 %v3589_v9, %v3588_v41  ;;  %v3360_v9 = vsel %vm3268_vm14, %v3256_v12, 0.0 }
 0x3c4   : > { %v6417_v58 = vadd.f32 %v3603_v37, %v3323_v2  ;;  %v3591_v54 = vrot.slane %v3590_v13, 2 }
 0x3c5   : > { %3793 = vperm.xlu0 %4630, %v3788_v29  }
 0x3c6   : > { %v3592_v17 = vadd.f32 %v3591_v54, %v3590_v13 }
 0x3c7   : > { %4620 = vset.pattern.permute.xlu2 %v7092_v56  ;;  %v3196_v31 = vpop.permute.xlu0 %3195 }
 0x3c8   : > { %v3593_v61 = vrot.slane %v3592_v17, 1  ;;  %4619 = vset.pattern.permute.xlu1 %v7091_v25  ;;  %v3261_v28 = vmul.f32 %v3196_v31, %v6302_v40 }
 0x3c9   : > { %v3177_v27 = vpop.permute.xlu2 %3176 }
 0x3ca   : > { %v3594_v50 = vadd.f32 %v3593_v61, %v3592_v17  ;;  %v3138_v53 = vpop.permute.xlu1 %3137  ;;  %v3379_v1 = vsel %vm3270_vm13, %v3261_v28, 0.0  ;;  %v3258_v17 = vmul.f32 %v3177_v27, %v6310_v32  ;;  %v3536_v8 = vmul.f32 %v3177_v27, %v6321_v36 }
 0x3cb   : > { %v3252_v26 = vmul.f32 %v3138_v53, %v6310_v32 }
 0x3cc   : > { %v6426_v10 = vadd.f32 %v3594_v50, %v3314_v44  ;;  %v3631_v19 = vsel %vm3268_vm14, %v3536_v8, 0.0 }
 0x3cd   : > { %v3342_v18 = vsel %vm3268_vm14, %v3252_v26, 0.0 }
 0x3ce   : > { %v3344_v49 = vadd.f32 %v3343_v48, %v3342_v18 }
 0x3cf   : > { %3484 = vperm.xlu2 %4620, %v3479_v59  }
 0x3d0   : > { %3477 = vperm.xlu1 %4619, %v3466_v33   ;;  %v3345_v45 = vrot.slane %v3344_v49, 4 }
 0x3d1   : > { %v3190_v51 = vpop.permute.xlu2 %3189 }
 0x3d2   : > { %v3151_v24 = vpop.permute.xlu1 %3150  ;;  %v3260_v21 = vmul.f32 %v3190_v51, %v6310_v32  ;;  %v3346_v5 = vadd.f32 %v3345_v45, %v3344_v49  ;;  %v3369_v49 = vsel %vm3268_vm14, %v3258_v17, 0.0 }
 0x3d3   : > { %v3254_v47 = vmul.f32 %v3151_v24, %v6310_v32 }
 0x3d4   : > { %v3378_v3 = vsel %vm3268_vm14, %v3260_v21, 0.0  ;;  %v3347_v7 = vrot.slane %v3346_v5, 2 }
 0x3d5   : > { %v3351_v55 = vsel %vm3268_vm14, %v3254_v47, 0.0  ;;  %v6441_v35 = vadd.f32 %v3379_v1, %v3378_v3 }
 0x3d6   : > { %v3353_v33 = vadd.f32 %v3352_v38, %v3351_v55  ;;  %v3348_v44 = vadd.f32 %v3347_v7, %v3346_v5 }
 0x3d7   : > { %3497 = vperm.xlu2 %4620, %v3492_v15   ;;  %v3622_v15 = vsel %vm3268_vm14, %v3534_v16, 0.0 }
 0x3d8   : > { %3490 = vperm.xlu1 %4619, %v3479_v59   ;;  %v3354_v13 = vrot.slane %v3353_v33, 4  ;;  %v3710_v59 = vperm.slane %v6215_v39, 6  ;;  %v3349_v28 = vrot.slane %v3348_v44, 1 }
 0x3da   : > { %v3355_v50 = vadd.f32 %v3354_v13, %v3353_v33  ;;  %v3350_v55 = vadd.f32 %v3349_v28, %v3348_v44  ;;  %v6486_v44 = vld [vmem:[%s6978_s7 + $0x28] sm:$0xf] }
 0x3dc   : > { %v3356_v24 = vrot.slane %v3355_v50, 2 }
 0x3de   : > { %v3357_v33 = vadd.f32 %v3356_v24, %v3355_v50 }
 0x3df   : > { %4623 = vset.pattern.permute.xlu2 %v7091_v25 }
 0x3e0   : > { %4622 = vset.pattern.permute.xlu1 %v7092_v56 }
 0x3e1   : > { %v3209_v34 = vpop.permute.xlu2 %3208 }
 0x3e2   : > { %v3170_v30 = vpop.permute.xlu1 %3169  ;;  %v3263_v7 = vmul.f32 %v3209_v34, %v6302_v40 }
 0x3e3   : > { %v3257_v41 = vmul.f32 %v3170_v30, %v6302_v40  ;;  %v3535_v6 = vmul.f32 %v3170_v30, %v6332_v42 }
 0x3e4   : > { %v3388_v8 = vsel %vm3270_vm13, %v3263_v7, 0.0 }
 0x3e5   : > { %v3361_v37 = vsel %vm3270_vm13, %v3257_v41, 0.0  ;;  %v3623_v2 = vsel %vm3270_vm13, %v3535_v6, 0.0  ;;  %v6471_v41 = vpop.permute.xlu0 %3228  ;;  %v3358_v6 = vrot.slane %v3357_v33, 1 }
 0x3e6   : > { %v6455_v20 = vadd.f32 %v3361_v37, %v3360_v9  ;;  %v3624_v54 = vadd.f32 %v3623_v2, %v3622_v15 }
 0x3e7   : > { %3516 = vperm.xlu2 %4623, %v3505_v52   ;;  %v3359_v37 = vadd.f32 %v3358_v6, %v3357_v33 }
 0x3e8   : > { %v3625_v61 = vrot.slane %v3624_v54, 4  ;;  %3510 = vperm.xlu1 %4622, %v3505_v52   ;;  %v3300_v52 = vrot.slane %v6365_v11, 4 }
 0x3e9   : > { %v3222_v12 = vpop.permute.xlu2 %3221 }
 0x3ea   : > { %v3626_v53 = vadd.f32 %v3625_v61, %v3624_v54  ;;  %v3183_v26 = vpop.permute.xlu1 %3182  ;;  %v3543_v28 = vmul.f32 %v3222_v12, %v6332_v42 }
 0x3eb   : > { %v3259_v48 = vmul.f32 %v3183_v26, %v6302_v40  ;;  %v3537_v18 = vmul.f32 %v3183_v26, %v6332_v42 }
 0x3ec   : > { %v3627_v31 = vrot.slane %v3626_v53, 2 }
 0x3ed   : > { %v3370_v51 = vsel %vm3270_vm13, %v3259_v48, 0.0  ;;  %v3632_v27 = vsel %vm3270_vm13, %v3537_v18, 0.0  ;;  %v3439_v50 = vpop.permute.xlu0 %3438  ;;  %v3736_v48 = vperm.slane %v6272_v60, 6  ;;  %v3301_v18 = vadd.f32 %v3300_v52, %v6365_v11 }
 0x3ee   : > { %v3628_v21 = vadd.f32 %v3627_v31, %v3626_v53  ;;  %v6467_v47 = vadd.f32 %v3370_v51, %v3369_v49  ;;  %v3633_v38 = vadd.f32 %v3632_v27, %v3631_v19  ;;  %v3381_v53 = vrot.slane %v6441_v35, 4  ;;  %v6504_v51 = vld [vmem:[%s6978_s7 + $0x20] sm:$0xff] }
 0x3ef   : > { %3721 = vperm.xlu2 %4623, %v3710_v59   ;;  %v3265_v49 = vmul.f32 %v3222_v12, %v6302_v40  ;;  %v3525_v31 = vmul.f32 %v3439_v50, %v6332_v42 }
 0x3f0   : > { %v3629_v1 = vrot.slane %v3628_v21, 1  ;;  %v3634_v3 = vrot.slane %v3633_v38, 4  ;;  %3715 = vperm.xlu1 %4622, %v3710_v59   ;;  %v3817_v59 = vmul.f32 %v3439_v50, %v6486_v44  ;;  %v3382_v19 = vadd.f32 %v3381_v53, %v6441_v35 }
 0x3f1   : > { %v3397_v35 = vsel %vm3270_vm13, %v3265_v49, 0.0 }
 0x3f2   : > { %v3630_v45 = vadd.f32 %v3629_v1, %v3628_v21  ;;  %v3635_v16 = vadd.f32 %v3634_v3, %v3633_v38  ;;  %v3578_v1 = vsel %vm3270_vm13, %v3525_v31, 0.0  ;;  %v3856_v3 = vsel %vm3270_vm13, %v3817_v59, 0.0 }
 0x3f3   : > { %v3383_v7 = vrot.slane %v3382_v19, 2 }
 0x3f4   : > { %v6469_v5 = vadd.f32 %v3630_v45, %v3350_v55  ;;  %v3636_v30 = vrot.slane %v3635_v16, 2 }
 0x3f5   : > { %v3384_v53 = vadd.f32 %v3383_v7, %v3382_v19 }
 0x3f6   : > { %v3637_v9 = vadd.f32 %v3636_v30, %v3635_v16  ;;  %v6520_v16 = vld [vmem:[%s6980_s9] sm:$0x3]  ;;  %v3659_v30 = vsel %vm3270_vm13, %v3543_v28, 0.0 }
 0x3f7   : > { %4626 = vset.pattern.permute.xlu2 %v7092_v56 }
 0x3f8   : > { %v3638_v15 = vrot.slane %v3637_v9, 1  ;;  %4625 = vset.pattern.permute.xlu1 %v7091_v25 }
 0x3f9   : > { %v6476_v13 = vpop.permute.xlu2 %3419 }
 0x3fa   : > { %v3639_v2 = vadd.f32 %v3638_v15, %v3637_v9  ;;  %v3203_v54 = vpop.permute.xlu1 %3202 }
 0x3fb   : > { %v3262_v17 = vmul.f32 %v3203_v54, %v6310_v32 }
 0x3fc   : > { %v6480_v61 = vadd.f32 %v3639_v2, %v3359_v37  ;;  %v4032_v2 = vperm.slane %v6520_v16, 1 }
 0x3fd   : > { %v3387_v34 = vsel %vm3268_vm14, %v3262_v17, 0.0 }
 0x3fe   : > { %v6490_v26 = vadd.f32 %v3388_v8, %v3387_v34  ;;  %4037 = vperm.xlu0 %4630, %v4032_v2  }
 0x3ff   : > { %3741 = vperm.xlu2 %4626, %v3736_v48  }
 0x400   : > { %3734 = vperm.xlu1 %4625, %v3723_v4   ;;  %v3302_v4 = vrot.slane %v3301_v18, 2 }
 0x401   : > { %v3433_v11 = vpop.permute.xlu2 %3432 }
 0x402   : > { %v3216_v27 = vpop.permute.xlu1 %3215  ;;  %v3524_v24 = vmul.f32 %v3433_v11, %v6321_v36  ;;  %v3816_v21 = vmul.f32 %v3433_v11, %v6504_v51  ;;  %v3303_v8 = vadd.f32 %v3302_v4, %v3301_v18  ;;  %v3544_v4 = vmul.f32 %v6471_v41, %v6321_v36 }
 0x403   : > { %v3264_v38 = vmul.f32 %v3216_v27, %v6310_v32  ;;  %v3542_v39 = vmul.f32 %v3216_v27, %v6321_v36 }
 0x404   : > { %v3577_v55 = vsel %vm3268_vm14, %v3524_v24, 0.0  ;;  %v3855_v33 = vsel %vm3268_vm14, %v3816_v21, 0.0  ;;  %v3304_v11 = vrot.slane %v3303_v8, 1  ;;  %v3385_v21 = vrot.slane %v3384_v53, 1 }
 0x405   : > { %v3396_v45 = vsel %vm3268_vm14, %v3264_v38, 0.0  ;;  %v3658_v12 = vsel %vm3268_vm14, %v3542_v39, 0.0  ;;  %v3579_v6 = vadd.f32 %v3578_v1, %v3577_v55  ;;  %v3857_v9 = vadd.f32 %v3856_v3, %v3855_v33 }
 0x406   : > { %v6523_v15 = vadd.f32 %v3397_v35, %v3396_v45  ;;  %v3660_v37 = vadd.f32 %v3659_v30, %v3658_v12  ;;  %v3390_v38 = vrot.slane %v6490_v26, 4  ;;  %v3305_v19 = vadd.f32 %v3304_v11, %v3303_v8 }
 0x407   : > { %v3580_v54 = vrot.slane %v3579_v6, 4  ;;  %v3858_v52 = vrot.slane %v3857_v9, 4  ;;  %3754 = vperm.xlu2 %4626, %v3749_v62   ;;  %v3386_v55 = vadd.f32 %v3385_v21, %v3384_v53  ;;  %v3667_v2 = vsel %vm3268_vm14, %v3544_v4, 0.0 }
 0x408   : > { %3747 = vperm.xlu1 %4625, %v3736_v48   ;;  %v3661_v17 = vrot.slane %v3660_v37, 4  ;;  %v3266_v48 = vmul.f32 %v6471_v41, %v6310_v32  ;;  %v3391_v33 = vadd.f32 %v3390_v38, %v6490_v26  ;;  %v3291_v26 = vrot.slane %v6342_v57, 4 }
 0x409   : > { %v3581_v50 = vadd.f32 %v3580_v54, %v3579_v6  ;;  %v3859_v34 = vadd.f32 %v3858_v52, %v3857_v9  ;;  %v3522_v8 = vmul.f32 %v6476_v13, %v6321_v36  ;;  %v3814_v53 = vmul.f32 %v6476_v13, %v6504_v51 }
 0x40a   : > { %v3662_v49 = vadd.f32 %v3661_v17, %v3660_v37  ;;  %v3405_v9 = vsel %vm3268_vm14, %v3266_v48, 0.0  ;;  %v3762_v37 = vperm.slane %v6267_v43, 6  ;;  %v3775_v38 = vperm.slane %v6267_v43, 7 }
 0x40b   : > { %v3582_v31 = vrot.slane %v3581_v50, 2  ;;  %v3860_v59 = vrot.slane %v3859_v34, 2 }
 0x40c   : > { %v3663_v28 = vrot.slane %v3662_v49, 2 }
 0x40d   : > { %v3583_v27 = vadd.f32 %v3582_v31, %v3581_v50  ;;  %v3861_v24 = vadd.f32 %v3860_v59, %v3859_v34  ;;  %v3292_v34 = vadd.f32 %v3291_v26, %v6342_v57  ;;  %v3846_v57 = vsel %vm3268_vm14, %v3814_v53, 0.0 }
 0x40e   : > { %v3664_v39 = vadd.f32 %v3663_v28, %v3662_v49 }
 0x40f   : > { %v3584_v60 = vrot.slane %v3583_v27, 1  ;;  %v3862_v62 = vrot.slane %v3861_v24, 1  ;;  %4629 = vset.pattern.permute.xlu2 %v7091_v25 }
 0x410   : > { %4628 = vset.pattern.permute.xlu1 %v7092_v56  ;;  %v3665_v18 = vrot.slane %v3664_v39, 1 }
 0x411   : > { %v3585_v35 = vadd.f32 %v3584_v60, %v3583_v27  ;;  %v3863_v1 = vadd.f32 %v3862_v62, %v3861_v24  ;;  %v3452_v17 = vpop.permute.xlu2 %3451  ;;  %v3568_v27 = vsel %vm3268_vm14, %v3522_v8, 0.0 }
 0x412   : > { %v3235_v3 = vpop.permute.xlu1 %3234  ;;  %v3666_v45 = vadd.f32 %v3665_v18, %v3664_v39  ;;  %v3293_v39 = vrot.slane %v3292_v34, 2 }
 0x413   : > { %v3267_v12 = vmul.f32 %v3235_v3, %v6302_v40  ;;  %v6537_v30 = vadd.f32 %v3585_v35, %v3305_v19  ;;  %v6540_v6 = vadd.f32 %v3863_v1, %v6390_v0  ;;  %v3545_v32 = vmul.f32 %v3235_v3, %v6332_v42 }
 0x414   : > { %v6544_v7 = vadd.f32 %v3666_v45, %v3386_v55  ;;  %v3392_v0 = vrot.slane %v3391_v33, 2  ;;  %v3327_v19 = vrot.slane %v6414_v23, 4  ;;  %v3294_v3 = vadd.f32 %v3293_v39, %v3292_v34  ;;  %v6568_v45 = vpop.permute.xlu0 %3471 }
 0x415   : > { %v3406_v41 = vsel %vm3270_vm13, %v3267_v12, 0.0  ;;  %v3668_v54 = vsel %vm3270_vm13, %v3545_v32, 0.0  ;;  %v3801_v39 = vperm.slane %v6264_v46, 7 }
 0x416   : > { %v6550_v40 = vadd.f32 %v3406_v41, %v3405_v9  ;;  %v3669_v52 = vadd.f32 %v3668_v54, %v3667_v2  ;;  %v3393_v31 = vadd.f32 %v3392_v0, %v3391_v33  ;;  %v3328_v9 = vadd.f32 %v3327_v19, %v6414_v23 }
 0x417   : > { %3773 = vperm.xlu2 %4629, %v3762_v37   ;;  %v3295_v2 = vrot.slane %v3294_v3, 1 }
 0x418   : > { %3767 = vperm.xlu1 %4628, %v3762_v37   ;;  %v3670_v50 = vrot.slane %v3669_v52, 4  ;;  %v3394_v62 = vrot.slane %v3393_v31, 1 }
 0x419   : > { %v6566_v55 = vpop.permute.xlu2 %3464  ;;  %v3296_v53 = vadd.f32 %v3295_v2, %v3294_v3 }
 0x41a   : > { %v3426_v49 = vpop.permute.xlu1 %3425  ;;  %v3671_v59 = vadd.f32 %v3670_v50, %v3669_v52  ;;  %v3395_v33 = vadd.f32 %v3394_v62, %v3393_v31  ;;  %v3329_v52 = vrot.slane %v3328_v9, 2  ;;  %v3531_v50 = vmul.f32 %v3452_v17, %v6332_v42 }
 0x41b   : > { %v3523_v28 = vmul.f32 %v3426_v49, %v6332_v42  ;;  %v3815_v11 = vmul.f32 %v3426_v49, %v6486_v44  ;;  %v3823_v49 = vmul.f32 %v3452_v17, %v6486_v44  ;;  %v3399_v17 = vrot.slane %v6523_v15, 4 }
 0x41c   : > { %v3672_v24 = vrot.slane %v3671_v59, 2 }
 0x41d   : > { %v3569_v21 = vsel %vm3270_vm13, %v3523_v28, 0.0  ;;  %v3847_v13 = vsel %vm3270_vm13, %v3815_v11, 0.0  ;;  %v3504_v28 = vpop.permute.xlu0 %3503 }
 0x41e   : > { %v3570_v60 = vadd.f32 %v3569_v21, %v3568_v27  ;;  %v3673_v48 = vadd.f32 %v3672_v24, %v3671_v59  ;;  %v3848_v18 = vadd.f32 %v3847_v13, %v3846_v57  ;;  %v3330_v24 = vadd.f32 %v3329_v52, %v3328_v9  ;;  %v6587_v57 = vld [vmem:[%s6979_s8] ss:$0 sm:$0xff] }
 0x41f   : > { %3786 = vperm.xlu2 %4629, %v3775_v38   ;;  %v4025_v9 = vperm.slane %v6520_v16, 0 }
 0x420   : > { %v3571_v4 = vrot.slane %v3570_v60, 4  ;;  %3780 = vperm.xlu1 %4628, %v3775_v38   ;;  %v3674_v35 = vrot.slane %v3673_v48, 1  ;;  %v3849_v1 = vrot.slane %v3848_v18, 4 }
 0x422   : > { %v3572_v43 = vadd.f32 %v3571_v4, %v3570_v60  ;;  %v3675_v12 = vadd.f32 %v3674_v35, %v3673_v48  ;;  %v3850_v32 = vadd.f32 %v3849_v1, %v3848_v18  ;;  %v3605_v60 = vsel %vm3270_vm13, %v3531_v50, 0.0 }
 0x423   : > { %v3547_v48 = vmul.f32 %v3504_v28, %v6332_v42  ;;  %v3883_v18 = vsel %vm3270_vm13, %v3823_v49, 0.0  ;;  %v3839_v1 = vmul.f32 %v3504_v28, %v6486_v44 }
 0x424   : > { %v3573_v41 = vrot.slane %v3572_v43, 2  ;;  %v6571_v37 = vadd.f32 %v3675_v12, %v3395_v33  ;;  %v3851_v26 = vrot.slane %v3850_v32, 2  ;;  %v3400_v12 = vadd.f32 %v3399_v17, %v6523_v15 }
 0x425   : > { %v3825_v15 = vmul.f32 %v6566_v55, %v6486_v44 }
 0x426   : > { %v3574_v54 = vadd.f32 %v3573_v41, %v3572_v43  ;;  %v3852_v0 = vadd.f32 %v3851_v26, %v3850_v32  ;;  %v3331_v43 = vrot.slane %v3330_v24, 1  ;;  %v3677_v32 = vsel %vm3270_vm13, %v3547_v48, 0.0 }
 0x427   : > { %4632 = vset.pattern.permute.xlu2 %v7092_v56  ;;  %v3401_v49 = vrot.slane %v3400_v12, 2  ;;  %v3892_v17 = vsel %vm3270_vm13, %v3825_v15, 0.0 }
 0x428   : > { %v3575_v8 = vrot.slane %v3574_v54, 1  ;;  %4631 = vset.pattern.permute.xlu1 %v7091_v25  ;;  %v3853_v34 = vrot.slane %v3852_v0, 1  ;;  %v3332_v48 = vadd.f32 %v3331_v43, %v3330_v24 }
 0x429   : > { %v6577_v31 = vpop.permute.xlu2 %3484 }
 0x42a   : > { %v3576_v23 = vadd.f32 %v3575_v8, %v3574_v54  ;;  %v3446_v59 = vpop.permute.xlu1 %3445  ;;  %v3854_v11 = vadd.f32 %v3853_v34, %v3852_v0 }
 0x42b   : > { %v3530_v27 = vmul.f32 %v3446_v59, %v6321_v36  ;;  %v3822_v38 = vmul.f32 %v3446_v59, %v6504_v51 }
 0x42c   : > { %v6580_v21 = vadd.f32 %v3576_v23, %v3296_v53  ;;  %v3990_v13 = vadd.f32 %v3854_v11, %v6355_v63  ;;  %v4010_v63 = vadd.f32 %v6587_v57, %v6540_v6  ;;  %v3955_v6 = vsel %vm3270_vm13, %v3839_v1, 0.0 }
 0x42d   : > { %v3604_v62 = vsel %vm3268_vm14, %v3530_v27, 0.0  ;;  %v3882_v4 = vsel %vm3268_vm14, %v3822_v38, 0.0 }
 0x42e   : > { %v3606_v19 = vadd.f32 %v3605_v60, %v3604_v62  ;;  %v3884_v35 = vadd.f32 %v3883_v18, %v3882_v4  ;;  %v4009_v54 = vadd.f32 %v6587_v57, %v3990_v13  ;;  %v4055_v8 = vrot.slane %v4010_v63, 7 }
 0x42f   : > { %3806 = vperm.xlu2 %4632, %v3801_v39   ;;  %v3402_v4 = vadd.f32 %v3401_v49, %v3400_v12  ;;  %v3372_v49 = vrot.slane %v6467_v47, 4 }
 0x430   : > { %v3607_v3 = vrot.slane %v3606_v19, 4  ;;  %3799 = vperm.xlu1 %4631, %v3788_v29   ;;  %v3885_v33 = vrot.slane %v3884_v35, 4  ;;  %v6618_v38 = vsel %vm1385_vm2, %v4055_v8, %v4009_v54 }
 0x431   : > { %v3498_v26 = vpop.permute.xlu2 %3497 }
 0x432   : > { %v3608_v41 = vadd.f32 %v3607_v3, %v3606_v19  ;;  %v6604_v2 = vpop.permute.xlu1 %3458  ;;  %v3886_v0 = vadd.f32 %v3885_v33, %v3884_v35  ;;  %v3546_v46 = vmul.f32 %v3498_v26, %v6321_v36  ;;  %v3838_v29 = vmul.f32 %v3498_v26, %v6504_v51 }
 0x433   : > { %v3824_v16 = vmul.f32 %v6604_v2, %v6504_v51 }
 0x434   : > { %v3609_v52 = vrot.slane %v3608_v41, 2  ;;  %v3887_v50 = vrot.slane %v3886_v0, 2  ;;  %v3676_v34 = vsel %vm3268_vm14, %v3546_v46, 0.0  ;;  %v3954_v53 = vsel %vm3268_vm14, %v3838_v29, 0.0 }
 0x435   : > { %v3678_v59 = vadd.f32 %v3677_v32, %v3676_v34  ;;  %v3956_v28 = vadd.f32 %v3955_v6, %v3954_v53  ;;  %v3891_v27 = vsel %vm3268_vm14, %v3824_v16, 0.0  ;;  %v3403_v46 = vrot.slane %v3402_v4, 1 }
 0x436   : > { %v3610_v23 = vadd.f32 %v3609_v52, %v3608_v41  ;;  %v3888_v11 = vadd.f32 %v3887_v50, %v3886_v0  ;;  %v3893_v19 = vadd.f32 %v3892_v17, %v3891_v27  ;;  %v3830_v6 = vmul.f32 %v6568_v45, %v6504_v51 }
 0x437   : > { %v3679_v13 = vrot.slane %v3678_v59, 4  ;;  %v3957_v62 = vrot.slane %v3956_v28, 4  ;;  %4030 = vperm.xlu2 %4632, %v4025_v9   ;;  %v3404_v15 = vadd.f32 %v3403_v46, %v3402_v4 }
 0x438   : > { %v3611_v60 = vrot.slane %v3610_v23, 1  ;;  %3812 = vperm.xlu1 %4631, %v3801_v39   ;;  %v3889_v18 = vrot.slane %v3888_v11, 1  ;;  %v3894_v33 = vrot.slane %v3893_v19, 4 }
 0x439   : > { %v3680_v1 = vadd.f32 %v3679_v13, %v3678_v59  ;;  %v3958_v3 = vadd.f32 %v3957_v62, %v3956_v28  ;;  %v3918_v59 = vsel %vm3268_vm14, %v3830_v6, 0.0  ;;  %v3832_v62 = vmul.f32 %v6577_v31, %v6504_v51 }
 0x43a   : > { %v3612_v35 = vadd.f32 %v3611_v60, %v3610_v23  ;;  %v3890_v63 = vadd.f32 %v3889_v18, %v3888_v11  ;;  %v3895_v0 = vadd.f32 %v3894_v33, %v3893_v19  ;;  %v3373_v60 = vadd.f32 %v3372_v49, %v6467_v47 }
 0x43b   : > { %v3681_v41 = vrot.slane %v3680_v1, 2  ;;  %v3959_v26 = vrot.slane %v3958_v3, 2 }
 0x43c   : > { %v6621_v32 = vadd.f32 %v3612_v35, %v3332_v48  ;;  %v3994_v54 = vadd.f32 %v3890_v63, %v6426_v10  ;;  %v3896_v39 = vrot.slane %v3895_v0, 2 }
 0x43d   : > { %v3682_v29 = vadd.f32 %v3681_v41, %v3680_v1  ;;  %v3960_v9 = vadd.f32 %v3959_v26, %v3958_v3  ;;  %v3927_v3 = vsel %vm3268_vm14, %v3832_v62, 0.0 }
 0x43e   : > { %v3897_v12 = vadd.f32 %v3896_v39, %v3895_v0 }
 0x43f   : > { %v3683_v24 = vrot.slane %v3682_v29, 1  ;;  %v3961_v43 = vrot.slane %v3960_v9, 1  ;;  %4634 = vset.pattern.permute.xlu2 %v7091_v25 }
 0x440   : > { %4633 = vset.pattern.permute.xlu1 %v7092_v56  ;;  %v3898_v10 = vrot.slane %v3897_v12, 1 }
 0x441   : > { %v3684_v52 = vadd.f32 %v3683_v24, %v3682_v29  ;;  %v3962_v16 = vadd.f32 %v3961_v43, %v3960_v9  ;;  %v3517_v17 = vpop.permute.xlu2 %3516 }
 0x442   : > { %v6628_v8 = vpop.permute.xlu1 %3477  ;;  %v3899_v23 = vadd.f32 %v3898_v10, %v3897_v12  ;;  %v3408_v12 = vrot.slane %v6550_v40, 4  ;;  %v3549_v49 = vmul.f32 %v3517_v17, %v6332_v42 }
 0x443   : > { %v6630_v50 = vadd.f32 %v3684_v52, %v3404_v15  ;;  %v6633_v34 = vadd.f32 %v3962_v16, %v6544_v7  ;;  %v3831_v53 = vmul.f32 %v6628_v8, %v6486_v44  ;;  %v3540_v7 = vmul.f32 %v6577_v31, %v6321_v36 }
 0x444   : > { %v3995_v11 = vadd.f32 %v3899_v23, %v6417_v58  ;;  %v3374_v58 = vrot.slane %v3373_v60, 2  ;;  %v4013_v36 = vadd.f32 %v6587_v57, %v3994_v54 }
 0x445   : > { %v3919_v28 = vsel %vm3270_vm13, %v3831_v53, 0.0  ;;  %v3649_v1 = vsel %vm3268_vm14, %v3540_v7, 0.0  ;;  %v3409_v53 = vadd.f32 %v3408_v12, %v6550_v40  ;;  %v4666_v12 = vld [vmem:[%s6978_s7 + $0x8] sm:$0xf] }
 0x446   : > { %v3920_v27 = vadd.f32 %v3919_v28, %v3918_v59  ;;  %v4014_v13 = vadd.f32 %v6587_v57, %v3995_v11  ;;  %v3375_v29 = vadd.f32 %v3374_v58, %v3373_v60  ;;  %v3841_v59 = vmul.f32 %v3517_v17, %v6486_v44 }
 0x447   : > { %v3686_v17 = vsel %vm3270_vm13, %v3549_v49, 0.0 }
 0x448   : > { %v3921_v18 = vrot.slane %v3920_v27, 4  ;;  %v4061_v4 = vrot.slane %v4014_v13, 7  ;;  %v3376_v54 = vrot.slane %v3375_v29, 1 }
 0x449   : > { %v3722_v9 = vpop.permute.xlu2 %3721 }
 0x44a   : > { %v3491_v48 = vpop.permute.xlu1 %3490  ;;  %v3922_v31 = vadd.f32 %v3921_v18, %v3920_v27  ;;  %v6655_v0 = vsel %vm1385_vm2, %v4061_v4, %v4013_v36  ;;  %v3377_v11 = vadd.f32 %v3376_v54, %v3375_v29  ;;  %v3410_v18 = vrot.slane %v3409_v53, 2 }
 0x44b   : > { %v3541_v19 = vmul.f32 %v3491_v48, %v6332_v42  ;;  %v3833_v35 = vmul.f32 %v3491_v48, %v6486_v44  ;;  %v6666_v48 = vld [vmem:[%s6978_s7 + $0x10] sm:$0xff] }
 0x44c   : > { %v3923_v24 = vrot.slane %v3922_v31, 2 }
 0x44d   : > { %v3650_v47 = vsel %vm3270_vm13, %v3541_v19, 0.0  ;;  %v3928_v33 = vsel %vm3270_vm13, %v3833_v35, 0.0  ;;  %v6670_v19 = vpop.permute.xlu0 %3728  ;;  %v3964_v35 = vsel %vm3270_vm13, %v3841_v59, 0.0 }
 0x44e   : > { %v3651_v63 = vadd.f32 %v3650_v47, %v3649_v1  ;;  %v3929_v41 = vadd.f32 %v3928_v33, %v3927_v3  ;;  %v3924_v16 = vadd.f32 %v3923_v24, %v3922_v31 }
 0x450   : > { %v3652_v26 = vrot.slane %v3651_v63, 4  ;;  %v3930_v46 = vrot.slane %v3929_v41, 4  ;;  %v3925_v13 = vrot.slane %v3924_v16, 1 }
 0x452   : > { %v3653_v39 = vadd.f32 %v3652_v26, %v3651_v63  ;;  %v3931_v43 = vadd.f32 %v3930_v46, %v3929_v41  ;;  %v3926_v63 = vadd.f32 %v3925_v13, %v3924_v16  ;;  %v3411_v41 = vadd.f32 %v3410_v18, %v3409_v53 }
 0x453   : > { %v3819_v26 = vmul.f32 %v3722_v9, %v6486_v44 }
 0x454   : > { %v3654_v6 = vrot.slane %v3653_v39, 2  ;;  %v3932_v15 = vrot.slane %v3931_v43, 2 }
 0x456   : > { %v3655_v52 = vadd.f32 %v3654_v6, %v3653_v39  ;;  %v3933_v10 = vadd.f32 %v3932_v15, %v3931_v43  ;;  %v3251_v6 = vmul.f32 %v4666_v12, %v6384_v14  ;;  %v3998_v15 = vadd.f32 %v3926_v63, %v6469_v5 }
 0x457   : > { %v3865_v14 = vsel %vm3270_vm13, %v3819_v26, 0.0 }
 0x458   : > { %v3656_v23 = vrot.slane %v3655_v52, 1  ;;  %v3934_v28 = vrot.slane %v3933_v10, 1  ;;  %v3334_v13 = vsel %vm3270_vm13, %v3251_v6, 0.0  ;;  %v4021_v6 = vadd.f32 %v6587_v57, %v6633_v34 }
 0x459   : > { %v6661_v60 = vpop.permute.xlu2 %3741 }
 0x45a   : > { %v3657_v27 = vadd.f32 %v3656_v23, %v3655_v52  ;;  %v3511_v7 = vpop.permute.xlu1 %3510  ;;  %v3935_v62 = vadd.f32 %v3934_v28, %v3933_v10  ;;  %v4667_v52 = vld [vmem:[%s6978_s7 + $0x18] sm:$0xf]  ;;  %v3761_v10 = vpop.permute.xlu0 %3760  ;;  %v3412_v23 = vrot.slane %v3411_v41, 1 }
 0x45b   : > { %v3548_v40 = vmul.f32 %v6666_v48, %v3511_v7  ;;  %v3840_v42 = vmul.f32 %v3511_v7, %v6504_v51  ;;  %v3533_v16 = vmul.f32 %v4667_v52, %v6566_v55  ;;  %v3829_v55 = vmul.f32 %v3761_v10, %v6486_v44 }
 0x45c   : > { %v6673_v4 = vadd.f32 %v3657_v27, %v3377_v11  ;;  %v3999_v58 = vadd.f32 %v3935_v62, %v6480_v61  ;;  %v4665_v61 = vld [vmem:[%s6978_s7] sm:$0xff]  ;;  %v4017_v62 = vadd.f32 %v6587_v57, %v3998_v15 }
 0x45d   : > { %v3685_v1 = vsel %vm3268_vm14, %v3548_v40, 0.0  ;;  %v3963_v47 = vsel %vm3268_vm14, %v3840_v42, 0.0  ;;  %v3250_v43 = vmul.f32 %v4665_v61, %v6373_v22  ;;  %v3532_v22 = vmul.f32 %v6666_v48, %v6604_v2 }
 0x45e   : > { %v3687_v3 = vadd.f32 %v3686_v17, %v3685_v1  ;;  %v3965_v36 = vadd.f32 %v3964_v35, %v3963_v47  ;;  %v4018_v46 = vadd.f32 %v6587_v57, %v3999_v58  ;;  %v3413_v35 = vadd.f32 %v3412_v23, %v3411_v41 }
 0x45f   : > { %v3613_v2 = vsel %vm3268_vm14, %v3532_v22, 0.0  ;;  %v3333_v17 = vsel %vm3268_vm14, %v3250_v43, 0.0  ;;  %v3614_v58 = vsel %vm3270_vm13, %v3533_v16, 0.0  ;;  %v3910_v26 = vsel %vm3270_vm13, %v3829_v55, 0.0 }
 0x460   : > { %v3688_v33 = vrot.slane %v3687_v3, 4  ;;  %v3966_v31 = vrot.slane %v3965_v36, 4  ;;  %v4067_v59 = vrot.slane %v4018_v46, 7 }
 0x461   : > { %v3755_v9 = vpop.permute.xlu2 %3754 }
 0x462   : > { %v3689_v29 = vadd.f32 %v3688_v33, %v3687_v3  ;;  %v3967_v39 = vadd.f32 %v3966_v31, %v3965_v36  ;;  %v3716_v24 = vpop.permute.xlu1 %3715  ;;  %v3828_v27 = vmul.f32 %v3755_v9, %v6504_v51  ;;  %v6707_v1 = vsel %vm1385_vm2, %v4067_v59, %v4017_v62 }
 0x463   : > { %v3818_v54 = vmul.f32 %v3716_v24, %v6504_v51  ;;  %v3335_v33 = vadd.f32 %v3334_v13, %v3333_v17  ;;  %v3615_v31 = vadd.f32 %v3614_v58, %v3613_v2  ;;  %v3826_v62 = vmul.f32 %v6661_v60, %v6504_v51 }
 0x464   : > { %v3690_v53 = vrot.slane %v3689_v29, 2  ;;  %v3968_v49 = vrot.slane %v3967_v39, 2  ;;  %v3909_v36 = vsel %vm3268_vm14, %v3828_v27, 0.0 }
 0x465   : > { %v3864_v5 = vsel %vm3268_vm14, %v3818_v54, 0.0  ;;  %v3911_v41 = vadd.f32 %v3910_v26, %v3909_v36  ;;  %v3616_v43 = vrot.slane %v3615_v31, 4  ;;  %v3336_v12 = vrot.slane %v3335_v33, 4 }
 0x466   : > { %v3691_v28 = vadd.f32 %v3690_v53, %v3689_v29  ;;  %v3969_v11 = vadd.f32 %v3968_v49, %v3967_v39  ;;  %v3866_v7 = vadd.f32 %v3865_v14, %v3864_v5  ;;  %v3820_v54 = vmul.f32 %v6670_v19, %v6504_v51 }
 0x467   : > { %v3912_v16 = vrot.slane %v3911_v41, 4  ;;  %v3617_v53 = vadd.f32 %v3616_v43, %v3615_v31  ;;  %v3337_v23 = vadd.f32 %v3336_v12, %v3335_v33  ;;  %v3539_v5 = vmul.f32 %v4667_v52, %v6628_v8 }
 0x468   : > { %v3692_v40 = vrot.slane %v3691_v28, 1  ;;  %v3970_v42 = vrot.slane %v3969_v11, 1  ;;  %v3867_v18 = vrot.slane %v3866_v7, 4  ;;  %v3873_v14 = vsel %vm3268_vm14, %v3820_v54, 0.0 }
 0x469   : > { %v3913_v59 = vadd.f32 %v3912_v16, %v3911_v41  ;;  %v3338_v27 = vrot.slane %v3337_v23, 2 }
 0x46a   : > { %v3693_v47 = vadd.f32 %v3692_v40, %v3691_v28  ;;  %v3971_v3 = vadd.f32 %v3970_v42, %v3969_v11  ;;  %v3868_v63 = vadd.f32 %v3867_v18, %v3866_v7  ;;  %v3618_v11 = vrot.slane %v3617_v53, 2 }
 0x46b   : > { %v3538_v7 = vmul.f32 %v6666_v48, %v6568_v45  ;;  %v3914_v2 = vrot.slane %v3913_v59, 2  ;;  %v3641_v40 = vsel %vm3270_vm13, %v3539_v5, 0.0  ;;  %v3339_v17 = vadd.f32 %v3338_v27, %v3337_v23 }
 0x46c   : > { %v6711_v46 = vadd.f32 %v3693_v47, %v3413_v35  ;;  %v4003_v29 = vadd.f32 %v3971_v3, %v6571_v37  ;;  %v3869_v39 = vrot.slane %v3868_v63, 2  ;;  %v3619_v52 = vadd.f32 %v3618_v11, %v3617_v53 }
 0x46d   : > { %v3640_v35 = vsel %vm3268_vm14, %v3538_v7, 0.0  ;;  %v3900_v48 = vsel %vm3268_vm14, %v3826_v62, 0.0  ;;  %v3915_v47 = vadd.f32 %v3914_v2, %v3913_v59 }
 0x46e   : > { %v4022_v24 = vadd.f32 %v6587_v57, %v4003_v29  ;;  %v3870_v61 = vadd.f32 %v3869_v39, %v3868_v63  ;;  %v3642_v45 = vadd.f32 %v3641_v40, %v3640_v35  ;;  %v3620_v33 = vrot.slane %v3619_v52, 1 }
 0x46f   : > { %v3340_v39 = vrot.slane %v3339_v17, 1 }
 0x470   : > { %v4073_v15 = vrot.slane %v4022_v24, 7  ;;  %v3871_v9 = vrot.slane %v3870_v61, 1  ;;  %v3643_v41 = vrot.slane %v3642_v45, 4  ;;  %v3916_v24 = vrot.slane %v3915_v47, 1 }
 0x471   : > { %v3774_v13 = vpop.permute.xlu2 %3773  ;;  %v3341_v16 = vadd.f32 %v3340_v39, %v3339_v17 }
 0x472   : > { %v6720_v10 = vsel %vm1385_vm2, %v4073_v15, %v4021_v6  ;;  %v3872_v37 = vadd.f32 %v3871_v9, %v3870_v61  ;;  %v3735_v22 = vpop.permute.xlu1 %3734  ;;  %v3621_v6 = vadd.f32 %v3620_v33, %v3619_v52  ;;  %v3363_v15 = vrot.slane %v6455_v20, 4 }
 0x473   : > { %v3821_v49 = vmul.f32 %v3735_v22, %v6486_v44  ;;  %v3917_v22 = vadd.f32 %v3916_v24, %v3915_v47 }
 0x474   : > { %v3992_v28 = vadd.f32 %v3872_v37, %v6580_v21  ;;  %v3644_v37 = vadd.f32 %v3643_v41, %v3642_v45  ;;  %v3701_v23 = vadd.f32 %v3621_v6, %v3341_v16 }
 0x475   : > { %v3874_v34 = vsel %vm3270_vm13, %v3821_v49, 0.0 }
 0x476   : > { %v3875_v19 = vadd.f32 %v3874_v34, %v3873_v14  ;;  %v4011_v42 = vadd.f32 %v6587_v57, %v3992_v28  ;;  %v3645_v34 = vrot.slane %v3644_v37, 2  ;;  %v3997_v5 = vadd.f32 %v3917_v22, %v3701_v23 }
 0x477   : > { %v3835_v28 = vmul.f32 %v3774_v13, %v6486_v44 }
 0x478   : > { %v3876_v55 = vrot.slane %v3875_v19, 4  ;;  %v4057_v63 = vrot.slane %v4011_v42, 6  ;;  %v3646_v2 = vadd.f32 %v3645_v34, %v3644_v37  ;;  %v4016_v42 = vadd.f32 %v6587_v57, %v3997_v5  ;;  %v3794_v5 = vpop.permute.xlu0 %3793 }
 0x479   : > { %v3787_v43 = vpop.permute.xlu2 %3786  ;;  %v3937_v13 = vsel %vm3270_vm13, %v3835_v28, 0.0 }
 0x47a   : > { %v3877_v18 = vadd.f32 %v3876_v55, %v3875_v19  ;;  %v3748_v8 = vpop.permute.xlu1 %3747  ;;  %v4058_v29 = vsel %vm1387_vm3, %v4057_v63, %v6618_v38  ;;  %v3364_v38 = vadd.f32 %v3363_v15, %v6455_v20  ;;  %v6745_v19 = vadd.s32 16, %v7092_v56 }
 0x47b   : > { %v3827_v21 = vmul.f32 %v3748_v8, %v6486_v44  ;;  %v3647_v35 = vrot.slane %v3646_v2, 1  ;;  %v3837_v45 = vmul.f32 %v3787_v43, %v6486_v44 }
 0x47c   : > { %v3878_v58 = vrot.slane %v3877_v18, 2  ;;  %4635 = vset.pattern.permute.xlu0 %v6745_v19  ;;  %v3365_v20 = vrot.slane %v3364_v38, 2 }
 0x47d   : > { %v3901_v60 = vsel %vm3270_vm13, %v3827_v21, 0.0  ;;  %v3946_v41 = vsel %vm3270_vm13, %v3837_v45, 0.0 }
 0x47e   : > { %v3879_v3 = vadd.f32 %v3878_v58, %v3877_v18  ;;  %v3902_v36 = vadd.f32 %v3901_v60, %v3900_v48  ;;  %v3366_v52 = vadd.f32 %v3365_v20, %v3364_v38  ;;  %v4065_v58 = vrot.slane %v4016_v42, 5 }
 0x480   : > { %v3880_v31 = vrot.slane %v3879_v3, 1  ;;  %v3903_v26 = vrot.slane %v3902_v36, 4  ;;  %v3367_v33 = vrot.slane %v3366_v52, 1 }
 0x482   : > { %v3881_v61 = vadd.f32 %v3880_v31, %v3879_v3  ;;  %v3904_v12 = vadd.f32 %v3903_v26, %v3902_v36  ;;  %v3368_v15 = vadd.f32 %v3367_v33, %v3366_v52  ;;  %v6788_v33 = vpop.permute.xlu0 %4037 }
 0x484   : > { %v3993_v9 = vadd.f32 %v3881_v61, %v6537_v30  ;;  %v3905_v54 = vrot.slane %v3904_v12, 2 }
 0x486   : > { %v3906_v53 = vadd.f32 %v3905_v54, %v3904_v12  ;;  %v4012_v49 = vadd.f32 %v6587_v57, %v3993_v9 }
 0x488   : > { %v3907_v14 = vrot.slane %v3906_v53, 1  ;;  %v4059_v59 = vrot.slane %v4012_v49, 5 }
 0x489   : > { %v6747_v11 = vpop.permute.xlu2 %3806 }
 0x48a   : > { %v3908_v30 = vadd.f32 %v3907_v14, %v3906_v53  ;;  %v3768_v27 = vpop.permute.xlu1 %3767  ;;  %v6750_v7 = vsel %vm1389_vm4, %v4059_v59, %v4058_v29  ;;  %v3648_v29 = vadd.f32 %v3647_v35, %v3646_v2  ;;  %v3842_v2 = vmul.f32 %v3794_v5, %v6504_v51 }
 0x48b   : > { %v3834_v55 = vmul.f32 %v3768_v27, %v6504_v51 }
 0x48c   : > { %v3996_v62 = vadd.f32 %v3908_v30, %v6621_v32  ;;  %v3704_v22 = vadd.f32 %v3648_v29, %v3368_v15 }
 0x48d   : > { %v3936_v40 = vsel %vm3268_vm14, %v3834_v55, 0.0 }
 0x48e   : > { %v4015_v18 = vadd.f32 %v6587_v57, %v3996_v62  ;;  %v3938_v8 = vadd.f32 %v3937_v13, %v3936_v40 }
 0x490   : > { %v3939_v21 = vrot.slane %v3938_v8, 4  ;;  %v4063_v17 = vrot.slane %v4015_v18, 6 }
 0x491   : > { %v6762_v47 = vpop.permute.xlu2 %4030 }
 0x492   : > { %v3940_v48 = vadd.f32 %v3939_v21, %v3938_v8  ;;  %v4064_v32 = vsel %vm1387_vm3, %v4063_v17, %v6655_v0  ;;  %v3781_v60 = vpop.permute.xlu1 %3780  ;;  %v4083_v36 = vmul.f32 %v6750_v7, %v6762_v47  ;;  %v3972_v21 = vsel %vm3268_vm14, %v3842_v2, 0.0 }
 0x493   : > { %v6765_v3 = vsel %vm1389_vm4, %v4065_v58, %v4064_v32  ;;  %v3836_v63 = vmul.f32 %v3781_v60, %v6504_v51  ;;  %v3844_v60 = vmul.f32 %v6747_v11, %v6504_v51  ;;  %v4084_v11 = vmul.f32 %v6750_v7, %v6788_v33 }
 0x494   : > { %v3941_v31 = vrot.slane %v3940_v48, 2  ;;  %v4085_v26 = vmul.f32 %v6765_v3, %v6762_v47  ;;  %v4091_v39 = vsel %vm3270_vm13, %v4083_v36, 0.0 }
 0x495   : > { %v3945_v0 = vsel %vm3268_vm14, %v3836_v63, 0.0  ;;  %v4092_v61 = vrot.slane %v4091_v39, 4 }
 0x496   : > { %v3942_v24 = vadd.f32 %v3941_v31, %v3940_v48  ;;  %v4105_v43 = vsel %vm3270_vm13, %v4085_v26, 0.0  ;;  %v3947_v6 = vadd.f32 %v3946_v41, %v3945_v0 }
 0x497   : > { %v4106_v12 = vrot.slane %v4105_v43, 4  ;;  %v4093_v54 = vadd.f32 %v4092_v61, %v4091_v39  ;;  %v3981_v39 = vsel %vm3268_vm14, %v3844_v60, 0.0 }
 0x498   : > { %v3943_v9 = vrot.slane %v3942_v24, 1  ;;  %v3948_v37 = vrot.slane %v3947_v6, 4 }
 0x499   : > { %v4107_v16 = vadd.f32 %v4106_v12, %v4105_v43  ;;  %v4094_v49 = vrot.slane %v4093_v54, 2 }
 0x49a   : > { %v3944_v53 = vadd.f32 %v3943_v9, %v3942_v24  ;;  %v3949_v23 = vadd.f32 %v3948_v37, %v3947_v6  ;;  %v4098_v6 = vsel %vm3270_vm13, %v4084_v11, 0.0 }
 0x49b   : > { %v4108_v14 = vrot.slane %v4107_v16, 2  ;;  %v4095_v59 = vadd.f32 %v4094_v49, %v4093_v54  ;;  %v4099_v37 = vrot.slane %v4098_v6, 4 }
 0x49c   : > { %v4000_v38 = vadd.f32 %v3944_v53, %v3704_v22  ;;  %v3950_v34 = vrot.slane %v3949_v23, 2 }
 0x49d   : > { %v4096_v30 = vrot.slane %v4095_v59, 1  ;;  %v4109_v62 = vadd.f32 %v4108_v14, %v4107_v16 }
 0x49e   : > { %v4019_v28 = vadd.f32 %v6587_v57, %v4000_v38  ;;  %v3951_v27 = vadd.f32 %v3950_v34, %v3949_v23  ;;  %v4100_v34 = vadd.f32 %v4099_v37, %v4098_v6 }
 0x49f   : > { %v4097_v20 = vadd.f32 %v4096_v30, %v4095_v59  ;;  %v4110_v52 = vrot.slane %v4109_v62, 1 }
 0x4a0   : > { %v4069_v55 = vrot.slane %v4019_v28, 6  ;;  %v3952_v13 = vrot.slane %v3951_v27, 1 }
 0x4a1   : > { %4170 = vperm.xlu0 %4635, %v4097_v20   ;;  %4164 = vperm.xlu2 %4634, %v4097_v20   ;;  %v4111_v32 = vadd.f32 %v4110_v52, %v4109_v62 }
 0x4a2   : > { %v3800_v40 = vpop.permute.xlu1 %3799  ;;  %v4070_v42 = vsel %vm1387_vm3, %v4069_v55, %v6707_v1  ;;  %v3953_v18 = vadd.f32 %v3952_v13, %v3951_v27  ;;  %4158 = vperm.xlu1 %4633, %v4097_v20  }
 0x4a3   : > { %v3843_v8 = vmul.f32 %v3800_v40, %v6486_v44 }
 0x4a4   : > { %v4001_v17 = vadd.f32 %v3953_v18, %v6673_v4 }
 0x4a5   : > { %v3973_v35 = vsel %vm3270_vm13, %v3843_v8, 0.0 }
 0x4a6   : > { %v3974_v58 = vadd.f32 %v3973_v35, %v3972_v21  ;;  %v4020_v45 = vadd.f32 %v6587_v57, %v4001_v17 }
 0x4a8   : > { %v3975_v48 = vrot.slane %v3974_v58, 4  ;;  %v4071_v1 = vrot.slane %v4020_v45, 5 }
 0x4a9   : > { %4182 = vperm.xlu2 %4634, %v4111_v32   ;;  %4638 = vset.pattern.permute.xlu0 %v7091_v25 }
 0x4aa   : > { %v3976_v36 = vadd.f32 %v3975_v48, %v3974_v58  ;;  %v3813_v63 = vpop.permute.xlu1 %3812  ;;  %4176 = vperm.xlu1 %4633, %v4111_v32   ;;  %v4072_v31 = vsel %vm1389_vm4, %v4071_v1, %v4070_v42 }
 0x4ab   : > { %v3845_v4 = vmul.f32 %v3813_v63, %v6486_v44  ;;  %v4087_v29 = vmul.f32 %v4072_v31, %v6762_v47  ;;  %v4088_v55 = vmul.f32 %v4072_v31, %v6788_v33 }
 0x4ac   : > { %v3977_v26 = vrot.slane %v3976_v36, 2 }
 0x4ad   : > { %v3982_v51 = vsel %vm3270_vm13, %v3845_v4, 0.0  ;;  %v4119_v24 = vsel %vm3270_vm13, %v4087_v29, 0.0  ;;  %v4126_v13 = vsel %vm3270_vm13, %v4088_v55, 0.0 }
 0x4ae   : > { %v3978_v0 = vadd.f32 %v3977_v26, %v3976_v36  ;;  %v3983_v41 = vadd.f32 %v3982_v51, %v3981_v39  ;;  %v4120_v61 = vrot.slane %v4119_v24, 4  ;;  %v4127_v42 = vrot.slane %v4126_v13, 4 }
 0x4b0   : > { %v3979_v43 = vrot.slane %v3978_v0, 1  ;;  %v3984_v44 = vrot.slane %v3983_v41, 4  ;;  %v4121_v12 = vadd.f32 %v4120_v61, %v4119_v24  ;;  %v4128_v21 = vadd.f32 %v4127_v42, %v4126_v13 }
 0x4b1   : > { %4637 = vset.pattern.permute.xlu2 %v7092_v56 }
 0x4b2   : > { %v3980_v15 = vadd.f32 %v3979_v43, %v3978_v0  ;;  %v3985_v9 = vadd.f32 %v3984_v44, %v3983_v41  ;;  %4636 = vset.pattern.permute.xlu1 %v6745_v19  ;;  %v4122_v54 = vrot.slane %v4121_v12, 2 }
 0x4b4   : > { %v4004_v16 = vadd.f32 %v3980_v15, %v6630_v50  ;;  %v3986_v7 = vrot.slane %v3985_v9, 2  ;;  %v4123_v22 = vadd.f32 %v4122_v54, %v4121_v12  ;;  %v4101_v50 = vrot.slane %v4100_v34, 2 }
 0x4b6   : > { %v4023_v53 = vadd.f32 %v6587_v57, %v4004_v16  ;;  %v3987_v49 = vadd.f32 %v3986_v7, %v3985_v9  ;;  %v4124_v23 = vrot.slane %v4123_v22, 1  ;;  %v4102_v62 = vadd.f32 %v4101_v50, %v4100_v34 }
 0x4b8   : > { %v4075_v38 = vrot.slane %v4023_v53, 6  ;;  %v3988_v14 = vrot.slane %v3987_v49, 1  ;;  %v4125_v59 = vadd.f32 %v4124_v23, %v4123_v22  ;;  %v4103_v40 = vrot.slane %v4102_v62, 1  ;;  %v6840_v22 = vld [vmem:[%s6981_s10 + $0x10] sm:$0xff] }
 0x4ba   : > { %v3989_v5 = vadd.f32 %v3988_v14, %v3987_v49  ;;  %v4076_v28 = vsel %vm1387_vm3, %v4075_v38, %v6720_v10  ;;  %4200 = vperm.xlu0 %4638, %v4125_v59   ;;  %4194 = vperm.xlu2 %4637, %v4125_v59   ;;  %v4104_v52 = vadd.f32 %v4103_v40, %v4102_v62  ;;  %v6858_v62 = vld [vmem:[%s6981_s10 + $0x20] sm:$0xff]  ;;  %v6865_v40 = vld [vmem:[%s6981_s10 + $0x28] sm:$0xff] }
 0x4bb   : > { %4188 = vperm.xlu1 %4636, %v4111_v32  }
 0x4bc   : > { %v4005_v30 = vadd.f32 %v3989_v5, %v6711_v46 }
 0x4be   : > { %v4024_v27 = vadd.f32 %v6587_v57, %v4005_v30  ;;  %v4086_v57 = vmul.f32 %v6765_v3, %v6788_v33 }
 0x4c0   : > { %v4077_v20 = vrot.slane %v4024_v27, 5  ;;  %v4112_v35 = vsel %vm3270_vm13, %v4086_v57, 0.0 }
 0x4c1   : > { %v4113_v45 = vrot.slane %v4112_v35, 4 }
 0x4c2   : > { %v4078_v2 = vsel %vm1389_vm4, %v4077_v20, %v4076_v28  ;;  %4641 = vset.pattern.permute.xlu0 %v7092_v56  ;;  %v6853_v20 = vld [vmem:[%s6981_s10 + $0x18] sm:$0xff] }
 0x4c3   : > { %v4089_v10 = vmul.f32 %v4078_v2, %v6762_v47  ;;  %4206 = vperm.xlu1 %4636, %v4125_v59   ;;  %v4129_v47 = vrot.slane %v4128_v21, 2  ;;  %v4114_v1 = vadd.f32 %v4113_v45, %v4112_v35  ;;  %v4090_v63 = vmul.f32 %v4078_v2, %v6788_v33 }
 0x4c5   : > { %v4133_v46 = vsel %vm3270_vm13, %v4089_v10, 0.0  ;;  %v4130_v60 = vadd.f32 %v4129_v47, %v4128_v21  ;;  %v4115_v36 = vrot.slane %v4114_v1, 2  ;;  %v4140_v26 = vsel %vm3270_vm13, %v4090_v63, 0.0 }
 0x4c6   : > { %v4134_v18 = vrot.slane %v4133_v46, 4  ;;  %v4141_v39 = vrot.slane %v4140_v26, 4 }
 0x4c7   : > { %v4131_v3 = vrot.slane %v4130_v60, 1  ;;  %v4116_v31 = vadd.f32 %v4115_v36, %v4114_v1 }
 0x4c8   : > { %v4135_v8 = vadd.f32 %v4134_v18, %v4133_v46  ;;  %v4142_v11 = vadd.f32 %v4141_v39, %v4140_v26 }
 0x4c9   : > { %v4132_v4 = vadd.f32 %v4131_v3, %v4130_v60  ;;  %v4117_v29 = vrot.slane %v4116_v31, 1 }
 0x4ca   : > { %v4136_v17 = vrot.slane %v4135_v8, 2  ;;  %4291 = vperm.xlu0 %4641, %v4104_v52   ;;  %v4143_v0 = vrot.slane %v4142_v11, 2 }
 0x4cb   : > { %4639 = vset.pattern.permute.xlu1 %v7091_v25  ;;  %v4118_v51 = vadd.f32 %v4117_v29, %v4116_v31 }
 0x4cc   : > { %v4137_v58 = vadd.f32 %v4136_v17, %v4135_v8  ;;  %v4144_v33 = vadd.f32 %v4143_v0, %v4142_v11 }
 0x4ce   : > { %v4138_v48 = vrot.slane %v4137_v58, 1  ;;  %v4145_v41 = vrot.slane %v4144_v33, 1 }
 0x4d0   : > { %v4139_v32 = vadd.f32 %v4138_v48, %v4137_v58  ;;  %v4146_v24 = vadd.f32 %v4145_v41, %v4144_v33 }
 0x4d2   : > { %4212 = vperm.xlu2 %4637, %v4139_v32   ;;  %4643 = vset.pattern.permute.xlu0 %v7091_v25 }
 0x4d3   : > { %4218 = vperm.xlu1 %4639, %v4139_v32  }
 0x4da   : > { %4640 = vset.pattern.permute.xlu2 %v6745_v19  ;;  %4333 = vperm.xlu0 %4643, %v4132_v4  }
 0x4db   : > { %4297 = vperm.xlu1 %4639, %v4104_v52  }
 0x4e2   : > { %4224 = vperm.xlu2 %4640, %v4139_v32   ;;  %4648 = vset.pattern.permute.xlu0 %v6745_v19 }
 0x4e3   : > { %4315 = vperm.xlu1 %4639, %v4118_v51  }
 0x4ea   : > { %4642 = vset.pattern.permute.xlu2 %v7092_v56  ;;  %4339 = vperm.xlu0 %4648, %v4132_v4  }
 0x4eb   : > { %4644 = vset.pattern.permute.xlu1 %v7092_v56 }
 0x4f2   : > { %4309 = vperm.xlu2 %4642, %v4118_v51  }
 0x4f3   : > { %4345 = vperm.xlu1 %4644, %v4146_v24  }
 0x4fa   : > { %4327 = vperm.xlu2 %4642, %v4132_v4  }
 0x4fb   : > { %4646 = vset.pattern.permute.xlu1 %v6745_v19  ;;  %v4165_v61 = vpop.permute.xlu2 %4164 }
 0x502   : > { %4645 = vset.pattern.permute.xlu2 %v7091_v25  ;;  %v4148_v25 = vld [vmem:[%s6981_s10 + $0x8] sm:$0xff] }
 0x503   : > { %4303 = vperm.xlu1 %4646, %v4104_v52   ;;  %v4183_v44 = vpop.permute.xlu2 %4182  ;;  %v4227_v17 = vmul.f32 %v4165_v61, %v4148_v25 }
 0x504   : > { %v4230_v47 = vmul.f32 %v4183_v44, %v4148_v25 }
 0x505   : > { %v4240_v3 = vsel %vm4238_vm15, %v4227_v17, 0.0 }
 0x506   : > { %v4251_v26 = vsel %vm4238_vm15, %v4230_v47, 0.0 }
 0x50a   : > { %4351 = vperm.xlu2 %4645, %v4146_v24  }
 0x50b   : > { %4357 = vperm.xlu1 %4646, %v4146_v24  }
 0x512   : > { %4647 = vset.pattern.permute.xlu2 %v6745_v19  ;;  %v4147_v19 = vld [vmem:[%s6981_s10] sm:$0xff] }
 0x513   : > { %v4171_v15 = vpop.permute.xlu0 %4170 }
 0x514   : > { %v4159_v43 = vpop.permute.xlu1 %4158  ;;  %v4195_v12 = vpop.permute.xlu2 %4194  ;;  %v4228_v36 = vmul.f32 %v4171_v15, %v6840_v22 }
 0x515   : > { %v4232_v53 = vmul.f32 %v4195_v12, %v4147_v19  ;;  %v4226_v18 = vmul.f32 %v4159_v43, %v4147_v19 }
 0x516   : > { %v4242_v33 = vsel %vm4238_vm15, %v4228_v36, 0.0 }
 0x517   : > { %v4261_v59 = vsel %vm4238_vm15, %v4232_v53, 0.0  ;;  %v4239_v48 = vsel %vm4238_vm15, %v4226_v18, 0.0 }
 0x518   : > { %v4241_v31 = vadd.f32 %v4240_v3, %v4239_v48 }
 0x51a   : > { %4321 = vperm.xlu2 %4647, %v4118_v51   ;;  %v4243_v61 = vadd.f32 %v4242_v33, %v4241_v31 }
 0x51c   : > { %v4177_v56 = vpop.permute.xlu1 %4176 }
 0x51d   : > { %v4229_v35 = vmul.f32 %v4177_v56, %v4147_v19 }
 0x51f   : > { %v4250_v63 = vsel %vm4238_vm15, %v4229_v35, 0.0 }
 0x520   : > { %v4252_v11 = vadd.f32 %v4251_v26, %v4250_v63 }
 0x52c   : > { %v6827_v6 = vpop.permute.xlu2 %4212  ;;  %v4201_v16 = vpop.permute.xlu0 %4200 }
 0x52d   : > { %v4189_v9 = vpop.permute.xlu1 %4188  ;;  %v4233_v37 = vmul.f32 %v4201_v16, %v4148_v25  ;;  %v4235_v44 = vmul.f32 %v6827_v6, %v4147_v19  ;;  %v6891_v16 = vld [vmem:[%s6982_s11] sm:$0x1] }
 0x52e   : > { %v4231_v32 = vmul.f32 %v4189_v9, %v6840_v22 }
 0x52f   : > { %v4262_v23 = vsel %vm4238_vm15, %v4233_v37, 0.0  ;;  %v4272_v19 = vsel %vm4238_vm15, %v4235_v44, 0.0 }
 0x530   : > { %v4263_v5 = vadd.f32 %v4262_v23, %v4261_v59  ;;  %v4253_v29 = vsel %vm4238_vm15, %v4231_v32, 0.0  ;;  %v4421_v59 = vld [vmem:[%s6886_s20 + $0x2] sm:$0x1] }
 0x531   : > { %v4254_v43 = vadd.f32 %v4253_v29, %v4252_v11 }
 0x535   : > { %v4207_v7 = vpop.permute.xlu1 %4206 }
 0x536   : > { %v4234_v49 = vmul.f32 %v4207_v7, %v6840_v22  ;;  %v4255_v7 = vrot.slane %v4254_v43, 4 }
 0x538   : > { %v4264_v34 = vsel %vm4238_vm15, %v4234_v49, 0.0 }
 0x539   : > { %v4265_v28 = vadd.f32 %v4264_v34, %v4263_v5 }
 0x53b   : > { %v4266_v50 = vrot.slane %v4265_v28, 4 }
 0x53c   : > { %v6829_v54 = vpop.permute.xlu2 %4224  ;;  %v6846_v14 = vpop.permute.xlu0 %4291 }
 0x53d   : > { %v4267_v13 = vadd.f32 %v4266_v50, %v4265_v28  ;;  %v4237_v53 = vmul.f32 %v6829_v54, %v6840_v22  ;;  %v4256_v50 = vadd.f32 %v4255_v7, %v4254_v43 }
 0x53f   : > { %v4268_v57 = vrot.slane %v4267_v13, 2 }
 0x541   : > { %v4269_v60 = vadd.f32 %v4268_v57, %v4267_v13  ;;  %v4359_v13 = vmul.f32 %v6846_v14, %v6853_v20 }
 0x543   : > { %v4270_v39 = vrot.slane %v4269_v60, 1  ;;  %v4371_v14 = vsel %vm4238_vm15, %v4359_v13, 0.0 }
 0x545   : > { %v4219_v30 = vpop.permute.xlu1 %4218  ;;  %v4271_v12 = vadd.f32 %v4270_v39, %v4269_v60 }
 0x546   : > { %v4236_v41 = vmul.f32 %v4219_v30, %v4148_v25  ;;  %v4244_v25 = vrot.slane %v4243_v61, 4 }
 0x547   : > { %v4285_v37 = vadd.f32 %v4271_v12, %v6891_v16 }
 0x548   : > { %v4273_v15 = vsel %vm4238_vm15, %v4236_v41, 0.0  ;;  %v4245_v30 = vadd.f32 %v4244_v25, %v4243_v61 }
 0x549   : > { %v4274_v23 = vadd.f32 %v4273_v15, %v4272_v19 }
 0x54a   : > { %v4246_v57 = vrot.slane %v4245_v30, 2 }
 0x54c   : > { %v6844_v38 = vpop.permute.xlu2 %4309  ;;  %v4334_v27 = vpop.permute.xlu0 %4333  ;;  %v4247_v32 = vadd.f32 %v4246_v57, %v4245_v30 }
 0x54d   : > { %v4366_v10 = vmul.f32 %v4334_v27, %v6858_v62  ;;  %v4298_v46 = vpop.permute.xlu1 %4297  ;;  %v4275_v27 = vsel %vm4238_vm15, %v4237_v53, 0.0 }
 0x54e   : > { %v4276_v22 = vadd.f32 %v4275_v27, %v4274_v23  ;;  %v4248_v39 = vrot.slane %v4247_v32, 1 }
 0x54f   : > { %v4394_v52 = vsel %vm4238_vm15, %v4366_v10, 0.0 }
 0x550   : > { %v4249_v12 = vadd.f32 %v4248_v39, %v4247_v32 }
 0x552   : > { %v4283_v53 = vadd.f32 %v4249_v12, %v6891_v16 }
 0x554   : > { %v4328_v55 = vpop.permute.xlu2 %4327 }
 0x555   : > { %v4365_v2 = vmul.f32 %v4328_v55, %v6853_v20  ;;  %v4316_v0 = vpop.permute.xlu1 %4315  ;;  %v4362_v55 = vmul.f32 %v6844_v38, %v6853_v20 }
 0x556   : > { %v4363_v5 = vmul.f32 %v4316_v0, %v6858_v62 }
 0x557   : > { %v4393_v42 = vsel %vm4238_vm15, %v4365_v2, 0.0  ;;  %v4360_v2 = vmul.f32 %v4298_v46, %v6858_v62 }
 0x558   : > { %v4395_v58 = vadd.f32 %v4394_v52, %v4393_v42  ;;  %v4383_v10 = vsel %vm4238_vm15, %v4363_v5, 0.0  ;;  %v4257_v42 = vrot.slane %v4256_v50, 2  ;;  %v4277_v52 = vrot.slane %v4276_v22, 4 }
 0x559   : > { %v4372_v38 = vsel %vm4238_vm15, %v4360_v2, 0.0 }
 0x55a   : > { %v4258_v47 = vadd.f32 %v4257_v42, %v4256_v50  ;;  %v4278_v36 = vadd.f32 %v4277_v52, %v4276_v22  ;;  %v4422_v42 = vld [vmem:[%s6886_s20 + $0x3] sm:$0x1] }
 0x55c   : > { %v4340_v8 = vpop.permute.xlu0 %4339  ;;  %v4259_v31 = vrot.slane %v4258_v47, 1  ;;  %v4279_v0 = vrot.slane %v4278_v36, 2 }
 0x55d   : > { %v4367_v21 = vmul.f32 %v4340_v8, %v6865_v40  ;;  %v4382_v8 = vsel %vm4238_vm15, %v4362_v55, 0.0 }
 0x55e   : > { %v4280_v15 = vadd.f32 %v4279_v0, %v4278_v36 }
 0x55f   : > { %v4396_v45 = vsel %vm4238_vm15, %v4367_v21, 0.0  ;;  %v4384_v21 = vadd.f32 %v4383_v10, %v4382_v8 }
 0x560   : > { %v4397_v1 = vadd.f32 %v4396_v45, %v4395_v58  ;;  %v4373_v45 = vadd.f32 %v4372_v38, %v4371_v14  ;;  %v4281_v23 = vrot.slane %v4280_v15, 1 }
 0x562   : > { %v4398_v4 = vrot.slane %v4397_v1, 4  ;;  %v4282_v55 = vadd.f32 %v4281_v23, %v4280_v15 }
 0x564   : > { %v4399_v51 = vadd.f32 %v4398_v4, %v4397_v1  ;;  %v4352_v6 = vpop.permute.xlu2 %4351  ;;  %v4286_v13 = vadd.f32 %v4282_v55, %v6891_v16 }
 0x565   : > { %v4346_v34 = vpop.permute.xlu1 %4345  ;;  %v4369_v60 = vmul.f32 %v4352_v6, %v6858_v62 }
 0x566   : > { %v4400_v24 = vrot.slane %v4399_v51, 2  ;;  %v4368_v1 = vmul.f32 %v4346_v34, %v6853_v20  ;;  %v4260_v20 = vadd.f32 %v4259_v31, %v4258_v47 }
 0x568   : > { %v4401_v56 = vadd.f32 %v4400_v24, %v4399_v51  ;;  %v4405_v51 = vsel %vm4238_vm15, %v4369_v60, 0.0  ;;  %v4404_v11 = vsel %vm4238_vm15, %v4368_v1, 0.0  ;;  %v4284_v6 = vadd.f32 %v4260_v20, %v6891_v16 }
 0x569   : > { %v4406_v61 = vadd.f32 %v4405_v51, %v4404_v11 }
 0x56a   : > { %v4402_v9 = vrot.slane %v4401_v56, 1 }
 0x56c   : > { %v4403_v49 = vadd.f32 %v4402_v9, %v4401_v56 }
 0x56e   : > { %v4417_v28 = vadd.f32 %v4403_v49, %v4285_v37  ;;  %v4420_v49 = vld [vmem:[%s6886_s20 + $0x1] sm:$0x1] }
 0x570   : > { %v4425_v54 = vadd.f32 %v4421_v59, %v4417_v28  ;;  %v4419_v28 = vld [vmem:[%s6886_s20] sm:$0x1] }
 0x572   : > { %4430 = vst.msk [vmem:[%s6908_s15 + $0x2] sm:$0x1] %vm4427_vm0, %v4425_v54 }
 0x574   : > { %v4322_v18 = vpop.permute.xlu2 %4321 }
 0x575   : > { %v4364_v46 = vmul.f32 %v4322_v18, %v6865_v40  ;;  %v4304_v17 = vpop.permute.xlu1 %4303 }
 0x576   : > { %v4361_v58 = vmul.f32 %v4304_v17, %v6865_v40 }
 0x577   : > { %v4385_v35 = vsel %vm4238_vm15, %v4364_v46, 0.0 }
 0x578   : > { %v4386_v48 = vadd.f32 %v4385_v35, %v4384_v21  ;;  %v4374_v3 = vsel %vm4238_vm15, %v4361_v58, 0.0 }
 0x579   : > { %v4375_v4 = vadd.f32 %v4374_v3, %v4373_v45 }
 0x57a   : > { %v4387_v63 = vrot.slane %v4386_v48, 4 }
 0x57b   : > { %v4376_v29 = vrot.slane %v4375_v4, 4 }
 0x57c   : > { %v4388_v26 = vadd.f32 %v4387_v63, %v4386_v48 }
 0x57d   : > { %v4377_v41 = vadd.f32 %v4376_v29, %v4375_v4  ;;  %v4358_v24 = vpop.permute.xlu1 %4357 }
 0x57e   : > { %v4389_v33 = vrot.slane %v4388_v26, 2  ;;  %v4370_v62 = vmul.f32 %v4358_v24, %v6865_v40 }
 0x57f   : > { %v4378_v44 = vrot.slane %v4377_v41, 2 }
 0x580   : > { %v4390_v43 = vadd.f32 %v4389_v33, %v4388_v26  ;;  %v4407_v56 = vsel %vm4238_vm15, %v4370_v62, 0.0 }
 0x581   : > { %v4379_v25 = vadd.f32 %v4378_v44, %v4377_v41  ;;  %v4408_v7 = vadd.f32 %v4407_v56, %v4406_v61 }
 0x582   : > { %v4391_v9 = vrot.slane %v4390_v43, 1 }
 0x583   : > { %v4380_v37 = vrot.slane %v4379_v25, 1  ;;  %v4409_v40 = vrot.slane %v4408_v7, 4 }
 0x584   : > { %v4392_v19 = vadd.f32 %v4391_v9, %v4390_v43 }
 0x585   : > { %v4381_v34 = vadd.f32 %v4380_v37, %v4379_v25  ;;  %v4410_v5 = vadd.f32 %v4409_v40, %v4408_v7 }
 0x586   : > { %v4416_v59 = vadd.f32 %v4392_v19, %v4284_v6 }
 0x587   : > { %v4415_v50 = vadd.f32 %v4381_v34, %v4283_v53  ;;  %v4411_v27 = vrot.slane %v4410_v5, 2 }
 0x588   : > { %v4424_v30 = vadd.f32 %v4420_v49, %v4416_v59 }
 0x589   : > { %v4423_v2 = vadd.f32 %v4419_v28, %v4415_v50  ;;  %v4412_v54 = vadd.f32 %v4411_v27, %v4410_v5 }
 0x58a   : > { %4429 = vst.msk [vmem:[%s6908_s15 + $0x1] sm:$0x1] %vm4427_vm0, %v4424_v30 }
 0x58b   : > { %4428 = vst.msk [vmem:[%s6908_s15] sm:$0x1] %vm4427_vm0, %v4423_v2  ;;  %v4413_v22 = vrot.slane %v4412_v54, 1 }
 0x58d   : > { %v4414_v10 = vadd.f32 %v4413_v22, %v4412_v54 }
 0x58f   : > { %v4418_v18 = vadd.f32 %v4414_v10, %v4286_v13 }
 0x591   : > { %v4426_v57 = vadd.f32 %v4422_v42, %v4418_v18 }
 0x593   : > { %4431 = vst.msk [vmem:[%s6908_s15 + $0x3] sm:$0x1] %vm4427_vm0, %v4426_v57 }
 0x594   : > { %4695 = shalt.err (!%p4692_p3)
}
 0x595   : > { %s4733_s17 = smov 16   ;;  %s4734_s15 = smov 1  }
 0x596   : > { %4534 = dma.vmem_to_hbm [thread:$0]  (%p4838_p5), %s4445_s29, 64, %s4447_s25, %s4433_s26, %s4733_s17, %s4733_s17, %s4734_s15  }
 0x597 PF: > { %p4540_p4 = scmp.ge.s32.totalorder %s4730_s24, 2  ;;  %s4461_s0 = sand.u32 1, %s4718_s21  }
 0x598   : > { %s4462_s1 = scalar_lea.sflag [#allocation3], %s4461_s0 }
 0x599   : > { %p4537_p7 = pnand %p4540_p4, %p4842_p6 }
 0x59b   : > { %p4538_p8 = pneg %p4537_p7 }
 0x59d   : > { %4713 = dma.done.wait (%p4538_p8), %s4462_s1, 64  }
 0x59e   : > { %4715 = vsyncadd (%p4538_p8), %s4462_s1, 4294967232  ;;  %p22_p9 = scmp.ge.s32.totalorder %s4825_s27, 4   ;;  %s7094_s21 = smov %s4722_s22 }
 0x59f   : > { %s7095_s22 = smov %s4726_s23  ;;  %s7096_s23 = smov %s4836_s30 }
 0x5a0   : > { %s7097_s24 = smov %s4825_s27  ;;  %24 = sbr.rel (!%p22_p9) target bundleno = 6 (0x6), region = 106 }
 0x5a5   :  { %4468 = vsyncpa [#allocation3], 1 }
 0x5a6   :  { %4470 = vsyncpa [#allocation3 + $0x1], 1 }

</bundles_post_ra>
